<compile_context>
chip_gen: v7x
topology: tpu7x:2x2x1
jax: 0.10.0
libtpu: 0.0.40
codegen_flags: <defaults>
</compile_context>

<pallas_src>
import numpy as np
import jax
import jax.numpy as jnp
from jax.experimental import pallas as pl
from jax.experimental.pallas import tpu as pltpu

# ----------------------------- constants ------------------------------------
SR = 16000
N_FFT = 1024
HOP = 160
N_MELS = 64
F_MIN = 60.0
F_MAX = 7800.0
N_FREQS = N_FFT // 2 + 1          # 513 onesided bins
F_USE = 512                       # exact truncation (bins >= 500 carry zero mel weight)
AMIN = 1e-10
TOP_DB = 80.0
CLAMP_LO, CLAMP_HI = -50.0, 80.0
SCALE_MIN, SCALE_MAX = -79.6482, 50.6842


def _hz_to_mel_htk(f):
    return 2595.0 * np.log10(1.0 + np.asarray(f, dtype=np.float64) / 700.0)


def _mel_to_hz_htk(m):
    return 700.0 * (10.0 ** (np.asarray(m, dtype=np.float64) / 2595.0) - 1.0)


def _melscale_fbanks():
    """torchaudio.functional.melscale_fbanks (htk, norm=None) -> (n_freqs, n_mels)."""
    all_freqs = np.linspace(0.0, SR // 2, N_FREQS)
    m_min, m_max = _hz_to_mel_htk(F_MIN), _hz_to_mel_htk(F_MAX)
    m_pts = np.linspace(m_min, m_max, N_MELS + 2)
    f_pts = _mel_to_hz_htk(m_pts)
    f_diff = f_pts[1:] - f_pts[:-1]                       # (n_mels+1,)
    slopes = f_pts[None, :] - all_freqs[:, None]          # (n_freqs, n_mels+2)
    down = -slopes[:, :-2] / f_diff[:-1]
    up = slopes[:, 2:] / f_diff[1:]
    fb = np.maximum(0.0, np.minimum(down, up))
    return fb                                             # (513, 64) float64


def _build_constants():
    # periodic hann window (torch.hann_window default), folded into the DFT matrices
    n = np.arange(N_FFT, dtype=np.float64)
    window = 0.5 * (1.0 - np.cos(2.0 * np.pi * n / N_FFT))          # (n_fft,)

    k = np.arange(F_USE, dtype=np.float64)
    ang = 2.0 * np.pi * np.outer(k, n) / N_FFT                      # (F_USE, n_fft)
    cos_t = np.cos(ang) * window[None, :]
    sin_t = np.sin(ang) * window[None, :]
    # single fused DFT matrix, transposed layout: rows 0..511 = re, 512..1023 = im.
    # bf16 inputs, f32 accumulation (review item); dB-domain error vs f32 is ~0.03 dB.
    cs = np.concatenate([cos_t, sin_t], axis=0).astype(np.float32)  # (2*F_USE, n_fft)

    fb_t = _melscale_fbanks()[:F_USE, :].T.astype(np.float32)       # (n_mels, F_USE)

    # TODO(synk): optional DFT-symmetry fold (x[n]±x[N-n] built in the gather) would halve
    # the MXU FLOPs of the dominant matmul; skipped here to keep the single fused dot.
    return jnp.asarray(cs, dtype=jnp.bfloat16), jnp.asarray(fb_t)


# ----------------------------- kernels --------------------------------------
def mel_db_kernel(frames_ref, cs_ref, fb_ref, db_ref, tmax_ref):
    """Per (batch, frame-tile): windowed |rFFT|^2 -> mel -> 10*log10, plus per-tile max.

    Transposed layout: features on sublanes, TM frames on lanes. bf16 in, f32 accumulate.
    """
    x = frames_ref[0]                                                 # (n_fft, TM) bf16
    y = jnp.dot(cs_ref[...], x, preferred_element_type=jnp.float32)  # (2*F_USE, TM) f32
    re = y[:F_USE, :]
    im = y[F_USE:, :]
    power = re * re + im * im                                         # (F_USE, TM)
    mel = jnp.dot(fb_ref[...], power,
                  preferred_element_type=jnp.float32)                 # (n_mels, TM)

    # AmplitudeToDB (power, ref=1): 10*log10(clamp(x, amin))
    db = 10.0 * jnp.log10(jnp.maximum(mel, AMIN))
    db_ref[0] = db                                                    # (n_mels, TM)
    tmax_ref[0] = jnp.max(db, axis=0, keepdims=True)                  # (1, TM)


def finalize_kernel(db_ref, gmax_ref, out_ref):
    """top_db flooring (global max), clamp(-50, 80), MinMax scale. Tiled over (B, time)."""
    gmax = gmax_ref[0, 0]
    x = db_ref[0]                                                     # (n_mels, TM)
    x = jnp.maximum(x, gmax - TOP_DB)
    x = jnp.clip(x, CLAMP_LO, CLAMP_HI)
    out_ref[0] = (x - SCALE_MIN) / (SCALE_MAX - SCALE_MIN) * 2.0 - 1.0


# ----------------------------- wrapper --------------------------------------
def _round_up(x, m):
    return ((x + m - 1) // m) * m


def _pick_tm(batch, n_frames):
    """Frame-tile width: big enough to amortize grid overhead, small enough that the
    'parallel' grid has >= 2 points (keeps both v7x TensorCores busy on short clips)."""
    tm = min(512, _round_up(n_frames, 128))
    while tm > 128 and batch * ((n_frames + tm - 1) // tm) < 2:
        tm //= 2
    return tm


def atst_mel(audio, consts):
    """audio: (B, N) float32  ->  (B, 1, n_mels, n_frames) float32."""
    cs, fb_t = consts
    B, N = audio.shape
    T = 1 + N // HOP
    pad = N_FFT // 2
    tm = _pick_tm(B, T)
    T_pad = _round_up(T, tm)
    n_t = T_pad // tm

    # glue: center reflect-pad + frame gather directly in transposed layout (B, n_fft, T),
    # emitted in bf16 to halve the gather's HBM traffic (and feed the bf16 MXU matmul).
    # Pad frames beyond T with zeros (they produce db == -100 and never affect the max).
    # TODO(synk): replace this XLA gather with in-kernel HBM DMA framing (memory_space=pl.ANY,
    # contiguous HOP*TM+N_FFT span per tile) to kill the ~6.4x HBM inflation, mainly for v5e.
    padded = jnp.pad(audio.astype(jnp.bfloat16), ((0, 0), (pad, pad)), mode="reflect")
    idx = HOP * jnp.arange(T)[None, :] + jnp.arange(N_FFT)[:, None]   # (n_fft, T)
    frames_t = padded[:, idx]                                          # (B, n_fft, T) bf16
    frames_t = jnp.pad(frames_t, ((0, 0), (0, 0), (0, T_pad - T)))     # (B, n_fft, T_pad)

    db_t, tmax = pl.pallas_call(
        mel_db_kernel,
        out_shape=(jax.ShapeDtypeStruct((B, N_MELS, T_pad), jnp.float32),
                   jax.ShapeDtypeStruct((B, 1, T_pad), jnp.float32)),
        grid_spec=pltpu.PrefetchScalarGridSpec(
            num_scalar_prefetch=0,
            grid=(B, n_t),
            in_specs=[
                pl.BlockSpec((1, N_FFT, tm), lambda b, t: (b, 0, t)),
                # TODO(synk): constant operands are only DMA'd once but still double-buffered;
                # pipeline_mode=pl.Buffered(1) would save ~2 MiB VMEM if needed for larger TM.
                pl.BlockSpec((2 * F_USE, N_FFT), lambda b, t: (0, 0)),
                pl.BlockSpec((N_MELS, F_USE), lambda b, t: (0, 0)),
            ],
            out_specs=[
                pl.BlockSpec((1, N_MELS, tm), lambda b, t: (b, 0, t)),
                pl.BlockSpec((1, 1, tm), lambda b, t: (b, 0, t)),
            ],
        ),
        compiler_params=pltpu.CompilerParams(
            dimension_semantics=("parallel", "parallel"),
            vmem_limit_bytes=32 << 20,
        ),
    )(frames_t, cs, fb_t)

    # Tiny reduction of the per-tile maxes. torchaudio's top_db for 3-D input uses the max
    # over the whole (B, n_mels, T) tensor; pad lanes hold exactly -100 dB (the floor of
    # 10*log10(amin)), so including them never changes the max.
    gmax = jnp.max(tmax).reshape(1, 1)

    out = pl.pallas_call(
        finalize_kernel,
        out_shape=jax.ShapeDtypeStruct((B, N_MELS, T_pad), jnp.float32),
        grid_spec=pltpu.PrefetchScalarGridSpec(
            num_scalar_prefetch=0,
            grid=(B, n_t),
            in_specs=[
                pl.BlockSpec((1, N_MELS, tm), lambda b, t: (b, 0, t)),
                pl.BlockSpec(memory_space=pltpu.MemorySpace.SMEM),
            ],
            out_specs=pl.BlockSpec((1, N_MELS, tm), lambda b, t: (b, 0, t)),
        ),
        input_output_aliases={0: 0},   # write the scaled result in place of db_t
        compiler_params=pltpu.CompilerParams(
            dimension_semantics=("parallel", "parallel"),
            vmem_limit_bytes=32 << 20,
        ),
    )(db_t, gmax)

    # glue: drop frame padding + unsqueeze(1) -> (B, 1, n_mels, T). No transpose needed.
    return out[:, None, :, :T]


# ----------------------------- main -----------------------------------------
if __name__ == "__main__":
    B = 2
    N = 2400                      # 0.15 s @ 16 kHz -> n_frames = 1 + 2400//160 = 16
    key = jax.random.PRNGKey(0)
    audio = jax.random.normal(key, (B, N), dtype=jnp.float32)

    consts = _build_constants()
    fwd = jax.jit(lambda a: atst_mel(a, consts))
    spec = fwd(audio)
    jax.block_until_ready(spec)

    assert spec.shape == (B, 1, N_MELS, 1 + N // HOP), spec.shape
    assert spec.dtype == jnp.float32
    assert bool(jnp.isfinite(spec).all())
    print("KERNEL_OK")
</pallas_src>

<mosaic_0001>
module attributes {stable_mosaic.version = 11 : i64} {
  func.func @finalize_kernel(%arg0: i32, %arg1: i32, %arg2: memref<1x64x128xf32, #tpu.memory_space<vmem>>, %arg3: memref<1x1xf32, #tpu.memory_space<smem>>, %arg4: memref<1x64x128xf32, #tpu.memory_space<vmem>>) attributes {dimension_semantics = [#tpu.dimension_semantics<parallel>, #tpu.dimension_semantics<parallel>], iteration_bounds = array<i64: 2, 1>, scalar_prefetch = 0 : i64, scratch_operands = 0 : i64, tpu.core_type = #tpu.core_type<tc>, window_params = [{transform_indices = @transform_0, window_bounds = array<i64: 1, 64, 128>}, {transform_indices = @transform_1, window_bounds = array<i64: 1, 1>}, {transform_indices = @transform_2, window_bounds = array<i64: 1, 64, 128>}]} {
    %c0 = arith.constant 0 : index
    %c0_0 = arith.constant 0 : index
    %0 = memref.load %arg3[%c0, %c0_0] : memref<1x1xf32, #tpu.memory_space<smem>>
    %c0_1 = arith.constant 0 : index
    %c0_2 = arith.constant 0 : index
    %c0_3 = arith.constant 0 : index
    %1 = vector.load %arg2[%c0_1, %c0_2, %c0_3] : memref<1x64x128xf32, #tpu.memory_space<vmem>>, vector<1x64x128xf32>
    %2 = vector.shape_cast %1 : vector<1x64x128xf32> to vector<64x128xf32>
    %cst = arith.constant 8.000000e+01 : f32
    %3 = arith.subf %0, %cst : f32
    %4 = vector.broadcast %3 : f32 to vector<64x128xf32>
    %5 = arith.maximumf %2, %4 : vector<64x128xf32>
    %cst_4 = arith.constant -5.000000e+01 : f32
    %cst_5 = arith.constant 8.000000e+01 : f32
    %6 = vector.broadcast %cst_4 : f32 to vector<64x128xf32>
    %7 = arith.maximumf %6, %5 : vector<64x128xf32>
    %8 = vector.broadcast %cst_5 : f32 to vector<64x128xf32>
    %9 = arith.minimumf %8, %7 : vector<64x128xf32>
    %cst_6 = arith.constant -7.964820e+01 : f32
    %10 = vector.broadcast %cst_6 : f32 to vector<64x128xf32>
    %11 = arith.subf %9, %10 : vector<64x128xf32>
    %cst_7 = arith.constant 130.332397 : f32
    %12 = vector.broadcast %cst_7 : f32 to vector<64x128xf32>
    %13 = arith.divf %11, %12 : vector<64x128xf32>
    %cst_8 = arith.constant 2.000000e+00 : f32
    %14 = vector.broadcast %cst_8 : f32 to vector<64x128xf32>
    %15 = arith.mulf %13, %14 : vector<64x128xf32>
    %cst_9 = arith.constant 1.000000e+00 : f32
    %16 = vector.broadcast %cst_9 : f32 to vector<64x128xf32>
    %17 = arith.subf %15, %16 : vector<64x128xf32>
    %c0_10 = arith.constant 0 : index
    %c0_11 = arith.constant 0 : index
    %c0_12 = arith.constant 0 : index
    %18 = vector.load %arg4[%c0_10, %c0_11, %c0_12] : memref<1x64x128xf32, #tpu.memory_space<vmem>>, vector<1x64x128xf32>
    %19 = vector.shape_cast %18 : vector<1x64x128xf32> to vector<64x128xf32>
    %20 = vector.shape_cast %17 : vector<64x128xf32> to vector<1x64x128xf32>
    tpu.vector_store %arg4[%c0_10, %c0_11, %c0_12], %20 {strides = array<i32>} : memref<1x64x128xf32, #tpu.memory_space<vmem>>, vector<1x64x128xf32>,
    return
  }
  func.func @transform_0(%arg0: i32, %arg1: i32) -> (i32, i32, i32) {
    %c0_i32 = arith.constant 0 : i32
    %c0_i32_0 = arith.constant 0 : i32
    return %arg0, %c0_i32, %arg1 : i32, i32, i32
  }
  func.func @transform_1(%arg0: i32, %arg1: i32) -> (i32, i32) {
    %c0_i32 = arith.constant 0 : i32
    %c0_i32_0 = arith.constant 0 : i32
    %c0_i32_1 = arith.constant 0 : i32
    return %c0_i32, %c0_i32_0 : i32, i32
  }
  func.func @transform_2(%arg0: i32, %arg1: i32) -> (i32, i32, i32) {
    %c0_i32 = arith.constant 0 : i32
    %c0_i32_0 = arith.constant 0 : i32
    return %arg0, %c0_i32, %arg1 : i32, i32, i32
  }
}

module attributes {stable_mosaic.version = 11 : i64} {
  func.func @mel_db_kernel(%arg0: i32, %arg1: i32, %arg2: memref<1x1024x128xbf16, #tpu.memory_space<vmem>>, %arg3: memref<1024x1024xbf16, #tpu.memory_space<vmem>>, %arg4: memref<64x512xf32, #tpu.memory_space<vmem>>, %arg5: memref<1x64x128xf32, #tpu.memory_space<vmem>>, %arg6: memref<1x1x128xf32, #tpu.memory_space<vmem>>) attributes {dimension_semantics = [#tpu.dimension_semantics<parallel>, #tpu.dimension_semantics<parallel>], iteration_bounds = array<i64: 2, 1>, scalar_prefetch = 0 : i64, scratch_operands = 0 : i64, tpu.core_type = #tpu.core_type<tc>, window_params = [{transform_indices = @transform_0, window_bounds = array<i64: 1, 1024, 128>}, {pipeline_mode = #tpu.pipeline_mode<synchronous>, transform_indices = @transform_1, window_bounds = array<i64: 1024, 1024>}, {pipeline_mode = #tpu.pipeline_mode<synchronous>, transform_indices = @transform_2, window_bounds = array<i64: 64, 512>}, {transform_indices = @transform_3, window_bounds = array<i64: 1, 64, 128>}, {transform_indices = @transform_4, window_bounds = array<i64: 1, 1, 128>}]} {
    %c0 = arith.constant 0 : index
    %c0_0 = arith.constant 0 : index
    %c0_1 = arith.constant 0 : index
    %0 = vector.load %arg2[%c0, %c0_0, %c0_1] : memref<1x1024x128xbf16, #tpu.memory_space<vmem>>, vector<1x1024x128xbf16>
    %1 = vector.shape_cast %0 : vector<1x1024x128xbf16> to vector<1024x128xbf16>
    %c0_2 = arith.constant 0 : index
    %c0_3 = arith.constant 0 : index
    %2 = vector.load %arg3[%c0_2, %c0_3] : memref<1024x1024xbf16, #tpu.memory_space<vmem>>, vector<1024x1024xbf16>
    %cst = arith.constant dense<0.000000e+00> : vector<1024x128xf32>
    %3 = tpu.matmul %2, %1, %cst {dimension_numbers = #tpu.dot_dimension_numbers<[1], [0], [0], [1], [0, 0, 1, 1], [], []>} : vector<1024x1024xbf16>, vector<1024x128xbf16>, vector<1024x128xf32> -> vector<1024x128xf32>
    %4 = vector.extract_strided_slice %3 {offsets = [0, 0], sizes = [512, 128], strides = [1, 1]} : vector<1024x128xf32> to vector<512x128xf32>
    %5 = vector.extract_strided_slice %3 {offsets = [512, 0], sizes = [512, 128], strides = [1, 1]} : vector<1024x128xf32> to vector<512x128xf32>
    %6 = arith.mulf %4, %4 : vector<512x128xf32>
    %7 = arith.mulf %5, %5 : vector<512x128xf32>
    %8 = arith.addf %6, %7 : vector<512x128xf32>
    %c0_4 = arith.constant 0 : index
    %c0_5 = arith.constant 0 : index
    %9 = vector.load %arg4[%c0_4, %c0_5] : memref<64x512xf32, #tpu.memory_space<vmem>>, vector<64x512xf32>
    %cst_6 = arith.constant dense<0.000000e+00> : vector<64x128xf32>
    %10 = tpu.matmul %9, %8, %cst_6 {dimension_numbers = #tpu.dot_dimension_numbers<[1], [0], [0], [1], [0, 0, 1, 1], [], []>} : vector<64x512xf32>, vector<512x128xf32>, vector<64x128xf32> -> vector<64x128xf32>
    %cst_7 = arith.constant 1.000000e-10 : f32
    %11 = vector.broadcast %cst_7 : f32 to vector<64x128xf32>
    %12 = arith.maximumf %10, %11 : vector<64x128xf32>
    %13 = math.log %12 : vector<64x128xf32>
    %cst_8 = arith.constant 0.434294492 : f32
    %14 = vector.broadcast %cst_8 : f32 to vector<64x128xf32>
    %15 = arith.mulf %13, %14 : vector<64x128xf32>
    %cst_9 = arith.constant 1.000000e+01 : f32
    %16 = vector.broadcast %cst_9 : f32 to vector<64x128xf32>
    %17 = arith.mulf %16, %15 : vector<64x128xf32>
    %c0_10 = arith.constant 0 : index
    %c0_11 = arith.constant 0 : index
    %c0_12 = arith.constant 0 : index
    %18 = vector.load %arg5[%c0_10, %c0_11, %c0_12] : memref<1x64x128xf32, #tpu.memory_space<vmem>>, vector<1x64x128xf32>
    %19 = vector.shape_cast %18 : vector<1x64x128xf32> to vector<64x128xf32>
    %20 = vector.shape_cast %17 : vector<64x128xf32> to vector<1x64x128xf32>
    tpu.vector_store %arg5[%c0_10, %c0_11, %c0_12], %20 {strides = array<i32>} : memref<1x64x128xf32, #tpu.memory_space<vmem>>, vector<1x64x128xf32>,
    %cst_13 = arith.constant dense<0xFF800000> : vector<128xf32>
    %21 = vector.multi_reduction <maximumf>, %17, %cst_13 [0] : vector<64x128xf32> to vector<128xf32>
    %22 = vector.shape_cast %21 : vector<128xf32> to vector<1x128xf32>
    %c0_14 = arith.constant 0 : index
    %c0_15 = arith.constant 0 : index
    %c0_16 = arith.constant 0 : index
    %23 = vector.load %arg6[%c0_14, %c0_15, %c0_16] : memref<1x1x128xf32, #tpu.memory_space<vmem>>, vector<1x1x128xf32>
    %24 = vector.shape_cast %23 : vector<1x1x128xf32> to vector<1x128xf32>
    %25 = vector.shape_cast %22 : vector<1x128xf32> to vector<1x1x128xf32>
    tpu.vector_store %arg6[%c0_14, %c0_15, %c0_16], %25 {strides = array<i32>} : memref<1x1x128xf32, #tpu.memory_space<vmem>>, vector<1x1x128xf32>,
    return
  }
  func.func @transform_0(%arg0: i32, %arg1: i32) -> (i32, i32, i32) {
    %c0_i32 = arith.constant 0 : i32
    %c0_i32_0 = arith.constant 0 : i32
    return %arg0, %c0_i32, %arg1 : i32, i32, i32
  }
  func.func @transform_1(%arg0: i32, %arg1: i32) -> (i32, i32) {
    %c0_i32 = arith.constant 0 : i32
    %c0_i32_0 = arith.constant 0 : i32
    %c0_i32_1 = arith.constant 0 : i32
    return %c0_i32, %c0_i32_0 : i32, i32
  }
  func.func @transform_2(%arg0: i32, %arg1: i32) -> (i32, i32) {
    %c0_i32 = arith.constant 0 : i32
    %c0_i32_0 = arith.constant 0 : i32
    %c0_i32_1 = arith.constant 0 : i32
    return %c0_i32, %c0_i32_0 : i32, i32
  }
  func.func @transform_3(%arg0: i32, %arg1: i32) -> (i32, i32, i32) {
    %c0_i32 = arith.constant 0 : i32
    %c0_i32_0 = arith.constant 0 : i32
    return %arg0, %c0_i32, %arg1 : i32, i32, i32
  }
  func.func @transform_4(%arg0: i32, %arg1: i32) -> (i32, i32, i32) {
    %c0_i32 = arith.constant 0 : i32
    %c0_i32_0 = arith.constant 0 : i32
    return %arg0, %c0_i32, %arg1 : i32, i32, i32
  }
}

</mosaic_0001>

<bundles_post_ra>
// kernel: _lambda_.3
= control target key start
LH: loop header
LB: loop body
LE: loop exit
PB: predicated region body
PF: predicated region fallthrough
CT: control target
= control target key end

     0   :  { %s431_s11 = smov 0   ;;  %s433_s12 = smov 0   ;;  %s471_s0 = inlined_call_operand.vmem [shape: f32[2,64,128], index: 0, kind: input, shape index: {}, may-alias: {0,2}]   ;;  %s472_s1 = inlined_call_operand.<no memory space> [shape: f32[1,1], index: 1, kind: input, shape index: {}]   ;;  %s473_s2 = inlined_call_operand.vmem [shape: f32[2,64,128], index: 2, kind: output, shape index: {}, may-alias: {0,2}]  }
   0x1   :  { %7 = sst [smem:[#allocation2]] %s472_s1  ;;  %s435_s13 = smov 0  }
   0x2 LB: > { %s25_s1 = sadd.s32 1, %s407_s12  ;;  %p339_p0 = scmp.ge.s32.totalorder %s411_s13, 1  ;;  %s411_s13 = sphi %s435_s13, %s13_s13   ;;  %s407_s12 = sphi %s433_s12, %s475_s12   ;;  %s403_s11 = sphi %s431_s11, %s474_s11  }
   0x3   : > { %p27_p1 = scmp.ge.s32.totalorder %s25_s1, 2  ;;  %p132_p2 = scmp.lt.s32.totalorder %s411_s13, 3 }
   0x5   : > { %s477_s1 = smov (%p27_p1, %s25_s1), 0  ;;  %p133_p3 = pnand %p339_p0, %p132_p2 }
   0x6   : > { %p160_p4 = scmp.lt.s32.totalorder (!%p133_p3), %s403_s11, 1  ;;  %s176_s14 = sld [smem:[#allocation2]] (!%p133_p3) }
   0x7   : > { %136 = sbr.rel (%p133_p3) target bundleno = 37 (0x25), region = 28 }
   0xc   : > { %s344_s19 = sadd.f32 (!%p133_p3), -80.0, %s176_s14 }
   0xe   : > { %s479_s11 = smov (!%p160_p4, %s403_s11), 1  ;;  %v186_v8 = vstv %s344_s19 }
   0xf   : > { %s363_s15 = sshll.u32 %s479_s11, 6 }
  0x10   : > { %s167_s18 = scalar_lea.vmem %s471_s0, %s363_s15  ;;  %s175_s22 = scalar_lea.vmem %s473_s2, %s363_s15 }
  0x11   : > { %v177_v0 = vld [vmem:[%s167_s18] sm:$0xff]  ;;  %v178_v1 = vld [vmem:[%s167_s18 + $0x8] sm:$0xff]  ;;  %v179_v2 = vld [vmem:[%s167_s18 + $0x10] sm:$0xff] }
  0x12   : > { %v180_v3 = vld [vmem:[%s167_s18 + $0x18] sm:$0xff]  ;;  %v181_v4 = vld [vmem:[%s167_s18 + $0x20] sm:$0xff]  ;;  %v182_v5 = vld [vmem:[%s167_s18 + $0x28] sm:$0xff]  ;;  %v187_v9 = vmax.f32 %v177_v0, %v186_v8  ;;  %v188_v10 = vmax.f32 %v178_v1, %v186_v8  ;;  %v189_v11 = vmax.f32 %v179_v2, %v186_v8 }
  0x13   : > { %v183_v6 = vld [vmem:[%s167_s18 + $0x30] sm:$0xff]  ;;  %v184_v7 = vld [vmem:[%s167_s18 + $0x38] sm:$0xff]  ;;  %v190_v12 = vmax.f32 %v180_v3, %v186_v8  ;;  %v191_v13 = vmax.f32 %v181_v4, %v186_v8  ;;  %v192_v14 = vmax.f32 %v182_v5, %v186_v8 }
  0x14   : > { %v193_v15 = vmax.f32 %v183_v6, %v186_v8  ;;  %v194_v16 = vmax.f32 %v184_v7, %v186_v8  ;;  %v195_v17 = vmax.f32 %v187_v9, -50.0  ;;  %v196_v18 = vmax.f32 %v188_v10, -50.0 }
  0x15   : > { %v197_v19 = vmax.f32 %v189_v11, -50.0  ;;  %v198_v20 = vmax.f32 %v190_v12, -50.0  ;;  %v199_v21 = vmax.f32 %v191_v13, -50.0  ;;  %v200_v22 = vmax.f32 %v192_v14, -50.0 }
  0x16   : > { %v201_v23 = vmax.f32 %v193_v15, -50.0  ;;  %v202_v24 = vmax.f32 %v194_v16, -50.0  ;;  %v203_v25 = vmin.f32 %v195_v17, 80.0  ;;  %v204_v26 = vmin.f32 %v196_v18, 80.0 }
  0x17   : > { %v205_v27 = vmin.f32 %v197_v19, 80.0  ;;  %v206_v28 = vmin.f32 %v198_v20, 80.0  ;;  %v207_v29 = vmin.f32 %v199_v21, 80.0  ;;  %v208_v30 = vmin.f32 %v200_v22, 80.0 }
  0x18   : > { %v209_v31 = vmin.f32 %v201_v23, 80.0  ;;  %v210_v32 = vmin.f32 %v202_v24, 80.0  ;;  %v345_v33 = vadd.f32 79.6482, %v203_v25  ;;  %v346_v34 = vadd.f32 79.6482, %v204_v26 }
  0x19   : > { %v347_v35 = vadd.f32 79.6482, %v205_v27  ;;  %v348_v36 = vadd.f32 79.6482, %v206_v28  ;;  %v349_v37 = vadd.f32 79.6482, %v207_v29 }
  0x1a   : > { %v350_v38 = vadd.f32 79.6482, %v208_v30  ;;  %v351_v39 = vadd.f32 79.6482, %v209_v31  ;;  %v352_v40 = vadd.f32 79.6482, %v210_v32 }
  0x1b   : > { %v220_v41 = vmul.f32 0.0076726894, %v345_v33  ;;  %v221_v42 = vmul.f32 0.0076726894, %v346_v34  ;;  %v222_v43 = vmul.f32 0.0076726894, %v347_v35 }
  0x1c   : > { %v223_v44 = vmul.f32 0.0076726894, %v348_v36  ;;  %v224_v45 = vmul.f32 0.0076726894, %v349_v37  ;;  %v225_v46 = vmul.f32 0.0076726894, %v350_v38 }
  0x1d   : > { %v226_v47 = vmul.f32 0.0076726894, %v351_v39  ;;  %v227_v48 = vmul.f32 0.0076726894, %v352_v40  ;;  %v228_v49 = vmul.f32 2.0, %v220_v41  ;;  %v229_v50 = vmul.f32 2.0, %v221_v42 }
  0x1e   : > { %v230_v51 = vmul.f32 2.0, %v222_v43  ;;  %v231_v52 = vmul.f32 2.0, %v223_v44  ;;  %v232_v53 = vmul.f32 2.0, %v224_v45  ;;  %v233_v54 = vmul.f32 2.0, %v225_v46 }
  0x1f   : > { %v234_v55 = vmul.f32 2.0, %v226_v47  ;;  %v235_v56 = vmul.f32 2.0, %v227_v48  ;;  %v353_v57 = vadd.f32 -1.0, %v228_v49  ;;  %v354_v58 = vadd.f32 -1.0, %v229_v50 }
  0x20   : > { %v355_v59 = vadd.f32 -1.0, %v230_v51  ;;  %v356_v60 = vadd.f32 -1.0, %v231_v52  ;;  %v357_v61 = vadd.f32 -1.0, %v232_v53  ;;  %v358_v62 = vadd.f32 -1.0, %v233_v54 }
  0x21   : > { %v359_v63 = vadd.f32 -1.0, %v234_v55  ;;  %v360_v0 = vadd.f32 -1.0, %v235_v56  ;;  %244 = vst [vmem:[%s175_s22] sm:$0xff] %v353_v57  ;;  %245 = vst [vmem:[%s175_s22 + $0x8] sm:$0xff] %v354_v58 }
  0x22   : > { %246 = vst [vmem:[%s175_s22 + $0x10] sm:$0xff] %v355_v59  ;;  %247 = vst [vmem:[%s175_s22 + $0x18] sm:$0xff] %v356_v60 }
  0x23   : > { %248 = vst [vmem:[%s175_s22 + $0x20] sm:$0xff] %v357_v61  ;;  %249 = vst [vmem:[%s175_s22 + $0x28] sm:$0xff] %v358_v62 }
  0x24   : > { %250 = vst [vmem:[%s175_s22 + $0x30] sm:$0xff] %v359_v63  ;;  %251 = vst [vmem:[%s175_s22 + $0x38] sm:$0xff] %v360_v0 }
  0x25 PF: > { %s13_s13 = sadd.s32 1, %s411_s13   ;;  %s474_s11 = smov %s407_s12 }
  0x26   : > { %p10_p5 = scmp.ge.s32.totalorder %s13_s13, 4   ;;  %s475_s12 = smov %s477_s1 }
  0x28   :  { %12 = sbr.rel (!%p10_p5) target bundleno = 2 (0x2), region = 58 }

// kernel: _lambda_.2
= control target key start
LH: loop header
LB: loop body
LE: loop exit
PB: predicated region body
PF: predicated region fallthrough
CT: control target
= control target key end

     0   :  { %s8097_s15 = smov 0   ;;  %s8099_s16 = smov 0   ;;  %s11141_s0 = inlined_call_operand.vmem [shape: bf16[2,1024,128], index: 0, kind: input, shape index: {}]   ;;  %s11142_s1 = inlined_call_operand.vmem [shape: bf16[1024,1024], index: 1, kind: input, shape index: {}]   ;;  %s11143_s2 = inlined_call_operand.vmem [shape: f32[64,512], index: 2, kind: input, shape index: {}]   ;;  %s11144_s3 = inlined_call_operand.vmem [shape: f32[2,64,128], index: 3, kind: output, shape index: {0}]   ;;  %s11145_s4 = inlined_call_operand.vmem [shape: f32[2,1,128], index: 4, kind: output, shape index: {1}]  }
   0x1   :  { %s8101_s17 = smov 0  }
   0x2 LB: > { %s27_s18 = sadd.s32 1, %s8065_s16  ;;  %p6629_p0 = scmp.ge.s32.totalorder %s8069_s17, 1  ;;  %s8069_s17 = sphi %s8101_s17, %s15_s17   ;;  %s8065_s16 = sphi %s8099_s16, %s11465_s16   ;;  %s8061_s15 = sphi %s8097_s15, %s11464_s15  }
   0x3   : > { %p29_p1 = scmp.ge.s32.totalorder %s27_s18, 2  ;;  %p186_p2 = scmp.lt.s32.totalorder %s8069_s17, 3 }
   0x5   : > { %s11467_s18 = smov (%p29_p1, %s27_s18), 0  ;;  %p187_p3 = pnand %p6629_p0, %p186_p2 }
   0x7   : > { %190 = sbr.rel (%p187_p3) target bundleno = 1687 (0x697), region = 32 }
   0xe   : > { %p224_p4 = scmp.lt.s32.totalorder %s8061_s15, 1  ;;  %v8118_v0 = vld [vmem:[%s11142_s1 + $0x8] sm:$0xff]  ;;  %v11146_v2 = vmov 0   ;;  %v8136_v5 = vld [vmem:[%s11142_s1] sm:$0xff] }
   0xf   : > { %v8123_v1 = vld [vmem:[%s11142_s1 + $0x28] sm:$0xff]  ;;  %4376 = vmatprep.subr.bf16.mxu0 %v11146_v2  ;;  %3831 = vmatprep.subr.bf16.mxu1 %v11146_v2  ;;  %v8141_v6 = vld [vmem:[%s11142_s1 + $0x20] sm:$0xff] }
  0x10   : > { %v6636_v3 = vcombine.low %v8118_v0, %v8123_v1  ;;  %v6637_v4 = vcombine.high %v8118_v0, %v8123_v1  ;;  %s11469_s15 = smov (!%p224_p4, %s8061_s15), 1  ;;  %v6634_v7 = vcombine.low %v8136_v5, %v8141_v6  ;;  %v6635_v8 = vcombine.high %v8136_v5, %v8141_v6  ;;  %v384_v38 = vld [vmem:[%s11142_s1 + $0x48] sm:$0xff]  ;;  %v383_v46 = vld [vmem:[%s11142_s1 + $0x40] sm:$0xff] }
  0x11   : > { %s7212_s27 = sshll.u32 %s11469_s15, 9  ;;  %v388_v39 = vld [vmem:[%s11142_s1 + $0x68] sm:$0xff]  ;;  %v387_v47 = vld [vmem:[%s11142_s1 + $0x60] sm:$0xff]  ;;  %s7213_s5 = sshll.u32 %s11469_s15, 6 }
  0x12   : > { %4408 = vmatprep.mubr.bf16.mxu0 %v6637_v4  ;;  %s8151_s30 = scalar_lea.vmem %s11141_s0, %s7212_s27  ;;  %3863 = vmatprep.mubr.bf16.mxu1 %v6635_v8  ;;  %v6645_v41 = vcombine.high %v384_v38, %v388_v39  ;;  %v392_v43 = vld [vmem:[%s11142_s1 + $0x88] sm:$0xff]  ;;  %v6644_v48 = vcombine.low %v384_v38, %v388_v39  ;;  %v6643_v50 = vcombine.high %v383_v46, %v387_v47  ;;  %v391_v53 = vld [vmem:[%s11142_s1 + $0x80] sm:$0xff]  ;;  %s11117_s7 = scalar_lea.vmem %s11144_s3, %s7213_s5 }
  0x13   : > { %v7967_v9 = vld [vmem:[%s8151_s30 + $0x80] sm:$0xff]   ;;  %v7968_v10 = vld [vmem:[%s8151_s30 + $0x88] sm:$0xff]   ;;  %v7969_v11 = vld [vmem:[%s8151_s30 + $0x90] sm:$0xff]   ;;  %v6642_v57 = vcombine.low %v383_v46, %v387_v47  ;;  %s245_s10 = scalar_lea.vmem %s11145_s4, %s11469_s15 }
  0x14   : > { %4377 = vmatpush1.bf16.msra.mxu0 %v7967_v9  ;;  %v7976_v12 = vld [vmem:[%s8151_s30] sm:$0xff]   ;;  %v7970_v13 = vld [vmem:[%s8151_s30 + $0x98] sm:$0xff]   ;;  %v7978_v14 = vld [vmem:[%s8151_s30 + $0x8] sm:$0xff]  }
  0x15   : > { %4378 = vmatprep.subr.bf16.mxu0 %v11146_v2  ;;  %3832 = vmatpush1.bf16.msra.mxu1 %v7976_v12  ;;  %v7971_v15 = vld [vmem:[%s8151_s30 + $0xa0] sm:$0xff]   ;;  %v7980_v16 = vld [vmem:[%s8151_s30 + $0x10] sm:$0xff]   ;;  %v7972_v17 = vld [vmem:[%s8151_s30 + $0xa8] sm:$0xff]  }
  0x16   : > { %3833 = vmatprep.subr.bf16.mxu1 %v11146_v2  ;;  %v7982_v18 = vld [vmem:[%s8151_s30 + $0x18] sm:$0xff]   ;;  %v7973_v19 = vld [vmem:[%s8151_s30 + $0xb0] sm:$0xff]   ;;  %v7984_v20 = vld [vmem:[%s8151_s30 + $0x20] sm:$0xff]  }
  0x17   : > { %v7974_v21 = vld [vmem:[%s8151_s30 + $0xb8] sm:$0xff]   ;;  %v7986_v22 = vld [vmem:[%s8151_s30 + $0x28] sm:$0xff]   ;;  %v7975_v23 = vld [vmem:[%s8151_s30 + $0xc0] sm:$0xff]  }
  0x18   : > { %4379 = vmatpush1.bf16.msra.mxu0 %v7968_v10  ;;  %v7988_v24 = vld [vmem:[%s8151_s30 + $0x30] sm:$0xff]   ;;  %v7977_v25 = vld [vmem:[%s8151_s30 + $0xc8] sm:$0xff]   ;;  %v7990_v26 = vld [vmem:[%s8151_s30 + $0x38] sm:$0xff]  }
  0x19   : > { %4380 = vmatprep.subr.bf16.mxu0 %v11146_v2  ;;  %3834 = vmatpush1.bf16.msra.mxu1 %v7978_v14  ;;  %v7979_v27 = vld [vmem:[%s8151_s30 + $0xd0] sm:$0xff]   ;;  %v7991_v28 = vld [vmem:[%s8151_s30 + $0x40] sm:$0xff]   ;;  %v7981_v29 = vld [vmem:[%s8151_s30 + $0xd8] sm:$0xff]  }
  0x1a   : > { %3835 = vmatprep.subr.bf16.mxu1 %v11146_v2  ;;  %v7992_v30 = vld [vmem:[%s8151_s30 + $0x48] sm:$0xff]   ;;  %v7983_v31 = vld [vmem:[%s8151_s30 + $0xe0] sm:$0xff]   ;;  %v7993_v32 = vld [vmem:[%s8151_s30 + $0x50] sm:$0xff]  }
  0x1b   : > { %v7985_v33 = vld [vmem:[%s8151_s30 + $0xe8] sm:$0xff]   ;;  %v7994_v34 = vld [vmem:[%s8151_s30 + $0x58] sm:$0xff]   ;;  %v7987_v35 = vld [vmem:[%s8151_s30 + $0xf0] sm:$0xff]  }
  0x1c   : > { %4381 = vmatpush1.bf16.msra.mxu0 %v7969_v11  ;;  %v7995_v36 = vld [vmem:[%s8151_s30 + $0x60] sm:$0xff]   ;;  %v7989_v37 = vld [vmem:[%s8151_s30 + $0xf8] sm:$0xff]   ;;  %v7996_v40 = vld [vmem:[%s8151_s30 + $0x68] sm:$0xff]  }
  0x1d   : > { %4382 = vmatprep.subr.bf16.mxu0 %v11146_v2  ;;  %3836 = vmatpush1.bf16.msra.mxu1 %v7980_v16  ;;  %v7997_v42 = vld [vmem:[%s8151_s30 + $0x70] sm:$0xff]   ;;  %v396_v44 = vld [vmem:[%s11142_s1 + $0xa8] sm:$0xff]  ;;  %v7998_v45 = vld [vmem:[%s8151_s30 + $0x78] sm:$0xff]  }
  0x1e   : > { %3837 = vmatprep.subr.bf16.mxu1 %v11146_v2  ;;  %v6653_v49 = vcombine.high %v392_v43, %v396_v44  ;;  %v400_v51 = vld [vmem:[%s11142_s1 + $0xc8] sm:$0xff]  ;;  %v395_v54 = vld [vmem:[%s11142_s1 + $0xa0] sm:$0xff]  ;;  %v6652_v55 = vcombine.low %v392_v43, %v396_v44 }
  0x1f   : > { %v404_v52 = vld [vmem:[%s11142_s1 + $0xe8] sm:$0xff]  ;;  %v6651_v58 = vcombine.high %v391_v53, %v395_v54  ;;  %v399_v61 = vld [vmem:[%s11142_s1 + $0xc0] sm:$0xff]  ;;  %v6650_v1 = vcombine.low %v391_v53, %v395_v54 }
  0x20   : > { %4383 = vmatpush1.bf16.msra.mxu0 %v7970_v13  ;;  %v6661_v56 = vcombine.high %v400_v51, %v404_v52  ;;  %v408_v59 = vld [vmem:[%s11142_s1 + $0x108] sm:$0xff]  ;;  %v403_v62 = vld [vmem:[%s11142_s1 + $0xe0] sm:$0xff]  ;;  %v6660_v63 = vcombine.low %v400_v51, %v404_v52 }
  0x21   : > { %4384 = vmatprep.subr.bf16.mxu0 %v11146_v2  ;;  %3838 = vmatpush1.bf16.msra.mxu1 %v7982_v18  ;;  %v412_v60 = vld [vmem:[%s11142_s1 + $0x128] sm:$0xff]  ;;  %v407_v6 = vld [vmem:[%s11142_s1 + $0x100] sm:$0xff]  ;;  %v6658_v10 = vcombine.low %v399_v61, %v403_v62 }
  0x22   : > { %3839 = vmatprep.subr.bf16.mxu1 %v11146_v2  ;;  %v6669_v0 = vcombine.high %v408_v59, %v412_v60  ;;  %v416_v4 = vld [vmem:[%s11142_s1 + $0x148] sm:$0xff]  ;;  %v6668_v8 = vcombine.low %v408_v59, %v412_v60  ;;  %v415_v14 = vld [vmem:[%s11142_s1 + $0x140] sm:$0xff] }
  0x23   : > { %v420_v5 = vld [vmem:[%s11142_s1 + $0x168] sm:$0xff]  ;;  %v439_v38 = vld [vmem:[%s11142_s1 + $0x200] sm:$0xff] }
  0x24   : > { %4385 = vmatpush1.bf16.msra.mxu0 %v7971_v15  ;;  %v6677_v9 = vcombine.high %v416_v4, %v420_v5  ;;  %v424_v12 = vld [vmem:[%s11142_s1 + $0x188] sm:$0xff]  ;;  %v419_v15 = vld [vmem:[%s11142_s1 + $0x160] sm:$0xff]  ;;  %v6676_v16 = vcombine.low %v416_v4, %v420_v5 }
  0x25   : > { %4386 = vmatprep.subr.bf16.mxu0 %v11146_v2  ;;  %3840 = vmatpush1.bf16.msra.mxu1 %v7984_v20  ;;  %v428_v13 = vld [vmem:[%s11142_s1 + $0x1a8] sm:$0xff]  ;;  %v443_v39 = vld [vmem:[%s11142_s1 + $0x220] sm:$0xff] }
  0x26   : > { %3841 = vmatprep.subr.bf16.mxu1 %v11146_v2  ;;  %v432_v20 = vld [vmem:[%s11142_s1 + $0x1c8] sm:$0xff]  ;;  %v6699_v43 = vcombine.high %v439_v38, %v443_v39  ;;  %v447_v46 = vld [vmem:[%s11142_s1 + $0x240] sm:$0xff] }
  0x27   : > { %v456_v44 = vld [vmem:[%s11142_s1 + $0x288] sm:$0xff]  ;;  %v451_v47 = vld [vmem:[%s11142_s1 + $0x260] sm:$0xff] }
  0x28   : > { %4387 = vmatpush1.bf16.msra.mxu0 %v7972_v17  ;;  %v6685_v17 = vcombine.high %v424_v12, %v428_v13  ;;  %v6707_v51 = vcombine.high %v447_v46, %v451_v47  ;;  %v464_v52 = vld [vmem:[%s11142_s1 + $0x2c8] sm:$0xff]  ;;  %v455_v54 = vld [vmem:[%s11142_s1 + $0x280] sm:$0xff] }
  0x29   : > { %4388 = vmatprep.subr.bf16.mxu0 %v11146_v2  ;;  %3842 = vmatpush1.bf16.msra.mxu1 %v7986_v22  ;;  %v423_v22 = vld [vmem:[%s11142_s1 + $0x180] sm:$0xff]  ;;  %v468_v53 = vld [vmem:[%s11142_s1 + $0x2e8] sm:$0xff] }
  0x2a   : > { %3843 = vmatprep.subr.bf16.mxu1 %v11146_v2  ;;  %v472_v60 = vld [vmem:[%s11142_s1 + $0x308] sm:$0xff] }
  0x2b   : > { %v480_v5 = vld [vmem:[%s11142_s1 + $0x348] sm:$0xff] }
  0x2c   : > { %4389 = vmatpush1.bf16.msra.mxu0 %v7973_v19  ;;  %v6675_v19 = vcombine.high %v415_v14, %v419_v15 }
  0x2d   : > { %4390 = vmatprep.subr.bf16.mxu0 %v11146_v2  ;;  %3844 = vmatpush1.bf16.msra.mxu1 %v7988_v24  ;;  %v6684_v24 = vcombine.low %v424_v12, %v428_v13  ;;  %v488_v13 = vld [vmem:[%s11142_s1 + $0x388] sm:$0xff] }
  0x2e   : > { %3845 = vmatprep.subr.bf16.mxu1 %v11146_v2 }
  0x30   : > { %4391 = vmatpush1.bf16.msra.mxu0 %v7974_v21  ;;  %v436_v21 = vld [vmem:[%s11142_s1 + $0x1e8] sm:$0xff] }
  0x31   : > { %4392 = vmatprep.subr.bf16.mxu0 %v11146_v2  ;;  %3846 = vmatpush1.bf16.msra.mxu1 %v7990_v26  ;;  %v6674_v26 = vcombine.low %v415_v14, %v419_v15  ;;  %v492_v14 = vld [vmem:[%s11142_s1 + $0x3a8] sm:$0xff]  ;;  %v479_v15 = vld [vmem:[%s11142_s1 + $0x340] sm:$0xff] }
  0x32   : > { %3847 = vmatprep.subr.bf16.mxu1 %v11146_v2 }
  0x34   : > { %4393 = vmatpush1.bf16.msra.mxu0 %v7975_v23  ;;  %v427_v23 = vld [vmem:[%s11142_s1 + $0x1a0] sm:$0xff] }
  0x35   : > { %4394 = vmatprep.subr.bf16.mxu0 %v11146_v2  ;;  %3848 = vmatpush1.bf16.msra.mxu1 %v7991_v28  ;;  %v440_v28 = vld [vmem:[%s11142_s1 + $0x208] sm:$0xff] }
  0x36   : > { %3849 = vmatprep.subr.bf16.mxu1 %v11146_v2 }
  0x38   : > { %4395 = vmatpush1.bf16.msra.mxu0 %v7977_v25  ;;  %v6693_v25 = vcombine.high %v432_v20, %v436_v21 }
  0x39   : > { %4396 = vmatprep.subr.bf16.mxu0 %v11146_v2  ;;  %3850 = vmatpush1.bf16.msra.mxu1 %v7992_v30  ;;  %v431_v30 = vld [vmem:[%s11142_s1 + $0x1c0] sm:$0xff] }
  0x3a   : > { %3851 = vmatprep.subr.bf16.mxu1 %v11146_v2 }
  0x3c   : > { %4397 = vmatpush1.bf16.msra.mxu0 %v7979_v27  ;;  %v6683_v27 = vcombine.high %v423_v22, %v427_v23 }
  0x3d   : > { %4398 = vmatprep.subr.bf16.mxu0 %v11146_v2  ;;  %3852 = vmatpush1.bf16.msra.mxu1 %v7993_v32  ;;  %v6692_v32 = vcombine.low %v432_v20, %v436_v21  ;;  %v496_v21 = vld [vmem:[%s11142_s1 + $0x3c8] sm:$0xff] }
  0x3e   : > { %3853 = vmatprep.subr.bf16.mxu1 %v11146_v2 }
  0x40   : > { %4399 = vmatpush1.bf16.msra.mxu0 %v7981_v29  ;;  %v444_v29 = vld [vmem:[%s11142_s1 + $0x228] sm:$0xff] }
  0x41   : > { %4400 = vmatprep.subr.bf16.mxu0 %v11146_v2  ;;  %3854 = vmatpush1.bf16.msra.mxu1 %v7994_v34  ;;  %v6682_v34 = vcombine.low %v423_v22, %v427_v23  ;;  %v500_v22 = vld [vmem:[%s11142_s1 + $0x3e8] sm:$0xff]  ;;  %v487_v23 = vld [vmem:[%s11142_s1 + $0x380] sm:$0xff] }
  0x42   : > { %3855 = vmatprep.subr.bf16.mxu1 %v11146_v2 }
  0x44   : > { %4401 = vmatpush1.bf16.msra.mxu0 %v7983_v31  ;;  %v435_v31 = vld [vmem:[%s11142_s1 + $0x1e0] sm:$0xff] }
  0x45   : > { %4402 = vmatprep.subr.bf16.mxu0 %v11146_v2  ;;  %3856 = vmatpush1.bf16.msra.mxu1 %v7995_v36  ;;  %v448_v36 = vld [vmem:[%s11142_s1 + $0x248] sm:$0xff] }
  0x46   : > { %3857 = vmatprep.subr.bf16.mxu1 %v11146_v2 }
  0x48   : > { %4403 = vmatpush1.bf16.msra.mxu0 %v7985_v33  ;;  %v6701_v33 = vcombine.high %v440_v28, %v444_v29 }
  0x49   : > { %4404 = vmatprep.subr.bf16.mxu0 %v11146_v2  ;;  %3858 = vmatpush1.bf16.msra.mxu1 %v7996_v40  ;;  %v6700_v40 = vcombine.low %v440_v28, %v444_v29  ;;  %v504_v29 = vld [vmem:[%s11142_s1 + $0x408] sm:$0xff] }
  0x4a   : > { %3859 = vmatprep.subr.bf16.mxu1 %v11146_v2 }
  0x4c   : > { %4405 = vmatpush1.bf16.msra.mxu0 %v7987_v35  ;;  %v6691_v35 = vcombine.high %v431_v30, %v435_v31 }
  0x4d   : > { %4406 = vmatprep.subr.bf16.mxu0 %v11146_v2  ;;  %3860 = vmatpush1.bf16.msra.mxu1 %v7997_v42  ;;  %v6690_v42 = vcombine.low %v431_v30, %v435_v31  ;;  %v508_v30 = vld [vmem:[%s11142_s1 + $0x428] sm:$0xff]  ;;  %v495_v31 = vld [vmem:[%s11142_s1 + $0x3c0] sm:$0xff] }
  0x4e   : > { %3861 = vmatprep.subr.bf16.mxu1 %v11146_v2 }
  0x50   : > { %4407 = vmatpush1.bf16.msra.mxu0 %v7989_v37  ;;  %v452_v37 = vld [vmem:[%s11142_s1 + $0x268] sm:$0xff] }
  0x51   : > { %4921 = vmatprep.subr.bf16.mxu0 %v11146_v2  ;;  %3862 = vmatpush1.bf16.msra.mxu1 %v7998_v45  ;;  %v460_v45 = vld [vmem:[%s11142_s1 + $0x2a8] sm:$0xff] }
  0x52   : > { %7390 = vmatprep.subr.bf16.mxu1 %v11146_v2 }
  0x53   : > { %4409 = vmatmul.mubr.bf16.vlgmr.msra.gmra.mrb[0].mxu0 %v6636_v3  ;;  %v6659_v3 = vcombine.high %v399_v61, %v403_v62  ;;  %v476_v61 = vld [vmem:[%s11142_s1 + $0x328] sm:$0xff]  ;;  %v463_v62 = vld [vmem:[%s11142_s1 + $0x2c0] sm:$0xff] }
  0x54   : > { %4416 = vmatprep.mubr.bf16.mxu0 %v6645_v41  ;;  %3864 = vmatmul.mubr.bf16.vlgmr.msra.gmra.mrb[0].mxu1 %v6634_v7  ;;  %v411_v7 = vld [vmem:[%s11142_s1 + $0x120] sm:$0xff]  ;;  %v6709_v41 = vcombine.high %v448_v36, %v452_v37 }
  0x55   : > { %3871 = vmatprep.mubr.bf16.mxu1 %v6643_v50  ;;  %v6667_v11 = vcombine.high %v407_v6, %v411_v7  ;;  %v6666_v18 = vcombine.low %v407_v6, %v411_v7  ;;  %v6698_v50 = vcombine.low %v439_v38, %v443_v39  ;;  %v484_v6 = vld [vmem:[%s11142_s1 + $0x368] sm:$0xff]  ;;  %v471_v7 = vld [vmem:[%s11142_s1 + $0x300] sm:$0xff] }
  0x56   : > { %v516_v38 = vld [vmem:[%s11142_s1 + $0x468] sm:$0xff]  ;;  %v503_v39 = vld [vmem:[%s11142_s1 + $0x400] sm:$0xff] }
  0x5b   : > { %4417 = vmatmul.mubr.bf16.gmra.mrb[4].mxu0 %v6644_v48  ;;  %v6708_v48 = vcombine.low %v448_v36, %v452_v37  ;;  %v512_v37 = vld [vmem:[%s11142_s1 + $0x448] sm:$0xff] }
  0x5c   : > { %4424 = vmatprep.mubr.bf16.mxu0 %v6653_v49  ;;  %3872 = vmatmul.mubr.bf16.gmra.mrb[4].mxu1 %v6642_v57  ;;  %v6717_v49 = vcombine.high %v456_v44, %v460_v45  ;;  %v6725_v57 = vcombine.high %v464_v52, %v468_v53 }
  0x5d   : > { %3879 = vmatprep.mubr.bf16.mxu1 %v6651_v58  ;;  %v6706_v58 = vcombine.low %v447_v46, %v451_v47  ;;  %v524_v46 = vld [vmem:[%s11142_s1 + $0x4a8] sm:$0xff]  ;;  %v511_v47 = vld [vmem:[%s11142_s1 + $0x440] sm:$0xff] }
  0x63   : > { %4425 = vmatmul.mubr.bf16.gmra.mrb[8].mxu0 %v6652_v55  ;;  %v459_v55 = vld [vmem:[%s11142_s1 + $0x2a0] sm:$0xff] }
  0x64   : > { %4432 = vmatprep.mubr.bf16.mxu0 %v6661_v56  ;;  %3880 = vmatmul.mubr.bf16.gmra.mrb[8].mxu1 %v6650_v1  ;;  %v6716_v56 = vcombine.low %v456_v44, %v460_v45  ;;  %v6715_v59 = vcombine.high %v455_v54, %v459_v55  ;;  %v6733_v1 = vcombine.high %v472_v60, %v476_v61  ;;  %v520_v45 = vld [vmem:[%s11142_s1 + $0x488] sm:$0xff] }
  0x65   : > { %3887 = vmatprep.mubr.bf16.mxu1 %v6659_v3  ;;  %v6714_v3 = vcombine.low %v455_v54, %v459_v55  ;;  %v532_v54 = vld [vmem:[%s11142_s1 + $0x4e8] sm:$0xff]  ;;  %v519_v55 = vld [vmem:[%s11142_s1 + $0x480] sm:$0xff] }
  0x6b   : > { %4433 = vmatmul.mubr.bf16.gmra.mrb[12].mxu0 %v6660_v63  ;;  %v467_v63 = vld [vmem:[%s11142_s1 + $0x2e0] sm:$0xff] }
  0x6c   : > { %4440 = vmatprep.mubr.bf16.mxu0 %v6669_v0  ;;  %3888 = vmatmul.mubr.bf16.gmra.mrb[12].mxu1 %v6658_v10  ;;  %v6724_v0 = vcombine.low %v464_v52, %v468_v53  ;;  %v6723_v4 = vcombine.high %v463_v62, %v467_v63  ;;  %v6741_v10 = vcombine.high %v480_v5, %v484_v6  ;;  %v528_v53 = vld [vmem:[%s11142_s1 + $0x4c8] sm:$0xff] }
  0x6d   : > { %3895 = vmatprep.mubr.bf16.mxu1 %v6667_v11  ;;  %v6722_v11 = vcombine.low %v463_v62, %v467_v63  ;;  %v540_v62 = vld [vmem:[%s11142_s1 + $0x528] sm:$0xff]  ;;  %v527_v63 = vld [vmem:[%s11142_s1 + $0x4c0] sm:$0xff] }
  0x73   : > { %4441 = vmatmul.mubr.bf16.gmra.mrb[16].mxu0 %v6668_v8  ;;  %v475_v8 = vld [vmem:[%s11142_s1 + $0x320] sm:$0xff] }
  0x74   : > { %4448 = vmatprep.mubr.bf16.mxu0 %v6677_v9  ;;  %3896 = vmatmul.mubr.bf16.gmra.mrb[16].mxu1 %v6666_v18  ;;  %v6732_v9 = vcombine.low %v472_v60, %v476_v61  ;;  %v6731_v12 = vcombine.high %v471_v7, %v475_v8  ;;  %v6749_v18 = vcombine.high %v488_v13, %v492_v14  ;;  %v536_v61 = vld [vmem:[%s11142_s1 + $0x508] sm:$0xff] }
  0x75   : > { %3903 = vmatprep.mubr.bf16.mxu1 %v6675_v19  ;;  %v6730_v19 = vcombine.low %v471_v7, %v475_v8  ;;  %v548_v7 = vld [vmem:[%s11142_s1 + $0x568] sm:$0xff]  ;;  %v535_v8 = vld [vmem:[%s11142_s1 + $0x500] sm:$0xff] }
  0x7b   : > { %4449 = vmatmul.mubr.bf16.gmra.mrb[20].mxu0 %v6676_v16  ;;  %v483_v16 = vld [vmem:[%s11142_s1 + $0x360] sm:$0xff] }
  0x7c   : > { %4456 = vmatprep.mubr.bf16.mxu0 %v6685_v17  ;;  %3904 = vmatmul.mubr.bf16.gmra.mrb[20].mxu1 %v6674_v26  ;;  %v6740_v17 = vcombine.low %v480_v5, %v484_v6  ;;  %v6739_v20 = vcombine.high %v479_v15, %v483_v16  ;;  %v6757_v26 = vcombine.high %v496_v21, %v500_v22  ;;  %v544_v6 = vld [vmem:[%s11142_s1 + $0x548] sm:$0xff] }
  0x7d   : > { %3911 = vmatprep.mubr.bf16.mxu1 %v6683_v27  ;;  %v6738_v27 = vcombine.low %v479_v15, %v483_v16  ;;  %v556_v15 = vld [vmem:[%s11142_s1 + $0x5a8] sm:$0xff]  ;;  %v543_v16 = vld [vmem:[%s11142_s1 + $0x540] sm:$0xff] }
  0x83   : > { %4457 = vmatmul.mubr.bf16.gmra.mrb[24].mxu0 %v6684_v24  ;;  %v491_v24 = vld [vmem:[%s11142_s1 + $0x3a0] sm:$0xff] }
  0x84   : > { %4464 = vmatprep.mubr.bf16.mxu0 %v6693_v25  ;;  %3912 = vmatmul.mubr.bf16.gmra.mrb[24].mxu1 %v6682_v34  ;;  %v6748_v25 = vcombine.low %v488_v13, %v492_v14  ;;  %v6747_v28 = vcombine.high %v487_v23, %v491_v24  ;;  %v6765_v34 = vcombine.high %v504_v29, %v508_v30  ;;  %v552_v14 = vld [vmem:[%s11142_s1 + $0x588] sm:$0xff] }
  0x85   : > { %3919 = vmatprep.mubr.bf16.mxu1 %v6691_v35  ;;  %v6746_v35 = vcombine.low %v487_v23, %v491_v24  ;;  %v564_v23 = vld [vmem:[%s11142_s1 + $0x5e8] sm:$0xff]  ;;  %v551_v24 = vld [vmem:[%s11142_s1 + $0x580] sm:$0xff] }
  0x8b   : > { %4465 = vmatmul.mubr.bf16.gmra.mrb[28].mxu0 %v6692_v32  ;;  %v499_v32 = vld [vmem:[%s11142_s1 + $0x3e0] sm:$0xff] }
  0x8c   : > { %4472 = vmatprep.mubr.bf16.mxu0 %v6701_v33  ;;  %3920 = vmatmul.mubr.bf16.gmra.mrb[28].mxu1 %v6690_v42  ;;  %v6756_v33 = vcombine.low %v496_v21, %v500_v22  ;;  %v6755_v36 = vcombine.high %v495_v31, %v499_v32  ;;  %v6773_v42 = vcombine.high %v512_v37, %v516_v38  ;;  %v560_v22 = vld [vmem:[%s11142_s1 + $0x5c8] sm:$0xff] }
  0x8d   : > { %3927 = vmatprep.mubr.bf16.mxu1 %v6699_v43  ;;  %v6754_v43 = vcombine.low %v495_v31, %v499_v32  ;;  %v572_v31 = vld [vmem:[%s11142_s1 + $0x628] sm:$0xff]  ;;  %v559_v32 = vld [vmem:[%s11142_s1 + $0x5c0] sm:$0xff] }
  0x93   : > { %4473 = vmatmul.mubr.bf16.gmra.mrb[32].mxu0 %v6700_v40  ;;  %v507_v40 = vld [vmem:[%s11142_s1 + $0x420] sm:$0xff] }
  0x94   : > { %4480 = vmatprep.mubr.bf16.mxu0 %v6709_v41  ;;  %3928 = vmatmul.mubr.bf16.gmra.mrb[32].mxu1 %v6698_v50  ;;  %v6764_v41 = vcombine.low %v504_v29, %v508_v30  ;;  %v6763_v44 = vcombine.high %v503_v39, %v507_v40  ;;  %v6781_v50 = vcombine.high %v520_v45, %v524_v46  ;;  %v568_v30 = vld [vmem:[%s11142_s1 + $0x608] sm:$0xff] }
  0x95   : > { %3935 = vmatprep.mubr.bf16.mxu1 %v6707_v51  ;;  %v6762_v51 = vcombine.low %v503_v39, %v507_v40  ;;  %v580_v39 = vld [vmem:[%s11142_s1 + $0x668] sm:$0xff]  ;;  %v567_v40 = vld [vmem:[%s11142_s1 + $0x600] sm:$0xff] }
  0x9b   : > { %4481 = vmatmul.mubr.bf16.gmra.mrb[36].mxu0 %v6708_v48  ;;  %v515_v48 = vld [vmem:[%s11142_s1 + $0x460] sm:$0xff] }
  0x9c   : > { %4488 = vmatprep.mubr.bf16.mxu0 %v6717_v49  ;;  %3936 = vmatmul.mubr.bf16.gmra.mrb[36].mxu1 %v6706_v58  ;;  %v6772_v49 = vcombine.low %v512_v37, %v516_v38  ;;  %v6771_v52 = vcombine.high %v511_v47, %v515_v48  ;;  %v6789_v58 = vcombine.high %v528_v53, %v532_v54  ;;  %v576_v38 = vld [vmem:[%s11142_s1 + $0x648] sm:$0xff] }
  0x9d   : > { %3943 = vmatprep.mubr.bf16.mxu1 %v6715_v59  ;;  %v6770_v59 = vcombine.low %v511_v47, %v515_v48  ;;  %v588_v47 = vld [vmem:[%s11142_s1 + $0x6a8] sm:$0xff]  ;;  %v575_v48 = vld [vmem:[%s11142_s1 + $0x640] sm:$0xff] }
  0xa3   : > { %4489 = vmatmul.mubr.bf16.gmra.mrb[40].mxu0 %v6716_v56  ;;  %v523_v56 = vld [vmem:[%s11142_s1 + $0x4a0] sm:$0xff] }
  0xa4   : > { %4496 = vmatprep.mubr.bf16.mxu0 %v6725_v57  ;;  %3944 = vmatmul.mubr.bf16.gmra.mrb[40].mxu1 %v6714_v3  ;;  %v6780_v57 = vcombine.low %v520_v45, %v524_v46  ;;  %v6779_v60 = vcombine.high %v519_v55, %v523_v56  ;;  %v6797_v3 = vcombine.high %v536_v61, %v540_v62  ;;  %v584_v46 = vld [vmem:[%s11142_s1 + $0x688] sm:$0xff] }
  0xa5   : > { %3951 = vmatprep.mubr.bf16.mxu1 %v6723_v4  ;;  %v6778_v4 = vcombine.low %v519_v55, %v523_v56  ;;  %v596_v55 = vld [vmem:[%s11142_s1 + $0x6e8] sm:$0xff]  ;;  %v583_v56 = vld [vmem:[%s11142_s1 + $0x680] sm:$0xff] }
  0xab   : > { %4497 = vmatmul.mubr.bf16.gmra.mrb[44].mxu0 %v6724_v0  ;;  %v531_v0 = vld [vmem:[%s11142_s1 + $0x4e0] sm:$0xff] }
  0xac   : > { %4504 = vmatprep.mubr.bf16.mxu0 %v6733_v1  ;;  %3952 = vmatmul.mubr.bf16.gmra.mrb[44].mxu1 %v6722_v11  ;;  %v6788_v1 = vcombine.low %v528_v53, %v532_v54  ;;  %v6787_v5 = vcombine.high %v527_v63, %v531_v0  ;;  %v6805_v11 = vcombine.high %v544_v6, %v548_v7  ;;  %v592_v54 = vld [vmem:[%s11142_s1 + $0x6c8] sm:$0xff] }
  0xad   : > { %3959 = vmatprep.mubr.bf16.mxu1 %v6731_v12  ;;  %v6786_v12 = vcombine.low %v527_v63, %v531_v0  ;;  %v604_v63 = vld [vmem:[%s11142_s1 + $0x728] sm:$0xff]  ;;  %v591_v0 = vld [vmem:[%s11142_s1 + $0x6c0] sm:$0xff] }
  0xb3   : > { %4505 = vmatmul.mubr.bf16.gmra.mrb[48].mxu0 %v6732_v9  ;;  %v539_v9 = vld [vmem:[%s11142_s1 + $0x520] sm:$0xff] }
  0xb4   : > { %4512 = vmatprep.mubr.bf16.mxu0 %v6741_v10  ;;  %3960 = vmatmul.mubr.bf16.gmra.mrb[48].mxu1 %v6730_v19  ;;  %v6796_v10 = vcombine.low %v536_v61, %v540_v62  ;;  %v6795_v13 = vcombine.high %v535_v8, %v539_v9  ;;  %v6813_v19 = vcombine.high %v552_v14, %v556_v15  ;;  %v600_v62 = vld [vmem:[%s11142_s1 + $0x708] sm:$0xff] }
  0xb5   : > { %3967 = vmatprep.mubr.bf16.mxu1 %v6739_v20  ;;  %v6794_v20 = vcombine.low %v535_v8, %v539_v9  ;;  %v612_v8 = vld [vmem:[%s11142_s1 + $0x768] sm:$0xff]  ;;  %v599_v9 = vld [vmem:[%s11142_s1 + $0x700] sm:$0xff] }
  0xbb   : > { %4513 = vmatmul.mubr.bf16.gmra.mrb[52].mxu0 %v6740_v17  ;;  %v547_v17 = vld [vmem:[%s11142_s1 + $0x560] sm:$0xff] }
  0xbc   : > { %4520 = vmatprep.mubr.bf16.mxu0 %v6749_v18  ;;  %3968 = vmatmul.mubr.bf16.gmra.mrb[52].mxu1 %v6738_v27  ;;  %v6804_v18 = vcombine.low %v544_v6, %v548_v7  ;;  %v6803_v21 = vcombine.high %v543_v16, %v547_v17  ;;  %v6821_v27 = vcombine.high %v560_v22, %v564_v23  ;;  %v608_v7 = vld [vmem:[%s11142_s1 + $0x748] sm:$0xff] }
  0xbd   : > { %3975 = vmatprep.mubr.bf16.mxu1 %v6747_v28  ;;  %v6802_v28 = vcombine.low %v543_v16, %v547_v17 }
  0xc3   : > { %4521 = vmatmul.mubr.bf16.gmra.mrb[56].mxu0 %v6748_v25  ;;  %v555_v25 = vld [vmem:[%s11142_s1 + $0x5a0] sm:$0xff] }
  0xc4   : > { %4528 = vmatprep.mubr.bf16.mxu0 %v6757_v26  ;;  %3976 = vmatmul.mubr.bf16.gmra.mrb[56].mxu1 %v6746_v35  ;;  %v6812_v26 = vcombine.low %v552_v14, %v556_v15  ;;  %v6811_v29 = vcombine.high %v551_v24, %v555_v25  ;;  %v6829_v35 = vcombine.high %v568_v30, %v572_v31 }
  0xc5   : > { %3983 = vmatprep.mubr.bf16.mxu1 %v6755_v36  ;;  %v6810_v36 = vcombine.low %v551_v24, %v555_v25 }
  0xcb   : > { %4529 = vmatmul.mubr.bf16.gmra.mrb[60].mxu0 %v6756_v33  ;;  %v563_v33 = vld [vmem:[%s11142_s1 + $0x5e0] sm:$0xff] }
  0xcc   : > { %4536 = vmatprep.mubr.bf16.mxu0 %v6765_v34  ;;  %3984 = vmatmul.mubr.bf16.gmra.mrb[60].mxu1 %v6754_v43  ;;  %v6820_v34 = vcombine.low %v560_v22, %v564_v23  ;;  %v6819_v37 = vcombine.high %v559_v32, %v563_v33  ;;  %v6837_v43 = vcombine.high %v576_v38, %v580_v39  ;;  %v611_v22 = vld [vmem:[%s11142_s1 + $0x760] sm:$0xff] }
  0xcd   : > { %3991 = vmatprep.mubr.bf16.mxu1 %v6763_v44  ;;  %v6818_v44 = vcombine.low %v559_v32, %v563_v33  ;;  %v6868_v23 = vcombine.low %v608_v7, %v612_v8  ;;  %v628_v32 = vld [vmem:[%s11142_s1 + $0x7e8] sm:$0xff]  ;;  %v615_v33 = vld [vmem:[%s11142_s1 + $0x780] sm:$0xff] }
  0xd3   : > { %4537 = vmatmul.mubr.bf16.gmra.mrb[64].mxu0 %v6764_v41  ;;  %v571_v41 = vld [vmem:[%s11142_s1 + $0x620] sm:$0xff] }
  0xd4   : > { %4544 = vmatprep.mubr.bf16.mxu0 %v6773_v42  ;;  %3992 = vmatmul.mubr.bf16.gmra.mrb[64].mxu1 %v6762_v51  ;;  %v6828_v42 = vcombine.low %v568_v30, %v572_v31  ;;  %v6827_v45 = vcombine.high %v567_v40, %v571_v41  ;;  %v6845_v51 = vcombine.high %v584_v46, %v588_v47  ;;  %v624_v31 = vld [vmem:[%s11142_s1 + $0x7c8] sm:$0xff] }
  0xd5   : > { %3999 = vmatprep.mubr.bf16.mxu1 %v6771_v52  ;;  %v6826_v52 = vcombine.low %v567_v40, %v571_v41 }
  0xdb   : > { %4545 = vmatmul.mubr.bf16.gmra.mrb[68].mxu0 %v6772_v49  ;;  %v579_v49 = vld [vmem:[%s11142_s1 + $0x660] sm:$0xff] }
  0xdc   : > { %4552 = vmatprep.mubr.bf16.mxu0 %v6781_v50  ;;  %4000 = vmatmul.mubr.bf16.gmra.mrb[68].mxu1 %v6770_v59  ;;  %v6836_v50 = vcombine.low %v576_v38, %v580_v39  ;;  %v6835_v53 = vcombine.high %v575_v48, %v579_v49  ;;  %v6853_v59 = vcombine.high %v592_v54, %v596_v55 }
  0xdd   : > { %4007 = vmatprep.mubr.bf16.mxu1 %v6779_v60  ;;  %v6834_v60 = vcombine.low %v575_v48, %v579_v49 }
  0xe3   : > { %4553 = vmatmul.mubr.bf16.gmra.mrb[72].mxu0 %v6780_v57  ;;  %v587_v57 = vld [vmem:[%s11142_s1 + $0x6a0] sm:$0xff] }
  0xe4   : > { %4560 = vmatprep.mubr.bf16.mxu0 %v6789_v58  ;;  %4008 = vmatmul.mubr.bf16.gmra.mrb[72].mxu1 %v6778_v4  ;;  %v6844_v58 = vcombine.low %v584_v46, %v588_v47  ;;  %v6843_v61 = vcombine.high %v583_v56, %v587_v57  ;;  %v6861_v4 = vcombine.high %v600_v62, %v604_v63  ;;  %v627_v46 = vld [vmem:[%s11142_s1 + $0x7e0] sm:$0xff] }
  0xe5   : > { %4015 = vmatprep.mubr.bf16.mxu1 %v6787_v5  ;;  %v6842_v5 = vcombine.low %v583_v56, %v587_v57  ;;  %v6884_v47 = vcombine.low %v624_v31, %v628_v32  ;;  %v644_v56 = vld [vmem:[%s11142_s1 + $0x868] sm:$0xff]  ;;  %v631_v57 = vld [vmem:[%s11142_s1 + $0x800] sm:$0xff] }
  0xeb   : > { %4561 = vmatmul.mubr.bf16.gmra.mrb[76].mxu0 %v6788_v1  ;;  %v595_v1 = vld [vmem:[%s11142_s1 + $0x6e0] sm:$0xff] }
  0xec   : > { %4568 = vmatprep.mubr.bf16.mxu0 %v6797_v3  ;;  %4016 = vmatmul.mubr.bf16.gmra.mrb[76].mxu1 %v6786_v12  ;;  %v6852_v3 = vcombine.low %v592_v54, %v596_v55  ;;  %v6851_v6 = vcombine.high %v591_v0, %v595_v1  ;;  %v6850_v14 = vcombine.low %v591_v0, %v595_v1  ;;  %v640_v55 = vld [vmem:[%s11142_s1 + $0x848] sm:$0xff] }
  0xed   : > { %4023 = vmatprep.mubr.bf16.mxu1 %v6795_v13  ;;  %v6869_v13 = vcombine.high %v608_v7, %v612_v8  ;;  %v643_v7 = vld [vmem:[%s11142_s1 + $0x860] sm:$0xff]  ;;  %v6900_v8 = vcombine.low %v640_v55, %v644_v56 }
  0xf3   : > { %4569 = vmatmul.mubr.bf16.gmra.mrb[80].mxu0 %v6796_v10  ;;  %v603_v10 = vld [vmem:[%s11142_s1 + $0x720] sm:$0xff] }
  0xf4   : > { %4576 = vmatprep.mubr.bf16.mxu0 %v6805_v11  ;;  %4024 = vmatmul.mubr.bf16.gmra.mrb[80].mxu1 %v6794_v20  ;;  %v6860_v11 = vcombine.low %v600_v62, %v604_v63  ;;  %v6859_v16 = vcombine.high %v599_v9, %v603_v10  ;;  %v620_v20 = vld [vmem:[%s11142_s1 + $0x7a8] sm:$0xff] }
  0xf5   : > { %4031 = vmatprep.mubr.bf16.mxu1 %v6803_v21  ;;  %v607_v21 = vld [vmem:[%s11142_s1 + $0x740] sm:$0xff] }
  0xf6   : > { %v6866_v38 = vcombine.low %v607_v21, %v611_v22 }
  0xfb   : > { %4577 = vmatmul.mubr.bf16.gmra.mrb[84].mxu0 %v6804_v18 }
  0xfc   : > { %4584 = vmatprep.mubr.bf16.mxu0 %v6813_v19  ;;  %4032 = vmatmul.mubr.bf16.gmra.mrb[84].mxu1 %v6802_v28  ;;  %v616_v19 = vld [vmem:[%s11142_s1 + $0x788] sm:$0xff]  ;;  %v6867_v28 = vcombine.high %v607_v21, %v611_v22  ;;  %v651_v21 = vld [vmem:[%s11142_s1 + $0x8a0] sm:$0xff] }
  0xfd   : > { %4039 = vmatprep.mubr.bf16.mxu1 %v6811_v29  ;;  %v6877_v25 = vcombine.high %v616_v19, %v620_v20 }
 0x103   : > { %4585 = vmatmul.mubr.bf16.gmra.mrb[88].mxu0 %v6812_v26  ;;  %v6858_v26 = vcombine.low %v599_v9, %v603_v10 }
 0x104   : > { %4592 = vmatprep.mubr.bf16.mxu0 %v6821_v27  ;;  %4040 = vmatmul.mubr.bf16.gmra.mrb[88].mxu1 %v6810_v36 }
 0x105   : > { %4047 = vmatprep.mubr.bf16.mxu1 %v6819_v37  ;;  %v6885_v37 = vcombine.high %v624_v31, %v628_v32  ;;  %v664_v32 = vld [vmem:[%s11142_s1 + $0x908] sm:$0xff] }
 0x10b   : > { %4593 = vmatmul.mubr.bf16.gmra.mrb[92].mxu0 %v6820_v34  ;;  %v619_v34 = vld [vmem:[%s11142_s1 + $0x7a0] sm:$0xff] }
 0x10c   : > { %4600 = vmatprep.mubr.bf16.mxu0 %v6829_v35  ;;  %4048 = vmatmul.mubr.bf16.gmra.mrb[92].mxu1 %v6818_v44  ;;  %v6876_v35 = vcombine.low %v616_v19, %v620_v20  ;;  %v6875_v40 = vcombine.high %v615_v33, %v619_v34  ;;  %v636_v44 = vld [vmem:[%s11142_s1 + $0x828] sm:$0xff]  ;;  %v647_v20 = vld [vmem:[%s11142_s1 + $0x880] sm:$0xff] }
 0x10d   : > { %4055 = vmatprep.mubr.bf16.mxu1 %v6827_v45  ;;  %v623_v45 = vld [vmem:[%s11142_s1 + $0x7c0] sm:$0xff]  ;;  %v660_v19 = vld [vmem:[%s11142_s1 + $0x8e8] sm:$0xff] }
 0x10e   : > { %v6882_v62 = vcombine.low %v623_v45, %v627_v46 }
 0x113   : > { %4601 = vmatmul.mubr.bf16.gmra.mrb[96].mxu0 %v6828_v42 }
 0x114   : > { %4608 = vmatprep.mubr.bf16.mxu0 %v6837_v43  ;;  %4056 = vmatmul.mubr.bf16.gmra.mrb[96].mxu1 %v6826_v52  ;;  %v632_v43 = vld [vmem:[%s11142_s1 + $0x808] sm:$0xff]  ;;  %v6883_v52 = vcombine.high %v623_v45, %v627_v46 }
 0x115   : > { %4063 = vmatprep.mubr.bf16.mxu1 %v6835_v53  ;;  %v6893_v49 = vcombine.high %v632_v43, %v636_v44  ;;  %v672_v46 = vld [vmem:[%s11142_s1 + $0x948] sm:$0xff] }
 0x11b   : > { %4609 = vmatmul.mubr.bf16.gmra.mrb[100].mxu0 %v6836_v50  ;;  %v6874_v50 = vcombine.low %v615_v33, %v619_v34  ;;  %v668_v33 = vld [vmem:[%s11142_s1 + $0x928] sm:$0xff]  ;;  %v655_v34 = vld [vmem:[%s11142_s1 + $0x8c0] sm:$0xff] }
 0x11c   : > { %4616 = vmatprep.mubr.bf16.mxu0 %v6845_v51  ;;  %4064 = vmatmul.mubr.bf16.gmra.mrb[100].mxu1 %v6834_v60 }
 0x11d   : > { %4071 = vmatprep.mubr.bf16.mxu1 %v6843_v61  ;;  %v6901_v61 = vcombine.high %v640_v55, %v644_v56 }
 0x123   : > { %4617 = vmatmul.mubr.bf16.gmra.mrb[104].mxu0 %v6844_v58  ;;  %v635_v58 = vld [vmem:[%s11142_s1 + $0x820] sm:$0xff] }
 0x124   : > { %4624 = vmatprep.mubr.bf16.mxu0 %v6853_v59  ;;  %4072 = vmatmul.mubr.bf16.gmra.mrb[104].mxu1 %v6842_v5  ;;  %v6892_v59 = vcombine.low %v632_v43, %v636_v44  ;;  %v6891_v0 = vcombine.high %v631_v57, %v635_v58  ;;  %v652_v5 = vld [vmem:[%s11142_s1 + $0x8a8] sm:$0xff] }
 0x125   : > { %4079 = vmatprep.mubr.bf16.mxu1 %v6851_v6  ;;  %v639_v6 = vld [vmem:[%s11142_s1 + $0x840] sm:$0xff] }
 0x127   : > { %v8565_v12 = vpop.f32.mrb[0].mxu1 }
 0x128   : > { %11162 = vst [vmem:[#allocation2_spill] sm:$0xff] %v8565_v12  ;;  %v3867_v15 = vpop.f32.mrb[1].mxu1 }
 0x129   : > { %v8567_v17 = vpop.f32.mrb[2].mxu1 }
 0x12a   : > { %11163 = vst [vmem:[#allocation3_spill] sm:$0xff] %v8567_v17  ;;  %v3870_v18 = vpop.f32.mrb[3].mxu1 }
 0x12b   : > { %4625 = vmatmul.mubr.bf16.gmra.mrb[108].mxu0 %v6852_v3  ;;  %v656_v18 = vld [vmem:[%s11142_s1 + $0x8c8] sm:$0xff] }
 0x12c   : > { %4632 = vmatprep.mubr.bf16.mxu0 %v6861_v4  ;;  %4080 = vmatmul.mubr.bf16.gmra.mrb[108].mxu1 %v6850_v14  ;;  %v648_v4 = vld [vmem:[%s11142_s1 + $0x888] sm:$0xff]  ;;  %v6899_v14 = vcombine.high %v639_v6, %v643_v7 }
 0x12d   : > { %4087 = vmatprep.mubr.bf16.mxu1 %v6859_v16  ;;  %v6909_v10 = vcombine.high %v648_v4, %v652_v5  ;;  %v6908_v22 = vcombine.low %v648_v4, %v652_v5 }
 0x12f   : > { %v8581_v24 = vpop.f32.mrb[4].mxu1 }
 0x130   : > { %11164 = vst [vmem:[#allocation4_spill] sm:$0xff] %v8581_v24  ;;  %v3875_v27 = vpop.f32.mrb[5].mxu1  ;;  %v8988_v24 = vld [vmem:[%s8151_s30 + $0x1d0] sm:$0xff]  }
 0x131   : > { %v8583_v29 = vpop.f32.mrb[6].mxu1 }
 0x132   : > { %11165 = vst [vmem:[#allocation5_spill] sm:$0xff] %v8583_v29  ;;  %v3878_v30 = vpop.f32.mrb[7].mxu1 }
 0x133   : > { %4633 = vmatmul.mubr.bf16.gmra.mrb[112].mxu0 %v6860_v11  ;;  %v6890_v11 = vcombine.low %v631_v57, %v635_v58 }
 0x134   : > { %4640 = vmatprep.mubr.bf16.mxu0 %v6869_v13  ;;  %4088 = vmatmul.mubr.bf16.gmra.mrb[112].mxu1 %v6858_v26  ;;  %v6898_v26 = vcombine.low %v639_v6, %v643_v7 }
 0x135   : > { %4095 = vmatprep.mubr.bf16.mxu1 %v6867_v28  ;;  %v6907_v28 = vcombine.high %v647_v20, %v651_v21 }
 0x137   : > { %v8597_v36 = vpop.f32.mrb[8].mxu1 }
 0x138   : > { %11166 = vst [vmem:[#allocation6_spill] sm:$0xff] %v8597_v36  ;;  %v3883_v39 = vpop.f32.mrb[9].mxu1 }
 0x139   : > { %v8599_v41 = vpop.f32.mrb[10].mxu1  ;;  %v6925_v39 = vcombine.high %v664_v32, %v668_v33 }
 0x13a   : > { %11167 = vst [vmem:[#allocation7_spill] sm:$0xff] %v8599_v41  ;;  %v3886_v42 = vpop.f32.mrb[11].mxu1 }
 0x13b   : > { %4641 = vmatmul.mubr.bf16.gmra.mrb[116].mxu0 %v6868_v23 }
 0x13c   : > { %4648 = vmatprep.mubr.bf16.mxu0 %v6877_v25  ;;  %4096 = vmatmul.mubr.bf16.gmra.mrb[116].mxu1 %v6866_v38  ;;  %v6917_v25 = vcombine.high %v656_v18, %v660_v19 }
 0x13d   : > { %4103 = vmatprep.mubr.bf16.mxu1 %v6875_v40  ;;  %v6906_v40 = vcombine.low %v647_v20, %v651_v21 }
 0x13f   : > { %v8613_v48 = vpop.f32.mrb[12].mxu1 }
 0x140   : > { %11168 = vst [vmem:[#allocation8_spill] sm:$0xff] %v8613_v48  ;;  %v3891_v51 = vpop.f32.mrb[13].mxu1 }
 0x141   : > { %v8615_v53 = vpop.f32.mrb[14].mxu1  ;;  %v6924_v51 = vcombine.low %v664_v32, %v668_v33  ;;  %v696_v32 = vld [vmem:[%s11142_s1 + $0xa08] sm:$0xff] }
 0x142   : > { %11169 = vst [vmem:[#allocation9_spill] sm:$0xff] %v8615_v53  ;;  %v3894_v54 = vpop.f32.mrb[15].mxu1  ;;  %v700_v33 = vld [vmem:[%s11142_s1 + $0xa28] sm:$0xff] }
 0x143   : > { %4649 = vmatmul.mubr.bf16.gmra.mrb[120].mxu0 %v6876_v35  ;;  %v659_v35 = vld [vmem:[%s11142_s1 + $0x8e0] sm:$0xff] }
 0x144   : > { %4656 = vmatprep.mubr.bf16.mxu0 %v6885_v37  ;;  %4104 = vmatmul.mubr.bf16.gmra.mrb[120].mxu1 %v6874_v50  ;;  %v6916_v37 = vcombine.low %v656_v18, %v660_v19  ;;  %v6915_v43 = vcombine.high %v655_v34, %v659_v35  ;;  %v667_v50 = vld [vmem:[%s11142_s1 + $0x920] sm:$0xff]  ;;  %v6914_v55 = vcombine.low %v655_v34, %v659_v35 }
 0x145   : > { %4111 = vmatprep.mubr.bf16.mxu1 %v6883_v52  ;;  %v683_v18 = vld [vmem:[%s11142_s1 + $0x9a0] sm:$0xff] }
 0x146   : > { %v687_v34 = vld [vmem:[%s11142_s1 + $0x9c0] sm:$0xff] }
 0x147   : > { %v8629_v60 = vpop.f32.mrb[16].mxu1  ;;  %v691_v35 = vld [vmem:[%s11142_s1 + $0x9e0] sm:$0xff] }
 0x148   : > { %v3899_v63 = vpop.f32.mrb[17].mxu1 }
 0x149   : > { %v8631_v1 = vpop.f32.mrb[18].mxu1  ;;  %v671_v63 = vld [vmem:[%s11142_s1 + $0x940] sm:$0xff] }
 0x14a   : > { %v3902_v3 = vpop.f32.mrb[19].mxu1 }
 0x14b   : > { %4657 = vmatmul.mubr.bf16.gmra.mrb[124].mxu0 %v6884_v47  ;;  %v676_v47 = vld [vmem:[%s11142_s1 + $0x968] sm:$0xff] }
 0x14c   : > { %4664 = vmatprep.mubr.bf16.mxu0 %v6893_v49  ;;  %4112 = vmatmul.mubr.bf16.gmra.mrb[124].mxu1 %v6882_v62  ;;  %v663_v49 = vld [vmem:[%s11142_s1 + $0x900] sm:$0xff]  ;;  %v6933_v54 = vcombine.high %v672_v46, %v676_v47  ;;  %v684_v62 = vld [vmem:[%s11142_s1 + $0x9a8] sm:$0xff]  ;;  %v6932_v3 = vcombine.low %v672_v46, %v676_v47 }
 0x14d   : > { %4119 = vmatprep.mubr.bf16.mxu1 %v6891_v0  ;;  %v6923_v57 = vcombine.high %v663_v49, %v667_v50  ;;  %v675_v0 = vld [vmem:[%s11142_s1 + $0x960] sm:$0xff]  ;;  %v6922_v6 = vcombine.low %v663_v49, %v667_v50  ;;  %v704_v49 = vld [vmem:[%s11142_s1 + $0xa48] sm:$0xff] }
 0x14e   : > { %v708_v50 = vld [vmem:[%s11142_s1 + $0xa68] sm:$0xff] }
 0x14f   : > { %v8645_v9 = vpop.f32.mrb[20].mxu1 }
 0x150   : > { %v3907_v13 = vpop.f32.mrb[21].mxu1 }
 0x151   : > { %v8647_v15 = vpop.f32.mrb[22].mxu1  ;;  %v688_v13 = vld [vmem:[%s11142_s1 + $0x9c8] sm:$0xff] }
 0x152   : > { %v3910_v16 = vpop.f32.mrb[23].mxu1 }
 0x153   : > { %4665 = vmatmul.mubr.bf16.gmra.mrb[128].mxu0 %v6892_v59  ;;  %v679_v16 = vld [vmem:[%s11142_s1 + $0x980] sm:$0xff] }
 0x154   : > { %4672 = vmatprep.mubr.bf16.mxu0 %v6901_v61  ;;  %4120 = vmatmul.mubr.bf16.gmra.mrb[128].mxu1 %v6890_v11  ;;  %v680_v61 = vld [vmem:[%s11142_s1 + $0x988] sm:$0xff] }
 0x155   : > { %4127 = vmatprep.mubr.bf16.mxu1 %v6899_v14  ;;  %v6941_v5 = vcombine.high %v680_v61, %v684_v62  ;;  %v692_v14 = vld [vmem:[%s11142_s1 + $0x9e8] sm:$0xff]  ;;  %v6940_v19 = vcombine.low %v680_v61, %v684_v62 }
 0x156   : > { %v6949_v21 = vcombine.high %v688_v13, %v692_v14 }
 0x157   : > { %v8661_v23 = vpop.f32.mrb[24].mxu1 }
 0x158   : > { %v3915_v27 = vpop.f32.mrb[25].mxu1 }
 0x159   : > { %v8663_v30 = vpop.f32.mrb[26].mxu1 }
 0x15a   : > { %v3918_v31 = vpop.f32.mrb[27].mxu1 }
 0x15b   : > { %4673 = vmatmul.mubr.bf16.gmra.mrb[132].mxu0 %v6900_v8  ;;  %v6931_v8 = vcombine.high %v671_v63, %v675_v0  ;;  %v7999_v31 = vld [vmem:[%s8151_s30 + $0x100] sm:$0xff]  }
 0x15c   : > { %4680 = vmatprep.mubr.bf16.mxu0 %v6909_v10  ;;  %4128 = vmatmul.mubr.bf16.gmra.mrb[132].mxu1 %v6898_v26  ;;  %v6939_v26 = vcombine.high %v679_v16, %v683_v18 }
 0x15d   : > { %4135 = vmatprep.mubr.bf16.mxu1 %v6907_v28  ;;  %4922 = vmatpush1.bf16.msra.mxu0 %v7999_v31  ;;  %v8002_v31 = vld [vmem:[%s8151_s30 + $0x118] sm:$0xff]  }
 0x15e   : > { %4923 = vmatprep.subr.bf16.mxu0 %v11146_v2 }
 0x15f   : > { %v8677_v38 = vpop.f32.mrb[28].mxu1 }
 0x160   : > { %v3923_v42 = vpop.f32.mrb[29].mxu1 }
 0x161   : > { %v8679_v44 = vpop.f32.mrb[30].mxu1  ;;  %v6938_v42 = vcombine.low %v679_v16, %v683_v18 }
 0x162   : > { %v3926_v45 = vpop.f32.mrb[31].mxu1 }
 0x163   : > { %4681 = vmatmul.mubr.bf16.gmra.mrb[136].mxu0 %v6908_v22  ;;  %v6930_v22 = vcombine.low %v671_v63, %v675_v0  ;;  %v6947_v45 = vcombine.high %v687_v34, %v691_v35 }
 0x164   : > { %4688 = vmatprep.mubr.bf16.mxu0 %v6917_v25  ;;  %4136 = vmatmul.mubr.bf16.gmra.mrb[136].mxu1 %v6906_v40  ;;  %v6957_v40 = vcombine.high %v696_v32, %v700_v33 }
 0x165   : > { %4143 = vmatprep.mubr.bf16.mxu1 %v6915_v43 }
 0x167   : > { %v8693_v52 = vpop.f32.mrb[32].mxu1 }
 0x168   : > { %v3931_v56 = vpop.f32.mrb[33].mxu1 }
 0x169   : > { %v8695_v58 = vpop.f32.mrb[34].mxu1 }
 0x16a   : > { %v3934_v59 = vpop.f32.mrb[35].mxu1 }
 0x16b   : > { %4689 = vmatmul.mubr.bf16.gmra.mrb[140].mxu0 %v6916_v37  ;;  %v6948_v37 = vcombine.low %v688_v13, %v692_v14  ;;  %v6946_v59 = vcombine.low %v687_v34, %v691_v35 }
 0x16c   : > { %4696 = vmatprep.mubr.bf16.mxu0 %v6925_v39  ;;  %4144 = vmatmul.mubr.bf16.gmra.mrb[140].mxu1 %v6914_v55  ;;  %v6956_v55 = vcombine.low %v696_v32, %v700_v33  ;;  %v711_v32 = vld [vmem:[%s11142_s1 + $0xa80] sm:$0xff] }
 0x16d   : > { %4151 = vmatprep.mubr.bf16.mxu1 %v6923_v57  ;;  %v6965_v57 = vcombine.high %v704_v49, %v708_v50  ;;  %v715_v33 = vld [vmem:[%s11142_s1 + $0xaa0] sm:$0xff] }
 0x16f   : > { %v8709_v4 = vpop.f32.mrb[36].mxu1 }
 0x170   : > { %v3939_v7 = vpop.f32.mrb[37].mxu1 }
 0x171   : > { %v8711_v10 = vpop.f32.mrb[38].mxu1  ;;  %v703_v7 = vld [vmem:[%s11142_s1 + $0xa40] sm:$0xff] }
 0x172   : > { %v3942_v11 = vpop.f32.mrb[39].mxu1 }
 0x173   : > { %4697 = vmatmul.mubr.bf16.gmra.mrb[144].mxu0 %v6924_v51  ;;  %v695_v51 = vld [vmem:[%s11142_s1 + $0xa00] sm:$0xff]  ;;  %v6964_v11 = vcombine.low %v704_v49, %v708_v50  ;;  %v728_v50 = vld [vmem:[%s11142_s1 + $0xb08] sm:$0xff] }
 0x174   : > { %4704 = vmatprep.mubr.bf16.mxu0 %v6933_v54  ;;  %4152 = vmatmul.mubr.bf16.gmra.mrb[144].mxu1 %v6922_v6  ;;  %v699_v54 = vld [vmem:[%s11142_s1 + $0xa20] sm:$0xff]  ;;  %v716_v6 = vld [vmem:[%s11142_s1 + $0xaa8] sm:$0xff] }
 0x175   : > { %4159 = vmatprep.mubr.bf16.mxu1 %v6931_v8  ;;  %v6955_v62 = vcombine.high %v695_v51, %v699_v54  ;;  %v707_v8 = vld [vmem:[%s11142_s1 + $0xa60] sm:$0xff]  ;;  %v6954_v16 = vcombine.low %v695_v51, %v699_v54  ;;  %v732_v51 = vld [vmem:[%s11142_s1 + $0xb28] sm:$0xff] }
 0x176   : > { %v8004_v54 = vld [vmem:[%s8151_s30 + $0x128] sm:$0xff]  }
 0x177   : > { %v8725_v20 = vpop.f32.mrb[40].mxu1 }
 0x178   : > { %v3947_v25 = vpop.f32.mrb[41].mxu1 }
 0x179   : > { %v8727_v27 = vpop.f32.mrb[42].mxu1 }
 0x17a   : > { %v3950_v28 = vpop.f32.mrb[43].mxu1 }
 0x17b   : > { %4705 = vmatmul.mubr.bf16.gmra.mrb[148].mxu0 %v6932_v3  ;;  %v8000_v3 = vld [vmem:[%s8151_s30 + $0x108] sm:$0xff]  }
 0x17c   : > { %4712 = vmatprep.mubr.bf16.mxu0 %v6941_v5  ;;  %4160 = vmatmul.mubr.bf16.gmra.mrb[148].mxu1 %v6930_v22  ;;  %v712_v5 = vld [vmem:[%s11142_s1 + $0xa88] sm:$0xff]  ;;  %v8001_v22 = vld [vmem:[%s8151_s30 + $0x110] sm:$0xff]  }
 0x17d   : > { %4167 = vmatprep.mubr.bf16.mxu1 %v6939_v26  ;;  %4924 = vmatpush1.bf16.msra.mxu0 %v8000_v3  ;;  %v6973_v14 = vcombine.high %v712_v5, %v716_v6  ;;  %v720_v26 = vld [vmem:[%s11142_s1 + $0xac8] sm:$0xff]  ;;  %v6972_v34 = vcombine.low %v712_v5, %v716_v6 }
 0x17e   : > { %4925 = vmatprep.subr.bf16.mxu0 %v11146_v2  ;;  %v724_v28 = vld [vmem:[%s11142_s1 + $0xae8] sm:$0xff] }
 0x17f   : > { %v8743_v39 = vpop.f32.mrb[44].mxu1 }
 0x180   : > { %v3955_v43 = vpop.f32.mrb[45].mxu1 }
 0x181   : > { %v8745_v46 = vpop.f32.mrb[46].mxu1  ;;  %4926 = vmatpush1.bf16.msra.mxu0 %v8001_v22  ;;  %v6971_v43 = vcombine.high %v711_v32, %v715_v33  ;;  %v6988_v22 = vcombine.low %v728_v50, %v732_v51 }
 0x182   : > { %v3958_v47 = vpop.f32.mrb[47].mxu1  ;;  %4927 = vmatprep.subr.bf16.mxu0 %v11146_v2 }
 0x183   : > { %4713 = vmatmul.mubr.bf16.gmra.mrb[152].mxu0 %v6940_v19  ;;  %v6963_v19 = vcombine.high %v703_v7, %v707_v8  ;;  %v8003_v47 = vld [vmem:[%s8151_s30 + $0x120] sm:$0xff]  }
 0x184   : > { %4720 = vmatprep.mubr.bf16.mxu0 %v6949_v21  ;;  %4168 = vmatmul.mubr.bf16.gmra.mrb[152].mxu1 %v6938_v42 }
 0x185   : > { %4175 = vmatprep.mubr.bf16.mxu1 %v6947_v45  ;;  %4928 = vmatpush1.bf16.msra.mxu0 %v8002_v31 }
 0x186   : > { %4929 = vmatprep.subr.bf16.mxu0 %v11146_v2 }
 0x187   : > { %v8759_v56 = vpop.f32.mrb[48].mxu1 }
 0x188   : > { %v3963_v61 = vpop.f32.mrb[49].mxu1 }
 0x189   : > { %v8761_v63 = vpop.f32.mrb[50].mxu1  ;;  %4930 = vmatpush1.bf16.msra.mxu0 %v8003_v47  ;;  %v8009_v47 = vld [vmem:[%s8151_s30 + $0x148] sm:$0xff]  }
 0x18a   : > { %v3966_v0 = vpop.f32.mrb[51].mxu1  ;;  %4931 = vmatprep.subr.bf16.mxu0 %v11146_v2 }
 0x18b   : > { %4721 = vmatmul.mubr.bf16.gmra.mrb[156].mxu0 %v6948_v37  ;;  %v6981_v37 = vcombine.high %v720_v26, %v724_v28  ;;  %v6970_v0 = vcombine.low %v711_v32, %v715_v33 }
 0x18c   : > { %4728 = vmatprep.mubr.bf16.mxu0 %v6957_v40  ;;  %4176 = vmatmul.mubr.bf16.gmra.mrb[156].mxu1 %v6946_v59  ;;  %v6962_v40 = vcombine.low %v703_v7, %v707_v8  ;;  %v6980_v59 = vcombine.low %v720_v26, %v724_v28  ;;  %v8005_v7 = vld [vmem:[%s8151_s30 + $0x130] sm:$0xff]  }
 0x18d   : > { %4183 = vmatprep.mubr.bf16.mxu1 %v6955_v62  ;;  %v6989_v62 = vcombine.high %v728_v50, %v732_v51  ;;  %4932 = vmatpush1.bf16.msra.mxu0 %v8004_v54  ;;  %v739_v50 = vld [vmem:[%s11142_s1 + $0xb60] sm:$0xff]  ;;  %v8861_v51 = vld [vmem:[%s8151_s30 + $0x188] sm:$0xff]  }
 0x18e   : > { %4933 = vmatprep.subr.bf16.mxu0 %v11146_v2 }
 0x18f   : > { %v8777_v13 = vpop.f32.mrb[52].mxu1 }
 0x190   : > { %v3971_v18 = vpop.f32.mrb[53].mxu1 }
 0x191   : > { %v8779_v21 = vpop.f32.mrb[54].mxu1  ;;  %4934 = vmatpush1.bf16.msra.mxu0 %v8005_v7  ;;  %v727_v18 = vld [vmem:[%s11142_s1 + $0xb00] sm:$0xff] }
 0x192   : > { %v3974_v25 = vpop.f32.mrb[55].mxu1  ;;  %4935 = vmatprep.subr.bf16.mxu0 %v11146_v2 }
 0x193   : > { %4729 = vmatmul.mubr.bf16.gmra.mrb[160].mxu0 %v6956_v55  ;;  %v719_v55 = vld [vmem:[%s11142_s1 + $0xac0] sm:$0xff] }
 0x194   : > { %4736 = vmatprep.mubr.bf16.mxu0 %v6965_v57  ;;  %4184 = vmatmul.mubr.bf16.gmra.mrb[160].mxu1 %v6954_v16  ;;  %v723_v57 = vld [vmem:[%s11142_s1 + $0xae0] sm:$0xff]  ;;  %v8006_v16 = vld [vmem:[%s8151_s30 + $0x138] sm:$0xff]  }
 0x195   : > { %4191 = vmatprep.mubr.bf16.mxu1 %v6963_v19  ;;  %v6979_v5 = vcombine.high %v719_v55, %v723_v57  ;;  %v731_v19 = vld [vmem:[%s11142_s1 + $0xb20] sm:$0xff]  ;;  %v6978_v28 = vcombine.low %v719_v55, %v723_v57  ;;  %4936 = vmatpush1.bf16.msra.mxu0 %v8006_v16  ;;  %v8013_v16 = vld [vmem:[%s8151_s30 + $0x158] sm:$0xff]  }
 0x196   : > { %v6987_v32 = vcombine.high %v727_v18, %v731_v19  ;;  %4937 = vmatprep.subr.bf16.mxu0 %v11146_v2 }
 0x197   : > { %v8796_v35 = vpop.f32.mrb[56].mxu1 }
 0x198   : > { %v3979_v42 = vpop.f32.mrb[57].mxu1 }
 0x199   : > { %v8798_v45 = vpop.f32.mrb[58].mxu1  ;;  %v744_v42 = vld [vmem:[%s11142_s1 + $0xb88] sm:$0xff] }
 0x19a   : > { %v3982_v49 = vpop.f32.mrb[59].mxu1 }
 0x19b   : > { %4737 = vmatmul.mubr.bf16.gmra.mrb[164].mxu0 %v6964_v11  ;;  %v736_v11 = vld [vmem:[%s11142_s1 + $0xb48] sm:$0xff]  ;;  %v735_v49 = vld [vmem:[%s11142_s1 + $0xb40] sm:$0xff] }
 0x19c   : > { %4744 = vmatprep.mubr.bf16.mxu0 %v6973_v14  ;;  %4192 = vmatmul.mubr.bf16.gmra.mrb[164].mxu1 %v6962_v40  ;;  %v740_v14 = vld [vmem:[%s11142_s1 + $0xb68] sm:$0xff]  ;;  %v8843_v40 = vld [vmem:[%s8151_s30 + $0x180] sm:$0xff]  }
 0x19d   : > { %4199 = vmatprep.mubr.bf16.mxu1 %v6971_v43  ;;  %v6997_v26 = vcombine.high %v736_v11, %v740_v14  ;;  %v748_v43 = vld [vmem:[%s11142_s1 + $0xba8] sm:$0xff]  ;;  %7406 = vmatpush1.bf16.msra.mxu1 %v8843_v40  ;;  %v6996_v54 = vcombine.low %v736_v11, %v740_v14 }
 0x19e   : > { %7391 = vmatprep.subr.bf16.mxu1 %v11146_v2  ;;  %v7005_v57 = vcombine.high %v744_v42, %v748_v43  ;;  %v752_v11 = vld [vmem:[%s11142_s1 + $0xbc8] sm:$0xff] }
 0x19f   : > { %v8816_v61 = vpop.f32.mrb[60].mxu1  ;;  %v756_v14 = vld [vmem:[%s11142_s1 + $0xbe8] sm:$0xff] }
 0x1a0   : > { %v3987_v3 = vpop.f32.mrb[61].mxu1 }
 0x1a1   : > { %v8818_v6 = vpop.f32.mrb[62].mxu1  ;;  %7407 = vmatpush1.bf16.msra.mxu1 %v8861_v51 }
 0x1a2   : > { %v3990_v8 = vpop.f32.mrb[63].mxu1  ;;  %7392 = vmatprep.subr.bf16.mxu1 %v11146_v2 }
 0x1a3   : > { %4745 = vmatmul.mubr.bf16.gmra.mrb[168].mxu0 %v6972_v34  ;;  %v8007_v34 = vld [vmem:[%s8151_s30 + $0x140] sm:$0xff]   ;;  %v8873_v8 = vld [vmem:[%s8151_s30 + $0x190] sm:$0xff]  }
 0x1a4   : > { %4752 = vmatprep.mubr.bf16.mxu0 %v6981_v37  ;;  %4200 = vmatmul.mubr.bf16.gmra.mrb[168].mxu1 %v6970_v0  ;;  %v6995_v0 = vcombine.high %v735_v49, %v739_v50 }
 0x1a5   : > { %4207 = vmatprep.mubr.bf16.mxu1 %v6979_v5  ;;  %4938 = vmatpush1.bf16.msra.mxu0 %v8007_v34  ;;  %v8011_v5 = vld [vmem:[%s8151_s30 + $0x150] sm:$0xff]  }
 0x1a6   : > { %4939 = vmatprep.subr.bf16.mxu0 %v11146_v2  ;;  %7408 = vmatpush1.bf16.msra.mxu1 %v8873_v8 }
 0x1a7   : > { %v8836_v25 = vpop.f32.mrb[64].mxu1  ;;  %7393 = vmatprep.subr.bf16.mxu1 %v11146_v2 }
 0x1a8   : > { %v3995_v31 = vpop.f32.mrb[65].mxu1 }
 0x1a9   : > { %v8838_v33 = vpop.f32.mrb[66].mxu1  ;;  %4940 = vmatpush1.bf16.msra.mxu0 %v8009_v47  ;;  %v7013_v31 = vcombine.high %v752_v11, %v756_v14 }
 0x1aa   : > { %v3998_v37 = vpop.f32.mrb[67].mxu1  ;;  %4941 = vmatprep.subr.bf16.mxu0 %v11146_v2 }
 0x1ab   : > { %4753 = vmatmul.mubr.bf16.gmra.mrb[172].mxu0 %v6980_v59  ;;  %v6986_v59 = vcombine.low %v727_v18, %v731_v19  ;;  %v743_v18 = vld [vmem:[%s11142_s1 + $0xb80] sm:$0xff] }
 0x1ac   : > { %4760 = vmatprep.mubr.bf16.mxu0 %v6989_v62  ;;  %4208 = vmatmul.mubr.bf16.gmra.mrb[172].mxu1 %v6978_v28  ;;  %v747_v19 = vld [vmem:[%s11142_s1 + $0xba0] sm:$0xff] }
 0x1ad   : > { %4215 = vmatprep.mubr.bf16.mxu1 %v6987_v32  ;;  %4942 = vmatpush1.bf16.msra.mxu0 %v8011_v5  ;;  %v6994_v32 = vcombine.low %v735_v49, %v739_v50  ;;  %v7003_v37 = vcombine.high %v743_v18, %v747_v19  ;;  %v764_v49 = vld [vmem:[%s11142_s1 + $0xc28] sm:$0xff]  ;;  %v7012_v5 = vcombine.low %v752_v11, %v756_v14  ;;  %v8933_v11 = vld [vmem:[%s8151_s30 + $0x1b0] sm:$0xff]  }
 0x1ae   : > { %4943 = vmatprep.subr.bf16.mxu0 %v11146_v2  ;;  %v8017_v50 = vld [vmem:[%s8151_s30 + $0x168] sm:$0xff]  }
 0x1af   : > { %v8864_v55 = vpop.f32.mrb[68].mxu1  ;;  %v768_v14 = vld [vmem:[%s11142_s1 + $0xc48] sm:$0xff] }
 0x1b0   : > { %v4003_v62 = vpop.f32.mrb[69].mxu1 }
 0x1b1   : > { %v8866_v3 = vpop.f32.mrb[70].mxu1  ;;  %4944 = vmatpush1.bf16.msra.mxu0 %v8013_v16  ;;  %v755_v62 = vld [vmem:[%s11142_s1 + $0xbe0] sm:$0xff] }
 0x1b2   : > { %v4006_v7 = vpop.f32.mrb[71].mxu1  ;;  %4945 = vmatprep.subr.bf16.mxu0 %v11146_v2 }
 0x1b3   : > { %4761 = vmatmul.mubr.bf16.gmra.mrb[176].mxu0 %v6988_v22  ;;  %v8891_v22 = vld [vmem:[%s8151_s30 + $0x198] sm:$0xff]  }
 0x1b4   : > { %4768 = vmatprep.mubr.bf16.mxu0 %v6997_v26  ;;  %4216 = vmatmul.mubr.bf16.gmra.mrb[176].mxu1 %v6986_v59  ;;  %v7004_v26 = vcombine.low %v744_v42, %v748_v43  ;;  %v8903_v42 = vld [vmem:[%s8151_s30 + $0x1a0] sm:$0xff]   ;;  %v760_v43 = vld [vmem:[%s11142_s1 + $0xc08] sm:$0xff] }
 0x1b5   : > { %4223 = vmatprep.mubr.bf16.mxu1 %v6995_v0  ;;  %7409 = vmatpush1.bf16.msra.mxu1 %v8891_v22  ;;  %v751_v59 = vld [vmem:[%s11142_s1 + $0xbc0] sm:$0xff]  ;;  %v8921_v0 = vld [vmem:[%s8151_s30 + $0x1a8] sm:$0xff]   ;;  %v7021_v16 = vcombine.high %v760_v43, %v764_v49 }
 0x1b6   : > { %7394 = vmatprep.subr.bf16.mxu1 %v11146_v2 }
 0x1b7   : > { %v8894_v28 = vpop.f32.mrb[72].mxu1 }
 0x1b8   : > { %v4011_v34 = vpop.f32.mrb[73].mxu1 }
 0x1b9   : > { %v8896_v47 = vpop.f32.mrb[74].mxu1  ;;  %7410 = vmatpush1.bf16.msra.mxu1 %v8903_v42 }
 0x1ba   : > { %7395 = vmatprep.subr.bf16.mxu1 %v11146_v2 }
 0x1bb   : > { %4769 = vmatmul.mubr.bf16.gmra.mrb[180].mxu0 %v6996_v54  ;;  %v8015_v54 = vld [vmem:[%s8151_s30 + $0x160] sm:$0xff]  }
 0x1bc   : > { %4776 = vmatprep.mubr.bf16.mxu0 %v7005_v57  ;;  %v4014_v57 = vpop.f32.mrb[75].mxu1  ;;  %4224 = vmatmul.mubr.bf16.gmra.mrb[180].mxu1 %v6994_v32  ;;  %v7011_v32 = vcombine.high %v751_v59, %v755_v62 }
 0x1bd   : > { %4231 = vmatprep.mubr.bf16.mxu1 %v7003_v37  ;;  %4946 = vmatpush1.bf16.msra.mxu0 %v8015_v54  ;;  %v8019_v37 = vld [vmem:[%s8151_s30 + $0x170] sm:$0xff]   ;;  %v759_v57 = vld [vmem:[%s11142_s1 + $0xc00] sm:$0xff] }
 0x1be   : > { %4947 = vmatprep.subr.bf16.mxu0 %v11146_v2  ;;  %7411 = vmatpush1.bf16.msra.mxu1 %v8921_v0 }
 0x1bf   : > { %v8924_v7 = vpop.f32.mrb[76].mxu1  ;;  %7396 = vmatprep.subr.bf16.mxu1 %v11146_v2 }
 0x1c1   : > { %4948 = vmatpush1.bf16.msra.mxu0 %v8017_v50  ;;  %v763_v50 = vld [vmem:[%s11142_s1 + $0xc20] sm:$0xff] }
 0x1c2   : > { %4949 = vmatprep.subr.bf16.mxu0 %v11146_v2  ;;  %7412 = vmatpush1.bf16.msra.mxu1 %v8933_v11 }
 0x1c3   : > { %4777 = vmatmul.mubr.bf16.gmra.mrb[184].mxu0 %v7004_v26  ;;  %v7002_v26 = vcombine.low %v743_v18, %v747_v19  ;;  %v772_v18 = vld [vmem:[%s11142_s1 + $0xc68] sm:$0xff]  ;;  %v8021_v19 = vld [vmem:[%s8151_s30 + $0x178] sm:$0xff]   ;;  %7397 = vmatprep.subr.bf16.mxu1 %v11146_v2 }
 0x1c4   : > { %4784 = vmatprep.mubr.bf16.mxu0 %v7013_v31  ;;  %v4019_v31 = vpop.f32.mrb[77].mxu1 }
 0x1c5   : > { %v8926_v34 = vpop.f32.mrb[78].mxu1  ;;  %4232 = vmatmul.mubr.bf16.gmra.mrb[184].mxu1 %v7002_v26  ;;  %4950 = vmatpush1.bf16.msra.mxu0 %v8019_v37  ;;  %v7029_v31 = vcombine.high %v768_v14, %v772_v18 }
 0x1c6   : > { %11170 = vst [vmem:[#allocation10_spill] sm:$0xff] %v8926_v34  ;;  %v4022_v54 = vpop.f32.mrb[79].mxu1  ;;  %4239 = vmatprep.mubr.bf16.mxu1 %v7011_v32  ;;  %4951 = vmatprep.subr.bf16.mxu0 %v11146_v2  ;;  %v7010_v32 = vcombine.low %v751_v59, %v755_v62  ;;  %v780_v59 = vld [vmem:[%s11142_s1 + $0xca8] sm:$0xff]  ;;  %v771_v62 = vld [vmem:[%s11142_s1 + $0xc60] sm:$0xff] }
 0x1c7   : > { %v8954_v26 = vpop.f32.mrb[80].mxu1  ;;  %v7019_v54 = vcombine.high %v759_v57, %v763_v50 }
 0x1c8   : > { %11171 = vst [vmem:[#allocation11_spill] sm:$0xff] %v8954_v26  ;;  %v4027_v37 = vpop.f32.mrb[81].mxu1  ;;  %v9040_v26 = vld [vmem:[%s8151_s30 + $0x1f0] sm:$0xff]  }
 0x1c9   : > { %4952 = vmatpush1.bf16.msra.mxu0 %v8021_v19  ;;  %v8956_v53 = vpop.f32.mrb[82].mxu1  ;;  %v8978_v19 = vld [vmem:[%s8151_s30 + $0x1c8] sm:$0xff]   ;;  %v7018_v37 = vcombine.low %v759_v57, %v763_v50  ;;  %v779_v57 = vld [vmem:[%s11142_s1 + $0xca0] sm:$0xff]  ;;  %v9004_v50 = vld [vmem:[%s8151_s30 + $0x1d8] sm:$0xff]  }
 0x1ca   : > { %11172 = vst [vmem:[#allocation12_spill] sm:$0xff] %v8956_v53  ;;  %v4030_v48 = vpop.f32.mrb[83].mxu1  ;;  %5466 = vmatprep.subr.bf16.mxu0 %v11146_v2 }
 0x1cb   : > { %4785 = vmatmul.mubr.bf16.gmra.mrb[188].mxu0 %v7012_v5  ;;  %v8951_v5 = vld [vmem:[%s8151_s30 + $0x1b8] sm:$0xff]   ;;  %v767_v48 = vld [vmem:[%s11142_s1 + $0xc40] sm:$0xff] }
 0x1cc   : > { %4792 = vmatprep.mubr.bf16.mxu0 %v7021_v16  ;;  %v7020_v16 = vcombine.low %v760_v43, %v764_v49  ;;  %7413 = vmatpush1.bf16.msra.mxu1 %v8951_v5  ;;  %v8962_v43 = vld [vmem:[%s8151_s30 + $0x1c0] sm:$0xff]   ;;  %v776_v49 = vld [vmem:[%s11142_s1 + $0xc88] sm:$0xff]  ;;  %v7027_v41 = vcombine.high %v767_v48, %v771_v62 }
 0x1cd   : > { %7398 = vmatprep.subr.bf16.mxu1 %v11146_v2  ;;  %4240 = vmatmul.mubr.bf16.gmra.mrb[188].mxu1 %v7010_v32  ;;  %v7037_v32 = vcombine.high %v776_v49, %v780_v59 }
 0x1ce   : > { %4247 = vmatprep.mubr.bf16.mxu1 %v7019_v54 }
 0x1d0   : > { %7414 = vmatpush1.bf16.msra.mxu1 %v8962_v43 }
 0x1d1   : > { %7399 = vmatprep.subr.bf16.mxu1 %v11146_v2 }
 0x1d3   : > { %4793 = vmatmul.mubr.bf16.gmra.mrb[192].mxu0 %v7020_v16  ;;  %v7028_v16 = vcombine.low %v768_v14, %v772_v18  ;;  %v784_v14 = vld [vmem:[%s11142_s1 + $0xcc8] sm:$0xff] }
 0x1d4   : > { %4800 = vmatprep.mubr.bf16.mxu0 %v7029_v31  ;;  %v8981_v31 = vpop.f32.mrb[84].mxu1  ;;  %7415 = vmatpush1.bf16.msra.mxu1 %v8978_v19  ;;  %v788_v18 = vld [vmem:[%s11142_s1 + $0xce8] sm:$0xff] }
 0x1d5   : > { %11173 = vst [vmem:[#allocation13_spill] sm:$0xff] %v8981_v31  ;;  %v4035_v54 = vpop.f32.mrb[85].mxu1  ;;  %7400 = vmatprep.subr.bf16.mxu1 %v11146_v2  ;;  %4248 = vmatmul.mubr.bf16.gmra.mrb[192].mxu1 %v7018_v37  ;;  %v7045_v37 = vcombine.high %v784_v14, %v788_v18  ;;  %v9014_v31 = vld [vmem:[%s8151_s30 + $0x1e0] sm:$0xff]  }
 0x1d6   : > { %v8983_v36 = vpop.f32.mrb[86].mxu1  ;;  %4255 = vmatprep.mubr.bf16.mxu1 %v7027_v41  ;;  %v7026_v41 = vcombine.low %v767_v48, %v771_v62  ;;  %v787_v48 = vld [vmem:[%s11142_s1 + $0xce0] sm:$0xff]  ;;  %v9030_v62 = vld [vmem:[%s8151_s30 + $0x1e8] sm:$0xff]  }
 0x1d7   : > { %11174 = vst [vmem:[#allocation14_spill] sm:$0xff] %v8983_v36  ;;  %v4038_v29 = vpop.f32.mrb[87].mxu1 }
 0x1d8   : > { %v775_v29 = vld [vmem:[%s11142_s1 + $0xc80] sm:$0xff]  ;;  %7416 = vmatpush1.bf16.msra.mxu1 %v8988_v24 }
 0x1d9   : > { %7401 = vmatprep.subr.bf16.mxu1 %v11146_v2  ;;  %v7035_v17 = vcombine.high %v775_v29, %v779_v57 }
 0x1db   : > { %4801 = vmatmul.mubr.bf16.gmra.mrb[196].mxu0 %v7028_v16  ;;  %v7036_v16 = vcombine.low %v776_v49, %v780_v59  ;;  %v792_v49 = vld [vmem:[%s11142_s1 + $0xd08] sm:$0xff] }
 0x1dc   : > { %4808 = vmatprep.mubr.bf16.mxu0 %v7037_v32  ;;  %v9007_v32 = vpop.f32.mrb[88].mxu1  ;;  %7417 = vmatpush1.bf16.msra.mxu1 %v9004_v50  ;;  %v796_v59 = vld [vmem:[%s11142_s1 + $0xd28] sm:$0xff] }
 0x1dd   : > { %11175 = vst [vmem:[#allocation15_spill] sm:$0xff] %v9007_v32  ;;  %v4043_v54 = vpop.f32.mrb[89].mxu1  ;;  %7402 = vmatprep.subr.bf16.mxu1 %v11146_v2  ;;  %4256 = vmatmul.mubr.bf16.gmra.mrb[196].mxu1 %v7026_v41  ;;  %v7053_v41 = vcombine.high %v792_v49, %v796_v59 }
 0x1de   : > { %v9009_v12 = vpop.f32.mrb[90].mxu1  ;;  %4263 = vmatprep.mubr.bf16.mxu1 %v7035_v17  ;;  %v7034_v17 = vcombine.low %v775_v29, %v779_v57  ;;  %v795_v29 = vld [vmem:[%s11142_s1 + $0xd20] sm:$0xff]  ;;  %v9056_v57 = vld [vmem:[%s8151_s30 + $0x1f8] sm:$0xff]  }
 0x1df   : > { %11176 = vst [vmem:[#allocation16_spill] sm:$0xff] %v9009_v12  ;;  %v4046_v36 = vpop.f32.mrb[91].mxu1 }
 0x1e0   : > { %v783_v36 = vld [vmem:[%s11142_s1 + $0xcc0] sm:$0xff]  ;;  %7418 = vmatpush1.bf16.msra.mxu1 %v9014_v31 }
 0x1e1   : > { %7403 = vmatprep.subr.bf16.mxu1 %v11146_v2  ;;  %v7043_v12 = vcombine.high %v783_v36, %v787_v48 }
 0x1e3   : > { %4809 = vmatmul.mubr.bf16.gmra.mrb[200].mxu0 %v7036_v16  ;;  %v7044_v16 = vcombine.low %v784_v14, %v788_v18  ;;  %v800_v14 = vld [vmem:[%s11142_s1 + $0xd48] sm:$0xff] }
 0x1e4   : > { %4816 = vmatprep.mubr.bf16.mxu0 %v7045_v37  ;;  %v9033_v37 = vpop.f32.mrb[92].mxu1  ;;  %7419 = vmatpush1.bf16.msra.mxu1 %v9030_v62  ;;  %v804_v18 = vld [vmem:[%s11142_s1 + $0xd68] sm:$0xff] }
 0x1e5   : > { %11177 = vst [vmem:[#allocation17_spill] sm:$0xff] %v9033_v37  ;;  %v4051_v54 = vpop.f32.mrb[93].mxu1  ;;  %7404 = vmatprep.subr.bf16.mxu1 %v11146_v2  ;;  %4264 = vmatmul.mubr.bf16.gmra.mrb[200].mxu1 %v7034_v17  ;;  %v7061_v17 = vcombine.high %v800_v14, %v804_v18 }
 0x1e6   : > { %v9035_v32 = vpop.f32.mrb[94].mxu1  ;;  %4271 = vmatprep.mubr.bf16.mxu1 %v7043_v12  ;;  %v7042_v54 = vcombine.low %v783_v36, %v787_v48  ;;  %v799_v36 = vld [vmem:[%s11142_s1 + $0xd40] sm:$0xff]  ;;  %v7060_v48 = vcombine.low %v800_v14, %v804_v18  ;;  %v820_v14 = vld [vmem:[%s11142_s1 + $0xde8] sm:$0xff] }
 0x1e7   : > { %11178 = vst [vmem:[#allocation18_spill] sm:$0xff] %v9035_v32  ;;  %v4054_v53 = vpop.f32.mrb[95].mxu1  ;;  %v807_v18 = vld [vmem:[%s11142_s1 + $0xd80] sm:$0xff] }
 0x1e8   : > { %v791_v53 = vld [vmem:[%s11142_s1 + $0xd00] sm:$0xff]  ;;  %7420 = vmatpush1.bf16.msra.mxu1 %v9040_v26 }
 0x1e9   : > { %7405 = vmatprep.subr.bf16.mxu1 %v11146_v2  ;;  %v7051_v32 = vcombine.high %v791_v53, %v795_v29 }
 0x1eb   : > { %4817 = vmatmul.mubr.bf16.gmra.mrb[204].mxu0 %v7044_v16  ;;  %v7052_v16 = vcombine.low %v792_v49, %v796_v59  ;;  %v808_v49 = vld [vmem:[%s11142_s1 + $0xd88] sm:$0xff] }
 0x1ec   : > { %4824 = vmatprep.mubr.bf16.mxu0 %v7053_v41  ;;  %v9059_v41 = vpop.f32.mrb[96].mxu1  ;;  %7421 = vmatpush1.bf16.msra.mxu1 %v9056_v57  ;;  %v812_v59 = vld [vmem:[%s11142_s1 + $0xda8] sm:$0xff] }
 0x1ed   : > { %11179 = vst [vmem:[#allocation19_spill] sm:$0xff] %v9059_v41  ;;  %v4059_v12 = vpop.f32.mrb[97].mxu1  ;;  %4272 = vmatmul.mubr.bf16.gmra.mrb[204].mxu1 %v7042_v54  ;;  %v7050_v54 = vcombine.low %v791_v53, %v795_v29  ;;  %v811_v53 = vld [vmem:[%s11142_s1 + $0xda0] sm:$0xff]  ;;  %v7068_v29 = vcombine.low %v808_v49, %v812_v59 }
 0x1ee   : > { %v9061_v37 = vpop.f32.mrb[98].mxu1  ;;  %4279 = vmatprep.mubr.bf16.mxu1 %v7051_v32  ;;  %v816_v32 = vld [vmem:[%s11142_s1 + $0xdc8] sm:$0xff] }
 0x1ef   : > { %11180 = vst [vmem:[#allocation20_spill] sm:$0xff] %v9061_v37  ;;  %v4062_v34 = vpop.f32.mrb[99].mxu1 }
 0x1f0   : > { %v803_v34 = vld [vmem:[%s11142_s1 + $0xd60] sm:$0xff] }
 0x1f1   : > { %v7059_v2 = vcombine.high %v799_v36, %v803_v34 }
 0x1f3   : > { %4825 = vmatmul.mubr.bf16.gmra.mrb[208].mxu0 %v7052_v16  ;;  %v9076_v16 = vpop.f32.mrb[100].mxu1 }
 0x1f4   : > { %4832 = vmatprep.mubr.bf16.mxu0 %v7061_v17  ;;  %11181 = vst [vmem:[#allocation21_spill] sm:$0xff] %v9076_v16  ;;  %v7069_v17 = vcombine.high %v808_v49, %v812_v59  ;;  %v4067_v12 = vpop.f32.mrb[101].mxu1  ;;  %v828_v49 = vld [vmem:[%s11142_s1 + $0xe28] sm:$0xff]  ;;  %v815_v59 = vld [vmem:[%s11142_s1 + $0xdc0] sm:$0xff] }
 0x1f5   : > { %v9078_v37 = vpop.f32.mrb[102].mxu1  ;;  %4280 = vmatmul.mubr.bf16.gmra.mrb[208].mxu1 %v7050_v54  ;;  %v7067_v12 = vcombine.high %v807_v18, %v811_v53 }
 0x1f6   : > { %11182 = vst [vmem:[#allocation22_spill] sm:$0xff] %v9078_v37  ;;  %v4070_v41 = vpop.f32.mrb[103].mxu1  ;;  %4287 = vmatprep.mubr.bf16.mxu1 %v7059_v2  ;;  %v824_v2 = vld [vmem:[%s11142_s1 + $0xe08] sm:$0xff] }
 0x1f7   : > { %v9092_v41 = vpop.f32.mrb[104].mxu1 }
 0x1f8   : > { %11183 = vst [vmem:[#allocation23_spill] sm:$0xff] %v9092_v41  ;;  %v4075_v54 = vpop.f32.mrb[105].mxu1 }
 0x1f9   : > { %v9094_v37 = vpop.f32.mrb[106].mxu1 }
 0x1fa   : > { %11184 = vst [vmem:[#allocation24_spill] sm:$0xff] %v9094_v37  ;;  %v4078_v16 = vpop.f32.mrb[107].mxu1 }
 0x1fb   : > { %4833 = vmatmul.mubr.bf16.gmra.mrb[212].mxu0 %v7060_v48  ;;  %v7077_v48 = vcombine.high %v816_v32, %v820_v14 }
 0x1fc   : > { %4840 = vmatprep.mubr.bf16.mxu0 %v7069_v17  ;;  %v7058_v17 = vcombine.low %v799_v36, %v803_v34  ;;  %v819_v36 = vld [vmem:[%s11142_s1 + $0xde0] sm:$0xff]  ;;  %v7076_v34 = vcombine.low %v816_v32, %v820_v14  ;;  %v836_v32 = vld [vmem:[%s11142_s1 + $0xe68] sm:$0xff] }
 0x1fd   : > { %v7075_v54 = vcombine.high %v815_v59, %v819_v36  ;;  %v823_v14 = vld [vmem:[%s11142_s1 + $0xe00] sm:$0xff] }
 0x1fe   : > { %4288 = vmatmul.mubr.bf16.gmra.mrb[212].mxu1 %v7058_v17 }
 0x1ff   : > { %4295 = vmatprep.mubr.bf16.mxu1 %v7067_v12  ;;  %v9108_v16 = vpop.f32.mrb[108].mxu1  ;;  %v832_v12 = vld [vmem:[%s11142_s1 + $0xe48] sm:$0xff] }
 0x200   : > { %11185 = vst [vmem:[#allocation25_spill] sm:$0xff] %v9108_v16  ;;  %v4083_v17 = vpop.f32.mrb[109].mxu1 }
 0x201   : > { %v9110_v37 = vpop.f32.mrb[110].mxu1 }
 0x202   : > { %11186 = vst [vmem:[#allocation26_spill] sm:$0xff] %v9110_v37  ;;  %v4086_v41 = vpop.f32.mrb[111].mxu1 }
 0x203   : > { %4841 = vmatmul.mubr.bf16.gmra.mrb[216].mxu0 %v7068_v29  ;;  %v7085_v29 = vcombine.high %v824_v2, %v828_v49 }
 0x204   : > { %4848 = vmatprep.mubr.bf16.mxu0 %v7077_v48  ;;  %v7066_v48 = vcombine.low %v807_v18, %v811_v53  ;;  %v827_v18 = vld [vmem:[%s11142_s1 + $0xe20] sm:$0xff]  ;;  %v7084_v53 = vcombine.low %v824_v2, %v828_v49  ;;  %v844_v2 = vld [vmem:[%s11142_s1 + $0xea8] sm:$0xff] }
 0x205   : > { %v7083_v17 = vcombine.high %v823_v14, %v827_v18  ;;  %v831_v49 = vld [vmem:[%s11142_s1 + $0xe40] sm:$0xff] }
 0x206   : > { %4296 = vmatmul.mubr.bf16.gmra.mrb[216].mxu1 %v7066_v48 }
 0x207   : > { %4303 = vmatprep.mubr.bf16.mxu1 %v7075_v54  ;;  %v9124_v41 = vpop.f32.mrb[112].mxu1  ;;  %v840_v54 = vld [vmem:[%s11142_s1 + $0xe88] sm:$0xff] }
 0x208   : > { %11187 = vst [vmem:[#allocation27_spill] sm:$0xff] %v9124_v41  ;;  %v4091_v48 = vpop.f32.mrb[113].mxu1 }
 0x209   : > { %v9126_v37 = vpop.f32.mrb[114].mxu1 }
 0x20a   : > { %11188 = vst [vmem:[#allocation28_spill] sm:$0xff] %v9126_v37  ;;  %v4094_v16 = vpop.f32.mrb[115].mxu1 }
 0x20b   : > { %4849 = vmatmul.mubr.bf16.gmra.mrb[220].mxu0 %v7076_v34  ;;  %v7093_v34 = vcombine.high %v832_v12, %v836_v32 }
 0x20c   : > { %4856 = vmatprep.mubr.bf16.mxu0 %v7085_v29  ;;  %v7074_v29 = vcombine.low %v815_v59, %v819_v36  ;;  %v835_v59 = vld [vmem:[%s11142_s1 + $0xe60] sm:$0xff]  ;;  %v7092_v36 = vcombine.low %v832_v12, %v836_v32  ;;  %v852_v12 = vld [vmem:[%s11142_s1 + $0xee8] sm:$0xff] }
 0x20d   : > { %v7091_v48 = vcombine.high %v831_v49, %v835_v59  ;;  %v839_v32 = vld [vmem:[%s11142_s1 + $0xe80] sm:$0xff] }
 0x20e   : > { %4304 = vmatmul.mubr.bf16.gmra.mrb[220].mxu1 %v7074_v29 }
 0x20f   : > { %4311 = vmatprep.mubr.bf16.mxu1 %v7083_v17  ;;  %v9140_v16 = vpop.f32.mrb[116].mxu1  ;;  %v848_v17 = vld [vmem:[%s11142_s1 + $0xec8] sm:$0xff] }
 0x210   : > { %11189 = vst [vmem:[#allocation29_spill] sm:$0xff] %v9140_v16  ;;  %v4099_v29 = vpop.f32.mrb[117].mxu1 }
 0x211   : > { %v9142_v37 = vpop.f32.mrb[118].mxu1 }
 0x212   : > { %11190 = vst [vmem:[#allocation30_spill] sm:$0xff] %v9142_v37  ;;  %v4102_v41 = vpop.f32.mrb[119].mxu1 }
 0x213   : > { %4857 = vmatmul.mubr.bf16.gmra.mrb[224].mxu0 %v7084_v53  ;;  %v7101_v53 = vcombine.high %v840_v54, %v844_v2 }
 0x214   : > { %4864 = vmatprep.mubr.bf16.mxu0 %v7093_v34  ;;  %v7082_v34 = vcombine.low %v823_v14, %v827_v18  ;;  %v843_v14 = vld [vmem:[%s11142_s1 + $0xea0] sm:$0xff]  ;;  %v7100_v18 = vcombine.low %v840_v54, %v844_v2  ;;  %v860_v54 = vld [vmem:[%s11142_s1 + $0xf28] sm:$0xff] }
 0x215   : > { %v7099_v29 = vcombine.high %v839_v32, %v843_v14  ;;  %v847_v2 = vld [vmem:[%s11142_s1 + $0xec0] sm:$0xff] }
 0x216   : > { %4312 = vmatmul.mubr.bf16.gmra.mrb[224].mxu1 %v7082_v34 }
 0x217   : > { %4319 = vmatprep.mubr.bf16.mxu1 %v7091_v48  ;;  %v9156_v41 = vpop.f32.mrb[120].mxu1  ;;  %v856_v48 = vld [vmem:[%s11142_s1 + $0xf08] sm:$0xff] }
 0x218   : > { %11191 = vst [vmem:[#allocation31_spill] sm:$0xff] %v9156_v41  ;;  %v4107_v34 = vpop.f32.mrb[121].mxu1 }
 0x219   : > { %v9158_v37 = vpop.f32.mrb[122].mxu1 }
 0x21a   : > { %11192 = vst [vmem:[#allocation32_spill] sm:$0xff] %v9158_v37  ;;  %v4110_v16 = vpop.f32.mrb[123].mxu1 }
 0x21b   : > { %4865 = vmatmul.mubr.bf16.gmra.mrb[228].mxu0 %v7092_v36  ;;  %v7109_v36 = vcombine.high %v848_v17, %v852_v12 }
 0x21c   : > { %4872 = vmatprep.mubr.bf16.mxu0 %v7101_v53  ;;  %v7090_v53 = vcombine.low %v831_v49, %v835_v59  ;;  %v851_v49 = vld [vmem:[%s11142_s1 + $0xee0] sm:$0xff]  ;;  %v7108_v59 = vcombine.low %v848_v17, %v852_v12  ;;  %v868_v17 = vld [vmem:[%s11142_s1 + $0xf68] sm:$0xff] }
 0x21d   : > { %v7107_v34 = vcombine.high %v847_v2, %v851_v49  ;;  %v855_v12 = vld [vmem:[%s11142_s1 + $0xf00] sm:$0xff] }
 0x21e   : > { %4320 = vmatmul.mubr.bf16.gmra.mrb[228].mxu1 %v7090_v53 }
 0x21f   : > { %4327 = vmatprep.mubr.bf16.mxu1 %v7099_v29  ;;  %v9172_v16 = vpop.f32.mrb[124].mxu1  ;;  %v864_v29 = vld [vmem:[%s11142_s1 + $0xf48] sm:$0xff] }
 0x220   : > { %11193 = vst [vmem:[#allocation33_spill] sm:$0xff] %v9172_v16  ;;  %v4115_v53 = vpop.f32.mrb[125].mxu1 }
 0x221   : > { %v9174_v37 = vpop.f32.mrb[126].mxu1 }
 0x222   : > { %11194 = vst [vmem:[#allocation34_spill] sm:$0xff] %v9174_v37  ;;  %v4118_v41 = vpop.f32.mrb[127].mxu1 }
 0x223   : > { %4873 = vmatmul.mubr.bf16.gmra.mrb[232].mxu0 %v7100_v18  ;;  %v7117_v18 = vcombine.high %v856_v48, %v860_v54 }
 0x224   : > { %4880 = vmatprep.mubr.bf16.mxu0 %v7109_v36  ;;  %v7098_v36 = vcombine.low %v839_v32, %v843_v14  ;;  %v859_v32 = vld [vmem:[%s11142_s1 + $0xf20] sm:$0xff]  ;;  %v7116_v14 = vcombine.low %v856_v48, %v860_v54  ;;  %v876_v48 = vld [vmem:[%s11142_s1 + $0xfa8] sm:$0xff] }
 0x225   : > { %v7115_v53 = vcombine.high %v855_v12, %v859_v32  ;;  %v863_v54 = vld [vmem:[%s11142_s1 + $0xf40] sm:$0xff] }
 0x226   : > { %4328 = vmatmul.mubr.bf16.gmra.mrb[232].mxu1 %v7098_v36 }
 0x227   : > { %4335 = vmatprep.mubr.bf16.mxu1 %v7107_v34  ;;  %v9188_v41 = vpop.f32.mrb[128].mxu1  ;;  %v872_v34 = vld [vmem:[%s11142_s1 + $0xf88] sm:$0xff] }
 0x228   : > { %11195 = vst [vmem:[#allocation35_spill] sm:$0xff] %v9188_v41  ;;  %v4123_v36 = vpop.f32.mrb[129].mxu1 }
 0x229   : > { %v9190_v37 = vpop.f32.mrb[130].mxu1 }
 0x22a   : > { %11196 = vst [vmem:[#allocation36_spill] sm:$0xff] %v9190_v37  ;;  %v4126_v16 = vpop.f32.mrb[131].mxu1 }
 0x22b   : > { %4881 = vmatmul.mubr.bf16.gmra.mrb[236].mxu0 %v7108_v59  ;;  %v7125_v59 = vcombine.high %v864_v29, %v868_v17 }
 0x22c   : > { %4888 = vmatprep.mubr.bf16.mxu0 %v7117_v18  ;;  %v7106_v18 = vcombine.low %v847_v2, %v851_v49  ;;  %v867_v2 = vld [vmem:[%s11142_s1 + $0xf60] sm:$0xff]  ;;  %v7124_v49 = vcombine.low %v864_v29, %v868_v17  ;;  %v884_v29 = vld [vmem:[%s11142_s1 + $0xfe8] sm:$0xff] }
 0x22d   : > { %v7123_v36 = vcombine.high %v863_v54, %v867_v2  ;;  %v871_v17 = vld [vmem:[%s11142_s1 + $0xf80] sm:$0xff] }
 0x22e   : > { %4336 = vmatmul.mubr.bf16.gmra.mrb[236].mxu1 %v7106_v18 }
 0x22f   : > { %4343 = vmatprep.mubr.bf16.mxu1 %v7115_v53  ;;  %v9204_v16 = vpop.f32.mrb[132].mxu1  ;;  %v880_v53 = vld [vmem:[%s11142_s1 + $0xfc8] sm:$0xff] }
 0x230   : > { %11197 = vst [vmem:[#allocation37_spill] sm:$0xff] %v9204_v16  ;;  %v4131_v18 = vpop.f32.mrb[133].mxu1 }
 0x231   : > { %v9206_v37 = vpop.f32.mrb[134].mxu1 }
 0x232   : > { %11198 = vst [vmem:[#allocation38_spill] sm:$0xff] %v9206_v37  ;;  %v4134_v41 = vpop.f32.mrb[135].mxu1 }
 0x233   : > { %4889 = vmatmul.mubr.bf16.gmra.mrb[240].mxu0 %v7116_v14  ;;  %v7133_v14 = vcombine.high %v872_v34, %v876_v48 }
 0x234   : > { %4896 = vmatprep.mubr.bf16.mxu0 %v7125_v59  ;;  %v7114_v59 = vcombine.low %v855_v12, %v859_v32  ;;  %v875_v12 = vld [vmem:[%s11142_s1 + $0xfa0] sm:$0xff]  ;;  %v7132_v32 = vcombine.low %v872_v34, %v876_v48  ;;  %v381_v34 = vld [vmem:[%s11142_s1 + $0x30] sm:$0xff] }
 0x235   : > { %v7131_v18 = vcombine.high %v871_v17, %v875_v12  ;;  %v879_v48 = vld [vmem:[%s11142_s1 + $0xfc0] sm:$0xff] }
 0x236   : > { %4344 = vmatmul.mubr.bf16.gmra.mrb[240].mxu1 %v7114_v59 }
 0x237   : > { %4351 = vmatprep.mubr.bf16.mxu1 %v7123_v36  ;;  %v9220_v41 = vpop.f32.mrb[136].mxu1  ;;  %v377_v36 = vld [vmem:[%s11142_s1 + $0x10] sm:$0xff] }
 0x238   : > { %11199 = vst [vmem:[#allocation39_spill] sm:$0xff] %v9220_v41  ;;  %v4139_v59 = vpop.f32.mrb[137].mxu1 }
 0x239   : > { %v9222_v37 = vpop.f32.mrb[138].mxu1 }
 0x23a   : > { %11200 = vst [vmem:[#allocation40_spill] sm:$0xff] %v9222_v37  ;;  %v4142_v16 = vpop.f32.mrb[139].mxu1 }
 0x23b   : > { %4897 = vmatmul.mubr.bf16.gmra.mrb[244].mxu0 %v7124_v49  ;;  %v7141_v49 = vcombine.high %v880_v53, %v884_v29 }
 0x23c   : > { %4904 = vmatprep.mubr.bf16.mxu0 %v7133_v14  ;;  %v7122_v14 = vcombine.low %v863_v54, %v867_v2  ;;  %v883_v54 = vld [vmem:[%s11142_s1 + $0xfe0] sm:$0xff]  ;;  %v7140_v2 = vcombine.low %v880_v53, %v884_v29  ;;  %v389_v53 = vld [vmem:[%s11142_s1 + $0x70] sm:$0xff]  ;;  %v410_v29 = vld [vmem:[%s11142_s1 + $0x118] sm:$0xff] }
 0x23d   : > { %v7139_v59 = vcombine.high %v879_v48, %v883_v54 }
 0x23e   : > { %4352 = vmatmul.mubr.bf16.gmra.mrb[244].mxu1 %v7122_v14 }
 0x23f   : > { %4359 = vmatprep.mubr.bf16.mxu1 %v7131_v18  ;;  %v9236_v16 = vpop.f32.mrb[140].mxu1  ;;  %v385_v18 = vld [vmem:[%s11142_s1 + $0x50] sm:$0xff] }
 0x240   : > { %11201 = vst [vmem:[#allocation41_spill] sm:$0xff] %v9236_v16  ;;  %v4147_v14 = vpop.f32.mrb[141].mxu1 }
 0x241   : > { %v9238_v37 = vpop.f32.mrb[142].mxu1 }
 0x242   : > { %11202 = vst [vmem:[#allocation42_spill] sm:$0xff] %v9238_v37  ;;  %v4150_v41 = vpop.f32.mrb[143].mxu1 }
 0x243   : > { %4905 = vmatmul.mubr.bf16.gmra.mrb[248].mxu0 %v7132_v32  ;;  %v6639_v32 = vcombine.high %v377_v36, %v381_v34 }
 0x244   : > { %4912 = vmatprep.mubr.bf16.mxu0 %v7141_v49  ;;  %v7130_v49 = vcombine.low %v871_v17, %v875_v12  ;;  %v414_v17 = vld [vmem:[%s11142_s1 + $0x138] sm:$0xff]  ;;  %v6638_v12 = vcombine.low %v377_v36, %v381_v34  ;;  %v397_v36 = vld [vmem:[%s11142_s1 + $0xb0] sm:$0xff] }
 0x245   : > { %v6673_v14 = vcombine.high %v410_v29, %v414_v17  ;;  %v418_v34 = vld [vmem:[%s11142_s1 + $0x158] sm:$0xff] }
 0x246   : > { %4360 = vmatmul.mubr.bf16.gmra.mrb[248].mxu1 %v7130_v49 }
 0x247   : > { %4367 = vmatprep.mubr.bf16.mxu1 %v7139_v59  ;;  %v9252_v41 = vpop.f32.mrb[144].mxu1  ;;  %v393_v59 = vld [vmem:[%s11142_s1 + $0x90] sm:$0xff] }
 0x248   : > { %v4155_v49 = vpop.f32.mrb[145].mxu1 }
 0x249   : > { %v9254_v37 = vpop.f32.mrb[146].mxu1 }
 0x24a   : > { %11203 = vst [vmem:[#allocation43_spill] sm:$0xff] %v9254_v37  ;;  %v4158_v16 = vpop.f32.mrb[147].mxu1 }
 0x24b   : > { %4913 = vmatmul.mubr.bf16.gmra.mrb[252].mxu0 %v7140_v2  ;;  %v6647_v2 = vcombine.high %v385_v18, %v389_v53  ;;  %v6646_v16 = vcombine.low %v385_v18, %v389_v53  ;;  %v401_v18 = vld [vmem:[%s11142_s1 + $0xd0] sm:$0xff] }
 0x24c   : > { %4953 = vmatprep.mubr.bf16.mxu0 %v6639_v32  ;;  %v7138_v32 = vcombine.low %v879_v48, %v883_v54  ;;  %v422_v48 = vld [vmem:[%s11142_s1 + $0x178] sm:$0xff]  ;;  %v11204_v54 = vmov 0   ;;  %v405_v53 = vld [vmem:[%s11142_s1 + $0xf0] sm:$0xff] }
 0x24d   : > { %v6681_v37 = vcombine.high %v418_v34, %v422_v48 }
 0x24e   : > { %4368 = vmatmul.mubr.bf16.gmra.mrb[252].mxu1 %v7138_v32  ;;  %v6672_v32 = vcombine.low %v410_v29, %v414_v17  ;;  %v430_v29 = vld [vmem:[%s11142_s1 + $0x1b8] sm:$0xff]  ;;  %v6654_v17 = vcombine.low %v393_v59, %v397_v36 }
 0x24f   : > { %5530 = vmatprep.mubr.bf16.mxu1 %v6673_v14 }
 0x253   : > { %4954 = vmatmul.mubr.bf16.vlgmr.msra.gmra.mrb[0].mxu0 %v6638_v12  ;;  %v9270_v12 = vpop.f32.mrb[148].mxu1 }
 0x254   : > { %4961 = vmatprep.mubr.bf16.mxu0 %v6647_v2  ;;  %5467 = vmatpush1.bf16.msra.mxu0 %v8843_v40  ;;  %v6655_v2 = vcombine.high %v393_v59, %v397_v36  ;;  %v4163_v49 = vpop.f32.mrb[149].mxu1  ;;  %v409_v59 = vld [vmem:[%s11142_s1 + $0x110] sm:$0xff] }
 0x255   : > { %5468 = vmatprep.subr.bf16.mxu0 %v11204_v54  ;;  %v9272_v14 = vpop.f32.mrb[150].mxu1  ;;  %v413_v36 = vld [vmem:[%s11142_s1 + $0x130] sm:$0xff] }
 0x256   : > { %v4166_v40 = vpop.f32.mrb[151].mxu1  ;;  %5531 = vmatmul.mubr.bf16.vlgmr.msra.gmra.mrb[0].mxu1 %v6672_v32  ;;  %v6680_v32 = vcombine.low %v418_v34, %v422_v48  ;;  %v438_v34 = vld [vmem:[%s11142_s1 + $0x1f8] sm:$0xff]  ;;  %v6662_v48 = vcombine.low %v401_v18, %v405_v53 }
 0x257   : > { %5538 = vmatprep.mubr.bf16.mxu1 %v6681_v37 }
 0x258   : > { %5469 = vmatpush1.bf16.msra.mxu0 %v8861_v51  ;;  %v426_v51 = vld [vmem:[%s11142_s1 + $0x198] sm:$0xff] }
 0x259   : > { %5470 = vmatprep.subr.bf16.mxu0 %v11204_v54  ;;  %v6689_v40 = vcombine.high %v426_v51, %v430_v29 }
 0x25b   : > { %4962 = vmatmul.mubr.bf16.gmra.mrb[4].mxu0 %v6646_v16  ;;  %v9290_v16 = vpop.f32.mrb[152].mxu1 }
 0x25c   : > { %4969 = vmatprep.mubr.bf16.mxu0 %v6655_v2  ;;  %5471 = vmatpush1.bf16.msra.mxu0 %v8873_v8  ;;  %11205 = vst [vmem:[#allocation44_spill] sm:$0xff] %v9290_v16  ;;  %v6663_v2 = vcombine.high %v401_v18, %v405_v53  ;;  %v4171_v49 = vpop.f32.mrb[153].mxu1  ;;  %v417_v18 = vld [vmem:[%s11142_s1 + $0x150] sm:$0xff] }
 0x25d   : > { %5472 = vmatprep.subr.bf16.mxu0 %v11204_v54  ;;  %v9292_v37 = vpop.f32.mrb[154].mxu1  ;;  %v421_v53 = vld [vmem:[%s11142_s1 + $0x170] sm:$0xff] }
 0x25e   : > { %11206 = vst [vmem:[#allocation45_spill] sm:$0xff] %v9292_v37  ;;  %v4174_v8 = vpop.f32.mrb[155].mxu1  ;;  %5539 = vmatmul.mubr.bf16.gmra.mrb[4].mxu1 %v6680_v32  ;;  %v6688_v32 = vcombine.low %v426_v51, %v430_v29  ;;  %v446_v51 = vld [vmem:[%s11142_s1 + $0x238] sm:$0xff]  ;;  %v6670_v29 = vcombine.low %v409_v59, %v413_v36 }
 0x25f   : > { %5546 = vmatprep.mubr.bf16.mxu1 %v6689_v40 }
 0x260   : > { %5473 = vmatpush1.bf16.msra.mxu0 %v8891_v22  ;;  %v434_v22 = vld [vmem:[%s11142_s1 + $0x1d8] sm:$0xff] }
 0x261   : > { %5474 = vmatprep.subr.bf16.mxu0 %v11204_v54  ;;  %v6697_v8 = vcombine.high %v434_v22, %v438_v34 }
 0x263   : > { %4970 = vmatmul.mubr.bf16.gmra.mrb[8].mxu0 %v6654_v17  ;;  %v9310_v17 = vpop.f32.mrb[156].mxu1 }
 0x264   : > { %4977 = vmatprep.mubr.bf16.mxu0 %v6663_v2  ;;  %5475 = vmatpush1.bf16.msra.mxu0 %v8903_v42  ;;  %11207 = vst [vmem:[#allocation46_spill] sm:$0xff] %v9310_v17  ;;  %v6671_v2 = vcombine.high %v409_v59, %v413_v36  ;;  %v4179_v49 = vpop.f32.mrb[157].mxu1  ;;  %v425_v59 = vld [vmem:[%s11142_s1 + $0x190] sm:$0xff] }
 0x265   : > { %5476 = vmatprep.subr.bf16.mxu0 %v11204_v54  ;;  %v9312_v40 = vpop.f32.mrb[158].mxu1  ;;  %v429_v36 = vld [vmem:[%s11142_s1 + $0x1b0] sm:$0xff] }
 0x266   : > { %11208 = vst [vmem:[#allocation47_spill] sm:$0xff] %v9312_v40  ;;  %v4182_v42 = vpop.f32.mrb[159].mxu1  ;;  %5547 = vmatmul.mubr.bf16.gmra.mrb[8].mxu1 %v6688_v32  ;;  %v6696_v32 = vcombine.low %v434_v22, %v438_v34  ;;  %v454_v22 = vld [vmem:[%s11142_s1 + $0x278] sm:$0xff]  ;;  %v6678_v34 = vcombine.low %v417_v18, %v421_v53 }
 0x267   : > { %5554 = vmatprep.mubr.bf16.mxu1 %v6697_v8 }
 0x268   : > { %5477 = vmatpush1.bf16.msra.mxu0 %v8921_v0  ;;  %v442_v0 = vld [vmem:[%s11142_s1 + $0x218] sm:$0xff] }
 0x269   : > { %5478 = vmatprep.subr.bf16.mxu0 %v11204_v54  ;;  %v6705_v42 = vcombine.high %v442_v0, %v446_v51 }
 0x26b   : > { %4978 = vmatmul.mubr.bf16.gmra.mrb[12].mxu0 %v6662_v48  ;;  %v9330_v48 = vpop.f32.mrb[160].mxu1 }
 0x26c   : > { %4985 = vmatprep.mubr.bf16.mxu0 %v6671_v2  ;;  %5479 = vmatpush1.bf16.msra.mxu0 %v8933_v11  ;;  %11209 = vst [vmem:[#allocation48_spill] sm:$0xff] %v9330_v48  ;;  %v6679_v2 = vcombine.high %v417_v18, %v421_v53  ;;  %v4187_v49 = vpop.f32.mrb[161].mxu1  ;;  %v433_v18 = vld [vmem:[%s11142_s1 + $0x1d0] sm:$0xff] }
 0x26d   : > { %5480 = vmatprep.subr.bf16.mxu0 %v11204_v54  ;;  %v9332_v8 = vpop.f32.mrb[162].mxu1  ;;  %v437_v53 = vld [vmem:[%s11142_s1 + $0x1f0] sm:$0xff] }
 0x26e   : > { %11210 = vst [vmem:[#allocation49_spill] sm:$0xff] %v9332_v8  ;;  %v4190_v11 = vpop.f32.mrb[163].mxu1  ;;  %5555 = vmatmul.mubr.bf16.gmra.mrb[12].mxu1 %v6696_v32  ;;  %v6704_v32 = vcombine.low %v442_v0, %v446_v51  ;;  %v462_v0 = vld [vmem:[%s11142_s1 + $0x2b8] sm:$0xff]  ;;  %v6686_v51 = vcombine.low %v425_v59, %v429_v36 }
 0x26f   : > { %5562 = vmatprep.mubr.bf16.mxu1 %v6705_v42 }
 0x270   : > { %5481 = vmatpush1.bf16.msra.mxu0 %v8951_v5  ;;  %v450_v5 = vld [vmem:[%s11142_s1 + $0x258] sm:$0xff] }
 0x271   : > { %5482 = vmatprep.subr.bf16.mxu0 %v11204_v54  ;;  %v6713_v11 = vcombine.high %v450_v5, %v454_v22 }
 0x273   : > { %4986 = vmatmul.mubr.bf16.gmra.mrb[16].mxu0 %v6670_v29  ;;  %v9350_v29 = vpop.f32.mrb[164].mxu1 }
 0x274   : > { %4993 = vmatprep.mubr.bf16.mxu0 %v6679_v2  ;;  %5483 = vmatpush1.bf16.msra.mxu0 %v8962_v43  ;;  %11211 = vst [vmem:[#allocation50_spill] sm:$0xff] %v9350_v29  ;;  %v6687_v2 = vcombine.high %v425_v59, %v429_v36  ;;  %v4195_v49 = vpop.f32.mrb[165].mxu1  ;;  %v441_v59 = vld [vmem:[%s11142_s1 + $0x210] sm:$0xff] }
 0x275   : > { %5484 = vmatprep.subr.bf16.mxu0 %v11204_v54  ;;  %v9352_v42 = vpop.f32.mrb[166].mxu1  ;;  %v445_v36 = vld [vmem:[%s11142_s1 + $0x230] sm:$0xff] }
 0x276   : > { %11212 = vst [vmem:[#allocation51_spill] sm:$0xff] %v9352_v42  ;;  %v4198_v43 = vpop.f32.mrb[167].mxu1  ;;  %5563 = vmatmul.mubr.bf16.gmra.mrb[16].mxu1 %v6704_v32  ;;  %v6712_v32 = vcombine.low %v450_v5, %v454_v22  ;;  %v470_v5 = vld [vmem:[%s11142_s1 + $0x2f8] sm:$0xff]  ;;  %v6694_v22 = vcombine.low %v433_v18, %v437_v53 }
 0x277   : > { %5570 = vmatprep.mubr.bf16.mxu1 %v6713_v11 }
 0x278   : > { %5485 = vmatpush1.bf16.msra.mxu0 %v8978_v19  ;;  %v458_v19 = vld [vmem:[%s11142_s1 + $0x298] sm:$0xff] }
 0x279   : > { %5486 = vmatprep.subr.bf16.mxu0 %v11204_v54  ;;  %v6721_v43 = vcombine.high %v458_v19, %v462_v0 }
 0x27b   : > { %4994 = vmatmul.mubr.bf16.gmra.mrb[20].mxu0 %v6678_v34  ;;  %v9370_v34 = vpop.f32.mrb[168].mxu1 }
 0x27c   : > { %5001 = vmatprep.mubr.bf16.mxu0 %v6687_v2  ;;  %5487 = vmatpush1.bf16.msra.mxu0 %v8988_v24  ;;  %11213 = vst [vmem:[#allocation52_spill] sm:$0xff] %v9370_v34  ;;  %v6695_v2 = vcombine.high %v433_v18, %v437_v53  ;;  %v4203_v49 = vpop.f32.mrb[169].mxu1  ;;  %v449_v18 = vld [vmem:[%s11142_s1 + $0x250] sm:$0xff] }
 0x27d   : > { %5488 = vmatprep.subr.bf16.mxu0 %v11204_v54  ;;  %v9372_v11 = vpop.f32.mrb[170].mxu1  ;;  %v453_v53 = vld [vmem:[%s11142_s1 + $0x270] sm:$0xff] }
 0x27e   : > { %11214 = vst [vmem:[#allocation53_spill] sm:$0xff] %v9372_v11  ;;  %v4206_v24 = vpop.f32.mrb[171].mxu1  ;;  %5571 = vmatmul.mubr.bf16.gmra.mrb[20].mxu1 %v6712_v32  ;;  %v6720_v32 = vcombine.low %v458_v19, %v462_v0  ;;  %v478_v19 = vld [vmem:[%s11142_s1 + $0x338] sm:$0xff]  ;;  %v6702_v0 = vcombine.low %v441_v59, %v445_v36 }
 0x27f   : > { %5578 = vmatprep.mubr.bf16.mxu1 %v6721_v43 }
 0x280   : > { %5489 = vmatpush1.bf16.msra.mxu0 %v9004_v50  ;;  %v466_v50 = vld [vmem:[%s11142_s1 + $0x2d8] sm:$0xff] }
 0x281   : > { %5490 = vmatprep.subr.bf16.mxu0 %v11204_v54  ;;  %v6729_v24 = vcombine.high %v466_v50, %v470_v5 }
 0x283   : > { %5002 = vmatmul.mubr.bf16.gmra.mrb[24].mxu0 %v6686_v51  ;;  %v9390_v51 = vpop.f32.mrb[172].mxu1 }
 0x284   : > { %5009 = vmatprep.mubr.bf16.mxu0 %v6695_v2  ;;  %5491 = vmatpush1.bf16.msra.mxu0 %v9014_v31  ;;  %11215 = vst [vmem:[#allocation54_spill] sm:$0xff] %v9390_v51  ;;  %v6703_v2 = vcombine.high %v441_v59, %v445_v36  ;;  %v4211_v49 = vpop.f32.mrb[173].mxu1  ;;  %v482_v59 = vld [vmem:[%s11142_s1 + $0x358] sm:$0xff]  ;;  %v6710_v36 = vcombine.low %v449_v18, %v453_v53 }
 0x285   : > { %5492 = vmatprep.subr.bf16.mxu0 %v11204_v54  ;;  %v9392_v43 = vpop.f32.mrb[174].mxu1 }
 0x286   : > { %11216 = vst [vmem:[#allocation55_spill] sm:$0xff] %v9392_v43  ;;  %v4214_v31 = vpop.f32.mrb[175].mxu1  ;;  %5579 = vmatmul.mubr.bf16.gmra.mrb[24].mxu1 %v6720_v32  ;;  %v6728_v32 = vcombine.low %v466_v50, %v470_v5  ;;  %v457_v43 = vld [vmem:[%s11142_s1 + $0x290] sm:$0xff] }
 0x287   : > { %5586 = vmatprep.mubr.bf16.mxu1 %v6729_v24 }
 0x288   : > { %5493 = vmatpush1.bf16.msra.mxu0 %v9030_v62  ;;  %v474_v62 = vld [vmem:[%s11142_s1 + $0x318] sm:$0xff] }
 0x289   : > { %5494 = vmatprep.subr.bf16.mxu0 %v11204_v54  ;;  %v6737_v31 = vcombine.high %v474_v62, %v478_v19 }
 0x28b   : > { %5010 = vmatmul.mubr.bf16.gmra.mrb[28].mxu0 %v6694_v22  ;;  %v9410_v22 = vpop.f32.mrb[176].mxu1 }
 0x28c   : > { %5017 = vmatprep.mubr.bf16.mxu0 %v6703_v2  ;;  %5495 = vmatpush1.bf16.msra.mxu0 %v9040_v26  ;;  %11217 = vst [vmem:[#allocation56_spill] sm:$0xff] %v9410_v22  ;;  %v6711_v2 = vcombine.high %v449_v18, %v453_v53  ;;  %v4219_v49 = vpop.f32.mrb[177].mxu1  ;;  %v469_v18 = vld [vmem:[%s11142_s1 + $0x2f0] sm:$0xff]  ;;  %v490_v53 = vld [vmem:[%s11142_s1 + $0x398] sm:$0xff] }
 0x28d   : > { %5496 = vmatprep.subr.bf16.mxu0 %v11204_v54  ;;  %v9412_v24 = vpop.f32.mrb[178].mxu1  ;;  %v461_v54 = vld [vmem:[%s11142_s1 + $0x2b0] sm:$0xff] }
 0x28e   : > { %11218 = vst [vmem:[#allocation57_spill] sm:$0xff] %v9412_v24  ;;  %v4222_v26 = vpop.f32.mrb[179].mxu1  ;;  %5587 = vmatmul.mubr.bf16.gmra.mrb[28].mxu1 %v6728_v32  ;;  %v6719_v5 = vcombine.high %v457_v43, %v461_v54  ;;  %v621_v24 = vld [vmem:[%s11142_s1 + $0x7b0] sm:$0xff] }
 0x28f   : > { %5594 = vmatprep.mubr.bf16.mxu1 %v6737_v31  ;;  %v9427_v50 = vpop.f32.mrb[180].mxu1  ;;  %v465_v31 = vld [vmem:[%s11142_s1 + $0x2d0] sm:$0xff] }
 0x290   : > { %5497 = vmatpush1.bf16.msra.mxu0 %v9056_v57  ;;  %v486_v57 = vld [vmem:[%s11142_s1 + $0x378] sm:$0xff]  ;;  %11219 = vst [vmem:[#allocation58_spill] sm:$0xff] %v9427_v50 }
 0x291   : > { %v6745_v32 = vcombine.high %v482_v59, %v486_v57 }
 0x293   : > { %5018 = vmatmul.mubr.bf16.gmra.mrb[32].mxu0 %v6702_v0  ;;  %v6736_v0 = vcombine.low %v474_v62, %v478_v19  ;;  %v494_v62 = vld [vmem:[%s11142_s1 + $0x3b8] sm:$0xff]  ;;  %v6718_v19 = vcombine.low %v457_v43, %v461_v54  ;;  %v477_v43 = vld [vmem:[%s11142_s1 + $0x330] sm:$0xff] }
 0x294   : > { %5025 = vmatprep.mubr.bf16.mxu0 %v6711_v2  ;;  %v4227_v2 = vpop.f32.mrb[181].mxu1  ;;  %v498_v54 = vld [vmem:[%s11142_s1 + $0x3d8] sm:$0xff] }
 0x295   : > { %v9429_v49 = vpop.f32.mrb[182].mxu1 }
 0x296   : > { %11220 = vst [vmem:[#allocation59_spill] sm:$0xff] %v9429_v49  ;;  %v4230_v26 = vpop.f32.mrb[183].mxu1  ;;  %5595 = vmatmul.mubr.bf16.gmra.mrb[32].mxu1 %v6736_v0  ;;  %v6744_v0 = vcombine.low %v482_v59, %v486_v57  ;;  %v502_v59 = vld [vmem:[%s11142_s1 + $0x3f8] sm:$0xff]  ;;  %v6726_v57 = vcombine.low %v465_v31, %v469_v18 }
 0x297   : > { %5602 = vmatprep.mubr.bf16.mxu1 %v6745_v32  ;;  %v6753_v26 = vcombine.high %v490_v53, %v494_v62  ;;  %v473_v32 = vld [vmem:[%s11142_s1 + $0x310] sm:$0xff] }
 0x29b   : > { %5026 = vmatmul.mubr.bf16.gmra.mrb[36].mxu0 %v6710_v36  ;;  %v9443_v36 = vpop.f32.mrb[184].mxu1 }
 0x29c   : > { %5033 = vmatprep.mubr.bf16.mxu0 %v6719_v5  ;;  %11221 = vst [vmem:[#allocation60_spill] sm:$0xff] %v9443_v36  ;;  %v6727_v5 = vcombine.high %v465_v31, %v469_v18  ;;  %v4235_v2 = vpop.f32.mrb[185].mxu1  ;;  %v485_v31 = vld [vmem:[%s11142_s1 + $0x370] sm:$0xff]  ;;  %v506_v18 = vld [vmem:[%s11142_s1 + $0x418] sm:$0xff] }
 0x29d   : > { %v9445_v49 = vpop.f32.mrb[186].mxu1  ;;  %v6761_v2 = vcombine.high %v498_v54, %v502_v59 }
 0x29e   : > { %11222 = vst [vmem:[#allocation61_spill] sm:$0xff] %v9445_v49  ;;  %v4238_v50 = vpop.f32.mrb[187].mxu1  ;;  %5603 = vmatmul.mubr.bf16.gmra.mrb[36].mxu1 %v6744_v0 }
 0x29f   : > { %5610 = vmatprep.mubr.bf16.mxu1 %v6753_v26  ;;  %v481_v26 = vld [vmem:[%s11142_s1 + $0x350] sm:$0xff] }
 0x2a0   : > { %v9459_v50 = vpop.f32.mrb[188].mxu1 }
 0x2a1   : > { %11223 = vst [vmem:[#allocation62_spill] sm:$0xff] %v9459_v50  ;;  %v4243_v0 = vpop.f32.mrb[189].mxu1 }
 0x2a2   : > { %v9461_v49 = vpop.f32.mrb[190].mxu1 }
 0x2a3   : > { %5034 = vmatmul.mubr.bf16.gmra.mrb[40].mxu0 %v6718_v19  ;;  %v6735_v19 = vcombine.high %v473_v32, %v477_v43  ;;  %11224 = vst [vmem:[#allocation63_spill] sm:$0xff] %v9461_v49  ;;  %v4246_v36 = vpop.f32.mrb[191].mxu1 }
 0x2a4   : > { %5041 = vmatprep.mubr.bf16.mxu0 %v6727_v5  ;;  %v6752_v5 = vcombine.low %v490_v53, %v494_v62  ;;  %v510_v53 = vld [vmem:[%s11142_s1 + $0x438] sm:$0xff]  ;;  %v6734_v62 = vcombine.low %v473_v32, %v477_v43  ;;  %v493_v32 = vld [vmem:[%s11142_s1 + $0x3b0] sm:$0xff] }
 0x2a5   : > { %v6769_v0 = vcombine.high %v506_v18, %v510_v53  ;;  %v514_v43 = vld [vmem:[%s11142_s1 + $0x458] sm:$0xff] }
 0x2a6   : > { %5611 = vmatmul.mubr.bf16.gmra.mrb[40].mxu1 %v6752_v5 }
 0x2a7   : > { %5618 = vmatprep.mubr.bf16.mxu1 %v6761_v2  ;;  %v489_v2 = vld [vmem:[%s11142_s1 + $0x390] sm:$0xff] }
 0x2a8   : > { %v9475_v36 = vpop.f32.mrb[192].mxu1 }
 0x2a9   : > { %11225 = vst [vmem:[#allocation64_spill] sm:$0xff] %v9475_v36  ;;  %v4251_v5 = vpop.f32.mrb[193].mxu1 }
 0x2aa   : > { %v9477_v49 = vpop.f32.mrb[194].mxu1 }
 0x2ab   : > { %5042 = vmatmul.mubr.bf16.gmra.mrb[44].mxu0 %v6726_v57  ;;  %v6743_v57 = vcombine.high %v481_v26, %v485_v31  ;;  %11226 = vst [vmem:[#allocation65_spill] sm:$0xff] %v9477_v49  ;;  %v4254_v50 = vpop.f32.mrb[195].mxu1 }
 0x2ac   : > { %5049 = vmatprep.mubr.bf16.mxu0 %v6735_v19  ;;  %v6760_v19 = vcombine.low %v498_v54, %v502_v59  ;;  %v518_v54 = vld [vmem:[%s11142_s1 + $0x478] sm:$0xff]  ;;  %v6742_v59 = vcombine.low %v481_v26, %v485_v31  ;;  %v501_v26 = vld [vmem:[%s11142_s1 + $0x3f0] sm:$0xff] }
 0x2ad   : > { %v6777_v5 = vcombine.high %v514_v43, %v518_v54  ;;  %v522_v31 = vld [vmem:[%s11142_s1 + $0x498] sm:$0xff] }
 0x2ae   : > { %5619 = vmatmul.mubr.bf16.gmra.mrb[44].mxu1 %v6760_v19 }
 0x2af   : > { %5626 = vmatprep.mubr.bf16.mxu1 %v6769_v0  ;;  %v497_v0 = vld [vmem:[%s11142_s1 + $0x3d0] sm:$0xff] }
 0x2b0   : > { %v9491_v50 = vpop.f32.mrb[196].mxu1 }
 0x2b1   : > { %11227 = vst [vmem:[#allocation66_spill] sm:$0xff] %v9491_v50  ;;  %v4259_v19 = vpop.f32.mrb[197].mxu1 }
 0x2b2   : > { %v9493_v49 = vpop.f32.mrb[198].mxu1 }
 0x2b3   : > { %5050 = vmatmul.mubr.bf16.gmra.mrb[48].mxu0 %v6734_v62  ;;  %v6751_v62 = vcombine.high %v489_v2, %v493_v32  ;;  %11228 = vst [vmem:[#allocation67_spill] sm:$0xff] %v9493_v49  ;;  %v4262_v36 = vpop.f32.mrb[199].mxu1 }
 0x2b4   : > { %5057 = vmatprep.mubr.bf16.mxu0 %v6743_v57  ;;  %v6768_v57 = vcombine.low %v506_v18, %v510_v53  ;;  %v526_v18 = vld [vmem:[%s11142_s1 + $0x4b8] sm:$0xff]  ;;  %v6750_v53 = vcombine.low %v489_v2, %v493_v32  ;;  %v509_v2 = vld [vmem:[%s11142_s1 + $0x430] sm:$0xff] }
 0x2b5   : > { %v6785_v19 = vcombine.high %v522_v31, %v526_v18  ;;  %v530_v32 = vld [vmem:[%s11142_s1 + $0x4d8] sm:$0xff] }
 0x2b6   : > { %5627 = vmatmul.mubr.bf16.gmra.mrb[48].mxu1 %v6768_v57 }
 0x2b7   : > { %5634 = vmatprep.mubr.bf16.mxu1 %v6777_v5  ;;  %v505_v5 = vld [vmem:[%s11142_s1 + $0x410] sm:$0xff] }
 0x2b8   : > { %v9507_v36 = vpop.f32.mrb[200].mxu1 }
 0x2b9   : > { %11229 = vst [vmem:[#allocation68_spill] sm:$0xff] %v9507_v36  ;;  %v4267_v57 = vpop.f32.mrb[201].mxu1 }
 0x2ba   : > { %v9509_v49 = vpop.f32.mrb[202].mxu1 }
 0x2bb   : > { %5058 = vmatmul.mubr.bf16.gmra.mrb[52].mxu0 %v6742_v59  ;;  %v6759_v59 = vcombine.high %v497_v0, %v501_v26  ;;  %11230 = vst [vmem:[#allocation69_spill] sm:$0xff] %v9509_v49  ;;  %v4270_v50 = vpop.f32.mrb[203].mxu1 }
 0x2bc   : > { %5065 = vmatprep.mubr.bf16.mxu0 %v6751_v62  ;;  %v6776_v62 = vcombine.low %v514_v43, %v518_v54  ;;  %v534_v43 = vld [vmem:[%s11142_s1 + $0x4f8] sm:$0xff]  ;;  %v6758_v54 = vcombine.low %v497_v0, %v501_v26  ;;  %v517_v0 = vld [vmem:[%s11142_s1 + $0x470] sm:$0xff] }
 0x2bd   : > { %v6793_v57 = vcombine.high %v530_v32, %v534_v43  ;;  %v538_v26 = vld [vmem:[%s11142_s1 + $0x518] sm:$0xff] }
 0x2be   : > { %5635 = vmatmul.mubr.bf16.gmra.mrb[52].mxu1 %v6776_v62 }
 0x2bf   : > { %5642 = vmatprep.mubr.bf16.mxu1 %v6785_v19  ;;  %v513_v19 = vld [vmem:[%s11142_s1 + $0x450] sm:$0xff] }
 0x2c0   : > { %v9523_v50 = vpop.f32.mrb[204].mxu1 }
 0x2c1   : > { %11231 = vst [vmem:[#allocation70_spill] sm:$0xff] %v9523_v50  ;;  %v4275_v62 = vpop.f32.mrb[205].mxu1 }
 0x2c2   : > { %v9525_v49 = vpop.f32.mrb[206].mxu1 }
 0x2c3   : > { %5066 = vmatmul.mubr.bf16.gmra.mrb[56].mxu0 %v6750_v53  ;;  %v6767_v53 = vcombine.high %v505_v5, %v509_v2  ;;  %11232 = vst [vmem:[#allocation71_spill] sm:$0xff] %v9525_v49  ;;  %v4278_v36 = vpop.f32.mrb[207].mxu1 }
 0x2c4   : > { %5073 = vmatprep.mubr.bf16.mxu0 %v6759_v59  ;;  %v6784_v59 = vcombine.low %v522_v31, %v526_v18  ;;  %v542_v31 = vld [vmem:[%s11142_s1 + $0x538] sm:$0xff]  ;;  %v6766_v18 = vcombine.low %v505_v5, %v509_v2  ;;  %v525_v5 = vld [vmem:[%s11142_s1 + $0x4b0] sm:$0xff] }
 0x2c5   : > { %v6801_v62 = vcombine.high %v538_v26, %v542_v31  ;;  %v546_v2 = vld [vmem:[%s11142_s1 + $0x558] sm:$0xff] }
 0x2c6   : > { %5643 = vmatmul.mubr.bf16.gmra.mrb[56].mxu1 %v6784_v59 }
 0x2c7   : > { %5650 = vmatprep.mubr.bf16.mxu1 %v6793_v57  ;;  %v521_v57 = vld [vmem:[%s11142_s1 + $0x490] sm:$0xff] }
 0x2c8   : > { %v9539_v36 = vpop.f32.mrb[208].mxu1 }
 0x2c9   : > { %11233 = vst [vmem:[#allocation72_spill] sm:$0xff] %v9539_v36  ;;  %v4283_v59 = vpop.f32.mrb[209].mxu1 }
 0x2ca   : > { %v9541_v49 = vpop.f32.mrb[210].mxu1 }
 0x2cb   : > { %5074 = vmatmul.mubr.bf16.gmra.mrb[60].mxu0 %v6758_v54  ;;  %v6775_v54 = vcombine.high %v513_v19, %v517_v0  ;;  %11234 = vst [vmem:[#allocation73_spill] sm:$0xff] %v9541_v49  ;;  %v4286_v50 = vpop.f32.mrb[211].mxu1 }
 0x2cc   : > { %5081 = vmatprep.mubr.bf16.mxu0 %v6767_v53  ;;  %v6792_v53 = vcombine.low %v530_v32, %v534_v43  ;;  %v550_v32 = vld [vmem:[%s11142_s1 + $0x578] sm:$0xff]  ;;  %v6774_v43 = vcombine.low %v513_v19, %v517_v0  ;;  %v533_v19 = vld [vmem:[%s11142_s1 + $0x4f0] sm:$0xff] }
 0x2cd   : > { %v6809_v59 = vcombine.high %v546_v2, %v550_v32  ;;  %v554_v0 = vld [vmem:[%s11142_s1 + $0x598] sm:$0xff] }
 0x2ce   : > { %5651 = vmatmul.mubr.bf16.gmra.mrb[60].mxu1 %v6792_v53 }
 0x2cf   : > { %5658 = vmatprep.mubr.bf16.mxu1 %v6801_v62  ;;  %v529_v62 = vld [vmem:[%s11142_s1 + $0x4d0] sm:$0xff] }
 0x2d1   : > { %v9555_v50 = vpop.f32.mrb[212].mxu1 }
 0x2d2   : > { %11235 = vst [vmem:[#allocation74_spill] sm:$0xff] %v9555_v50  ;;  %v4291_v53 = vpop.f32.mrb[213].mxu1 }
 0x2d3   : > { %5082 = vmatmul.mubr.bf16.gmra.mrb[64].mxu0 %v6766_v18  ;;  %v6783_v18 = vcombine.high %v521_v57, %v525_v5  ;;  %v9557_v49 = vpop.f32.mrb[214].mxu1 }
 0x2d4   : > { %5089 = vmatprep.mubr.bf16.mxu0 %v6775_v54  ;;  %v6800_v54 = vcombine.low %v538_v26, %v542_v31  ;;  %11236 = vst [vmem:[#allocation75_spill] sm:$0xff] %v9557_v49  ;;  %v4294_v36 = vpop.f32.mrb[215].mxu1  ;;  %v558_v26 = vld [vmem:[%s11142_s1 + $0x5b8] sm:$0xff]  ;;  %v6782_v31 = vcombine.low %v521_v57, %v525_v5  ;;  %v541_v57 = vld [vmem:[%s11142_s1 + $0x530] sm:$0xff] }
 0x2d5   : > { %v6817_v53 = vcombine.high %v554_v0, %v558_v26  ;;  %v562_v5 = vld [vmem:[%s11142_s1 + $0x5d8] sm:$0xff] }
 0x2d6   : > { %5659 = vmatmul.mubr.bf16.gmra.mrb[64].mxu1 %v6800_v54 }
 0x2d7   : > { %5666 = vmatprep.mubr.bf16.mxu1 %v6809_v59  ;;  %v537_v59 = vld [vmem:[%s11142_s1 + $0x510] sm:$0xff] }
 0x2d9   : > { %v9571_v36 = vpop.f32.mrb[216].mxu1 }
 0x2da   : > { %11237 = vst [vmem:[#allocation76_spill] sm:$0xff] %v9571_v36  ;;  %v4299_v54 = vpop.f32.mrb[217].mxu1 }
 0x2db   : > { %5090 = vmatmul.mubr.bf16.gmra.mrb[68].mxu0 %v6774_v43  ;;  %v6791_v43 = vcombine.high %v529_v62, %v533_v19  ;;  %v9573_v49 = vpop.f32.mrb[218].mxu1 }
 0x2dc   : > { %5097 = vmatprep.mubr.bf16.mxu0 %v6783_v18  ;;  %v6808_v18 = vcombine.low %v546_v2, %v550_v32  ;;  %11238 = vst [vmem:[#allocation77_spill] sm:$0xff] %v9573_v49  ;;  %v4302_v50 = vpop.f32.mrb[219].mxu1  ;;  %v566_v2 = vld [vmem:[%s11142_s1 + $0x5f8] sm:$0xff]  ;;  %v6790_v32 = vcombine.low %v529_v62, %v533_v19  ;;  %v549_v62 = vld [vmem:[%s11142_s1 + $0x570] sm:$0xff] }
 0x2dd   : > { %v6825_v54 = vcombine.high %v562_v5, %v566_v2  ;;  %v570_v19 = vld [vmem:[%s11142_s1 + $0x618] sm:$0xff] }
 0x2de   : > { %5667 = vmatmul.mubr.bf16.gmra.mrb[68].mxu1 %v6808_v18 }
 0x2df   : > { %5674 = vmatprep.mubr.bf16.mxu1 %v6817_v53  ;;  %v545_v53 = vld [vmem:[%s11142_s1 + $0x550] sm:$0xff] }
 0x2e1   : > { %v9587_v50 = vpop.f32.mrb[220].mxu1 }
 0x2e2   : > { %11239 = vst [vmem:[#allocation78_spill] sm:$0xff] %v9587_v50  ;;  %v4307_v18 = vpop.f32.mrb[221].mxu1 }
 0x2e3   : > { %5098 = vmatmul.mubr.bf16.gmra.mrb[72].mxu0 %v6782_v31  ;;  %v6799_v31 = vcombine.high %v537_v59, %v541_v57  ;;  %v9589_v49 = vpop.f32.mrb[222].mxu1 }
 0x2e4   : > { %5105 = vmatprep.mubr.bf16.mxu0 %v6791_v43  ;;  %v6816_v43 = vcombine.low %v554_v0, %v558_v26  ;;  %11240 = vst [vmem:[#allocation79_spill] sm:$0xff] %v9589_v49  ;;  %v4310_v36 = vpop.f32.mrb[223].mxu1  ;;  %v574_v0 = vld [vmem:[%s11142_s1 + $0x638] sm:$0xff]  ;;  %v6798_v26 = vcombine.low %v537_v59, %v541_v57  ;;  %v557_v59 = vld [vmem:[%s11142_s1 + $0x5b0] sm:$0xff] }
 0x2e5   : > { %v6833_v18 = vcombine.high %v570_v19, %v574_v0  ;;  %v578_v57 = vld [vmem:[%s11142_s1 + $0x658] sm:$0xff] }
 0x2e6   : > { %5675 = vmatmul.mubr.bf16.gmra.mrb[72].mxu1 %v6816_v43 }
 0x2e7   : > { %5682 = vmatprep.mubr.bf16.mxu1 %v6825_v54  ;;  %v553_v54 = vld [vmem:[%s11142_s1 + $0x590] sm:$0xff] }
 0x2e9   : > { %v9603_v36 = vpop.f32.mrb[224].mxu1 }
 0x2ea   : > { %11241 = vst [vmem:[#allocation80_spill] sm:$0xff] %v9603_v36  ;;  %v4315_v43 = vpop.f32.mrb[225].mxu1 }
 0x2eb   : > { %5106 = vmatmul.mubr.bf16.gmra.mrb[76].mxu0 %v6790_v32  ;;  %v6807_v32 = vcombine.high %v545_v53, %v549_v62  ;;  %v9605_v49 = vpop.f32.mrb[226].mxu1 }
 0x2ec   : > { %5113 = vmatprep.mubr.bf16.mxu0 %v6799_v31  ;;  %v6824_v31 = vcombine.low %v562_v5, %v566_v2  ;;  %11242 = vst [vmem:[#allocation81_spill] sm:$0xff] %v9605_v49  ;;  %v4318_v50 = vpop.f32.mrb[227].mxu1  ;;  %v582_v5 = vld [vmem:[%s11142_s1 + $0x678] sm:$0xff]  ;;  %v6806_v2 = vcombine.low %v545_v53, %v549_v62  ;;  %v565_v53 = vld [vmem:[%s11142_s1 + $0x5f0] sm:$0xff] }
 0x2ed   : > { %v6841_v43 = vcombine.high %v578_v57, %v582_v5  ;;  %v586_v62 = vld [vmem:[%s11142_s1 + $0x698] sm:$0xff] }
 0x2ee   : > { %5683 = vmatmul.mubr.bf16.gmra.mrb[76].mxu1 %v6824_v31 }
 0x2ef   : > { %5690 = vmatprep.mubr.bf16.mxu1 %v6833_v18  ;;  %v561_v18 = vld [vmem:[%s11142_s1 + $0x5d0] sm:$0xff] }
 0x2f1   : > { %v9619_v50 = vpop.f32.mrb[228].mxu1 }
 0x2f2   : > { %11243 = vst [vmem:[#allocation82_spill] sm:$0xff] %v9619_v50  ;;  %v4323_v31 = vpop.f32.mrb[229].mxu1 }
 0x2f3   : > { %5114 = vmatmul.mubr.bf16.gmra.mrb[80].mxu0 %v6798_v26  ;;  %v6815_v26 = vcombine.high %v553_v54, %v557_v59  ;;  %v9621_v49 = vpop.f32.mrb[230].mxu1 }
 0x2f4   : > { %5121 = vmatprep.mubr.bf16.mxu0 %v6807_v32  ;;  %v6832_v32 = vcombine.low %v570_v19, %v574_v0  ;;  %11244 = vst [vmem:[#allocation83_spill] sm:$0xff] %v9621_v49  ;;  %v4326_v36 = vpop.f32.mrb[231].mxu1  ;;  %v590_v19 = vld [vmem:[%s11142_s1 + $0x6b8] sm:$0xff]  ;;  %v6814_v0 = vcombine.low %v553_v54, %v557_v59  ;;  %v573_v54 = vld [vmem:[%s11142_s1 + $0x630] sm:$0xff] }
 0x2f5   : > { %v6849_v31 = vcombine.high %v586_v62, %v590_v19  ;;  %v594_v59 = vld [vmem:[%s11142_s1 + $0x6d8] sm:$0xff] }
 0x2f6   : > { %5691 = vmatmul.mubr.bf16.gmra.mrb[80].mxu1 %v6832_v32 }
 0x2f7   : > { %5698 = vmatprep.mubr.bf16.mxu1 %v6841_v43  ;;  %v569_v43 = vld [vmem:[%s11142_s1 + $0x610] sm:$0xff] }
 0x2f9   : > { %v9635_v36 = vpop.f32.mrb[232].mxu1 }
 0x2fa   : > { %11245 = vst [vmem:[#allocation84_spill] sm:$0xff] %v9635_v36  ;;  %v4331_v32 = vpop.f32.mrb[233].mxu1 }
 0x2fb   : > { %5122 = vmatmul.mubr.bf16.gmra.mrb[84].mxu0 %v6806_v2  ;;  %v6823_v2 = vcombine.high %v561_v18, %v565_v53  ;;  %v9637_v49 = vpop.f32.mrb[234].mxu1 }
 0x2fc   : > { %5129 = vmatprep.mubr.bf16.mxu0 %v6815_v26  ;;  %v6840_v26 = vcombine.low %v578_v57, %v582_v5  ;;  %11246 = vst [vmem:[#allocation85_spill] sm:$0xff] %v9637_v49  ;;  %v4334_v50 = vpop.f32.mrb[235].mxu1  ;;  %v598_v57 = vld [vmem:[%s11142_s1 + $0x6f8] sm:$0xff]  ;;  %v6822_v5 = vcombine.low %v561_v18, %v565_v53  ;;  %v581_v18 = vld [vmem:[%s11142_s1 + $0x670] sm:$0xff] }
 0x2fd   : > { %v6857_v32 = vcombine.high %v594_v59, %v598_v57  ;;  %v602_v53 = vld [vmem:[%s11142_s1 + $0x718] sm:$0xff] }
 0x2fe   : > { %5699 = vmatmul.mubr.bf16.gmra.mrb[84].mxu1 %v6840_v26 }
 0x2ff   : > { %5706 = vmatprep.mubr.bf16.mxu1 %v6849_v31  ;;  %v577_v31 = vld [vmem:[%s11142_s1 + $0x650] sm:$0xff] }
 0x301   : > { %v9651_v50 = vpop.f32.mrb[236].mxu1 }
 0x302   : > { %11247 = vst [vmem:[#allocation86_spill] sm:$0xff] %v9651_v50  ;;  %v4339_v26 = vpop.f32.mrb[237].mxu1 }
 0x303   : > { %5130 = vmatmul.mubr.bf16.gmra.mrb[88].mxu0 %v6814_v0  ;;  %v6831_v0 = vcombine.high %v569_v43, %v573_v54  ;;  %v9653_v49 = vpop.f32.mrb[238].mxu1 }
 0x304   : > { %5137 = vmatprep.mubr.bf16.mxu0 %v6823_v2  ;;  %v6848_v2 = vcombine.low %v586_v62, %v590_v19  ;;  %11248 = vst [vmem:[#allocation87_spill] sm:$0xff] %v9653_v49  ;;  %v4342_v36 = vpop.f32.mrb[239].mxu1  ;;  %v606_v62 = vld [vmem:[%s11142_s1 + $0x738] sm:$0xff]  ;;  %v6830_v19 = vcombine.low %v569_v43, %v573_v54  ;;  %v589_v43 = vld [vmem:[%s11142_s1 + $0x6b0] sm:$0xff] }
 0x305   : > { %v6865_v26 = vcombine.high %v602_v53, %v606_v62  ;;  %v610_v54 = vld [vmem:[%s11142_s1 + $0x758] sm:$0xff] }
 0x306   : > { %5707 = vmatmul.mubr.bf16.gmra.mrb[88].mxu1 %v6848_v2 }
 0x307   : > { %5714 = vmatprep.mubr.bf16.mxu1 %v6857_v32  ;;  %v585_v32 = vld [vmem:[%s11142_s1 + $0x690] sm:$0xff] }
 0x309   : > { %v9667_v36 = vpop.f32.mrb[240].mxu1 }
 0x30a   : > { %11249 = vst [vmem:[#allocation88_spill] sm:$0xff] %v9667_v36  ;;  %v4347_v2 = vpop.f32.mrb[241].mxu1 }
 0x30b   : > { %5138 = vmatmul.mubr.bf16.gmra.mrb[92].mxu0 %v6822_v5  ;;  %v6839_v5 = vcombine.high %v577_v31, %v581_v18  ;;  %v9669_v49 = vpop.f32.mrb[242].mxu1 }
 0x30c   : > { %5145 = vmatprep.mubr.bf16.mxu0 %v6831_v0  ;;  %v6856_v0 = vcombine.low %v594_v59, %v598_v57  ;;  %11250 = vst [vmem:[#allocation89_spill] sm:$0xff] %v9669_v49  ;;  %v4350_v50 = vpop.f32.mrb[243].mxu1  ;;  %v614_v59 = vld [vmem:[%s11142_s1 + $0x778] sm:$0xff]  ;;  %v6838_v57 = vcombine.low %v577_v31, %v581_v18  ;;  %v597_v31 = vld [vmem:[%s11142_s1 + $0x6f0] sm:$0xff] }
 0x30d   : > { %v6873_v2 = vcombine.high %v610_v54, %v614_v59  ;;  %v618_v18 = vld [vmem:[%s11142_s1 + $0x798] sm:$0xff] }
 0x30e   : > { %5715 = vmatmul.mubr.bf16.gmra.mrb[92].mxu1 %v6856_v0 }
 0x30f   : > { %5722 = vmatprep.mubr.bf16.mxu1 %v6865_v26  ;;  %v593_v26 = vld [vmem:[%s11142_s1 + $0x6d0] sm:$0xff] }
 0x311   : > { %v9683_v50 = vpop.f32.mrb[244].mxu1 }
 0x312   : > { %11251 = vst [vmem:[#allocation90_spill] sm:$0xff] %v9683_v50  ;;  %v4355_v0 = vpop.f32.mrb[245].mxu1 }
 0x313   : > { %5146 = vmatmul.mubr.bf16.gmra.mrb[96].mxu0 %v6830_v19  ;;  %v6847_v19 = vcombine.high %v585_v32, %v589_v43  ;;  %v9685_v49 = vpop.f32.mrb[246].mxu1 }
 0x314   : > { %5153 = vmatprep.mubr.bf16.mxu0 %v6839_v5  ;;  %v6864_v5 = vcombine.low %v602_v53, %v606_v62  ;;  %11252 = vst [vmem:[#allocation91_spill] sm:$0xff] %v9685_v49  ;;  %v4358_v36 = vpop.f32.mrb[247].mxu1  ;;  %v622_v53 = vld [vmem:[%s11142_s1 + $0x7b8] sm:$0xff]  ;;  %v6846_v62 = vcombine.low %v585_v32, %v589_v43  ;;  %v605_v32 = vld [vmem:[%s11142_s1 + $0x730] sm:$0xff] }
 0x315   : > { %v6881_v49 = vcombine.high %v618_v18, %v622_v53  ;;  %v626_v43 = vld [vmem:[%s11142_s1 + $0x7d8] sm:$0xff] }
 0x316   : > { %5723 = vmatmul.mubr.bf16.gmra.mrb[96].mxu1 %v6864_v5 }
 0x317   : > { %5730 = vmatprep.mubr.bf16.mxu1 %v6873_v2  ;;  %v601_v2 = vld [vmem:[%s11142_s1 + $0x710] sm:$0xff] }
 0x319   : > { %v9699_v36 = vpop.f32.mrb[248].mxu1 }
 0x31a   : > { %11253 = vst [vmem:[#allocation92_spill] sm:$0xff] %v9699_v36  ;;  %v4363_v5 = vpop.f32.mrb[249].mxu1 }
 0x31b   : > { %5154 = vmatmul.mubr.bf16.gmra.mrb[100].mxu0 %v6838_v57  ;;  %v6855_v57 = vcombine.high %v593_v26, %v597_v31  ;;  %v9701_v0 = vpop.f32.mrb[250].mxu1 }
 0x31c   : > { %5161 = vmatprep.mubr.bf16.mxu0 %v6847_v19  ;;  %v6872_v19 = vcombine.low %v610_v54, %v614_v59  ;;  %11254 = vst [vmem:[#allocation93_spill] sm:$0xff] %v9701_v0  ;;  %v4366_v50 = vpop.f32.mrb[251].mxu1  ;;  %v630_v54 = vld [vmem:[%s11142_s1 + $0x7f8] sm:$0xff]  ;;  %v6854_v59 = vcombine.low %v593_v26, %v597_v31  ;;  %v613_v26 = vld [vmem:[%s11142_s1 + $0x770] sm:$0xff] }
 0x31d   : > { %v6889_v0 = vcombine.high %v626_v43, %v630_v54  ;;  %v634_v31 = vld [vmem:[%s11142_s1 + $0x818] sm:$0xff] }
 0x31e   : > { %5731 = vmatmul.mubr.bf16.gmra.mrb[100].mxu1 %v6872_v19 }
 0x31f   : > { %5738 = vmatprep.mubr.bf16.mxu1 %v6881_v49  ;;  %v609_v49 = vld [vmem:[%s11142_s1 + $0x750] sm:$0xff] }
 0x321   : > { %v9715_v50 = vpop.f32.mrb[252].mxu1 }
 0x322   : > { %11255 = vst [vmem:[#allocation94_spill] sm:$0xff] %v9715_v50  ;;  %v4371_v19 = vpop.f32.mrb[253].mxu1 }
 0x323   : > { %5162 = vmatmul.mubr.bf16.gmra.mrb[104].mxu0 %v6846_v62  ;;  %v6863_v62 = vcombine.high %v601_v2, %v605_v32  ;;  %v9717_v5 = vpop.f32.mrb[254].mxu1 }
 0x324   : > { %5169 = vmatprep.mubr.bf16.mxu0 %v6855_v57  ;;  %v6880_v57 = vcombine.low %v618_v18, %v622_v53  ;;  %11256 = vst [vmem:[#allocation95_spill] sm:$0xff] %v9717_v5  ;;  %v4374_v36 = vpop.f32.mrb[255].mxu1  ;;  %v638_v18 = vld [vmem:[%s11142_s1 + $0x838] sm:$0xff]  ;;  %v6862_v53 = vcombine.low %v601_v2, %v605_v32 }
 0x325   : > { %v6897_v5 = vcombine.high %v634_v31, %v638_v18  ;;  %v642_v2 = vld [vmem:[%s11142_s1 + $0x858] sm:$0xff] }
 0x326   : > { %5739 = vmatmul.mubr.bf16.gmra.mrb[104].mxu1 %v6880_v57  ;;  %v6888_v57 = vcombine.low %v626_v43, %v630_v54  ;;  %v646_v32 = vld [vmem:[%s11142_s1 + $0x878] sm:$0xff]  ;;  %v6870_v43 = vcombine.low %v609_v49, %v613_v26 }
 0x327   : > { %5746 = vmatprep.mubr.bf16.mxu1 %v6889_v0  ;;  %v617_v0 = vld [vmem:[%s11142_s1 + $0x790] sm:$0xff] }
 0x329   : > { %v5532_v36 = vpop.f32.mrb[0].mxu1 }
 0x32b   : > { %5170 = vmatmul.mubr.bf16.gmra.mrb[108].mxu0 %v6854_v59  ;;  %v6871_v59 = vcombine.high %v609_v49, %v613_v26  ;;  %v629_v49 = vld [vmem:[%s11142_s1 + $0x7f0] sm:$0xff]  ;;  %v650_v26 = vld [vmem:[%s11142_s1 + $0x898] sm:$0xff] }
 0x32c   : > { %5177 = vmatprep.mubr.bf16.mxu0 %v6863_v62  ;;  %v5534_v62 = vpop.f32.mrb[1].mxu1 }
 0x32d   : > { %v5535_v19 = vpop.f32.mrb[2].mxu1 }
 0x32e   : > { %v5537_v50 = vpop.f32.mrb[3].mxu1  ;;  %5747 = vmatmul.mubr.bf16.gmra.mrb[108].mxu1 %v6888_v57  ;;  %v6905_v57 = vcombine.high %v642_v2, %v646_v32 }
 0x32f   : > { %5754 = vmatprep.mubr.bf16.mxu1 %v6897_v5  ;;  %v6879_v50 = vcombine.high %v617_v0, %v621_v24  ;;  %v625_v5 = vld [vmem:[%s11142_s1 + $0x7d0] sm:$0xff] }
 0x331   : > { %v9743_v54 = vpop.f32.mrb[4].mxu1 }
 0x333   : > { %5178 = vmatmul.mubr.bf16.gmra.mrb[112].mxu0 %v6862_v53  ;;  %v5542_v53 = vpop.f32.mrb[5].mxu1 }
 0x334   : > { %5185 = vmatprep.mubr.bf16.mxu0 %v6871_v59  ;;  %v6896_v59 = vcombine.low %v634_v31, %v638_v18  ;;  %v9745_v62 = vpop.f32.mrb[6].mxu1  ;;  %v6878_v31 = vcombine.low %v617_v0, %v621_v24  ;;  %v6904_v53 = vcombine.low %v642_v2, %v646_v32  ;;  %v637_v24 = vld [vmem:[%s11142_s1 + $0x830] sm:$0xff]  ;;  %v658_v2 = vld [vmem:[%s11142_s1 + $0x8d8] sm:$0xff] }
 0x335   : > { %v5545_v22 = vpop.f32.mrb[7].mxu1 }
 0x336   : > { %5755 = vmatmul.mubr.bf16.gmra.mrb[112].mxu1 %v6896_v59  ;;  %v654_v22 = vld [vmem:[%s11142_s1 + $0x8b8] sm:$0xff] }
 0x337   : > { %5762 = vmatprep.mubr.bf16.mxu1 %v6905_v57  ;;  %v6913_v51 = vcombine.high %v650_v26, %v654_v22  ;;  %v633_v57 = vld [vmem:[%s11142_s1 + $0x810] sm:$0xff]  ;;  %v6912_v29 = vcombine.low %v650_v26, %v654_v22 }
 0x338   : > { %v6895_v34 = vcombine.high %v633_v57, %v637_v24 }
 0x339   : > { %v9759_v18 = vpop.f32.mrb[8].mxu1 }
 0x33b   : > { %5186 = vmatmul.mubr.bf16.gmra.mrb[116].mxu0 %v6870_v43  ;;  %v6887_v43 = vcombine.high %v625_v5, %v629_v49 }
 0x33c   : > { %5193 = vmatprep.mubr.bf16.mxu0 %v6879_v50  ;;  %v5550_v50 = vpop.f32.mrb[9].mxu1 }
 0x33d   : > { %v9761_v59 = vpop.f32.mrb[10].mxu1 }
 0x33e   : > { %v5553_v11 = vpop.f32.mrb[11].mxu1  ;;  %5763 = vmatmul.mubr.bf16.gmra.mrb[116].mxu1 %v6904_v53 }
 0x33f   : > { %5770 = vmatprep.mubr.bf16.mxu1 %v6913_v51  ;;  %v662_v11 = vld [vmem:[%s11142_s1 + $0x8f8] sm:$0xff] }
 0x340   : > { %v6921_v17 = vcombine.high %v658_v2, %v662_v11  ;;  %v6920_v22 = vcombine.low %v658_v2, %v662_v11 }
 0x341   : > { %v9776_v50 = vpop.f32.mrb[12].mxu1 }
 0x342   : > { %v5558_v42 = vpop.f32.mrb[13].mxu1 }
 0x343   : > { %5194 = vmatmul.mubr.bf16.gmra.mrb[120].mxu0 %v6878_v31  ;;  %v9781_v40 = vpop.f32.mrb[14].mxu1 }
 0x344   : > { %5201 = vmatprep.mubr.bf16.mxu0 %v6887_v43  ;;  %v6886_v43 = vcombine.low %v625_v5, %v629_v49  ;;  %v5561_v37 = vpop.f32.mrb[15].mxu1 }
 0x345   : > { %v670_v37 = vld [vmem:[%s11142_s1 + $0x938] sm:$0xff] }
 0x346   : > { %v4987_v0 = vpop.f32.mrb[16].mxu0  ;;  %5771 = vmatmul.mubr.bf16.gmra.mrb[120].mxu1 %v6912_v29 }
 0x347   : > { %v7430_v32 = vadd.f32 %v4987_v0, %v8629_v60  ;;  %v4989_v31 = vpop.f32.mrb[17].mxu0  ;;  %v641_v60 = vld [vmem:[%s11142_s1 + $0x850] sm:$0xff]  ;;  %5778 = vmatprep.mubr.bf16.mxu1 %v6921_v17 }
 0x348   : > { %v4990_v53 = vpop.f32.mrb[18].mxu0 }
 0x349   : > { %v7432_v51 = vadd.f32 %v4990_v53, %v8631_v1  ;;  %v9779_v8 = vadd.f32 %v7430_v32, %v5532_v36  ;;  %v4992_v48 = vpop.f32.mrb[19].mxu0  ;;  %v645_v1 = vld [vmem:[%s11142_s1 + $0x870] sm:$0xff]  ;;  %v6894_v36 = vcombine.low %v633_v57, %v637_v24  ;;  %v674_v24 = vld [vmem:[%s11142_s1 + $0x958] sm:$0xff] }
 0x34a   : > { %v666_v48 = vld [vmem:[%s11142_s1 + $0x918] sm:$0xff]  ;;  %v6903_v49 = vcombine.high %v641_v60, %v645_v1  ;;  %v649_v57 = vld [vmem:[%s11142_s1 + $0x890] sm:$0xff] }
 0x34b   : > { %v9783_v16 = vadd.f32 %v7432_v51, %v5535_v19  ;;  %5202 = vmatmul.mubr.bf16.gmra.mrb[124].mxu0 %v6886_v43  ;;  %v9798_v19 = vpop.f32.mrb[16].mxu1  ;;  %v6929_v43 = vcombine.high %v666_v48, %v670_v37  ;;  %v6902_v51 = vcombine.low %v641_v60, %v645_v1  ;;  %v657_v60 = vld [vmem:[%s11142_s1 + $0x8d0] sm:$0xff]  ;;  %v682_v1 = vld [vmem:[%s11142_s1 + $0x998] sm:$0xff] }
 0x34c   : > { %5209 = vmatprep.mubr.bf16.mxu0 %v6895_v34  ;;  %v5566_v26 = vpop.f32.mrb[17].mxu1 }
 0x34d   : > { %v9804_v31 = vpop.f32.mrb[18].mxu1 }
 0x34e   : > { %v4995_v42 = vpop.f32.mrb[20].mxu0  ;;  %v5569_v53 = vpop.f32.mrb[19].mxu1  ;;  %5779 = vmatmul.mubr.bf16.gmra.mrb[124].mxu1 %v6920_v22 }
 0x34f   : > { %v7434_v29 = vadd.f32 %v4995_v42, %v8645_v9  ;;  %v4997_v34 = vpop.f32.mrb[21].mxu0  ;;  %5786 = vmatprep.mubr.bf16.mxu1 %v6929_v43 }
 0x350   : > { %v4998_v5 = vpop.f32.mrb[22].mxu0 }
 0x351   : > { %v7436_v17 = vadd.f32 %v4998_v5, %v8647_v15  ;;  %v9802_v0 = vadd.f32 %v7434_v29, %v9743_v54  ;;  %v5000_v32 = vpop.f32.mrb[23].mxu0  ;;  %v653_v15 = vld [vmem:[%s11142_s1 + $0x8b0] sm:$0xff]  ;;  %v9822_v42 = vpop.f32.mrb[20].mxu1  ;;  %v6928_v5 = vcombine.low %v666_v48, %v670_v37 }
 0x352   : > { %v6911_v34 = vcombine.high %v649_v57, %v653_v15  ;;  %v6910_v53 = vcombine.low %v649_v57, %v653_v15  ;;  %v665_v57 = vld [vmem:[%s11142_s1 + $0x910] sm:$0xff]  ;;  %v690_v15 = vld [vmem:[%s11142_s1 + $0x9d8] sm:$0xff] }
 0x353   : > { %v9807_v9 = vadd.f32 %v7436_v17, %v9745_v62  ;;  %5210 = vmatmul.mubr.bf16.gmra.mrb[128].mxu0 %v6894_v36  ;;  %v678_v62 = vld [vmem:[%s11142_s1 + $0x978] sm:$0xff]  ;;  %v5574_v36 = vpop.f32.mrb[21].mxu1 }
 0x354   : > { %5217 = vmatprep.mubr.bf16.mxu0 %v6903_v49  ;;  %v9828_v17 = vpop.f32.mrb[22].mxu1  ;;  %v6937_v32 = vcombine.high %v674_v24, %v678_v62 }
 0x355   : > { %v5577_v43 = vpop.f32.mrb[23].mxu1 }
 0x356   : > { %v5003_v54 = vpop.f32.mrb[24].mxu0  ;;  %5787 = vmatmul.mubr.bf16.gmra.mrb[128].mxu1 %v6928_v5 }
 0x357   : > { %v7438_v2 = vadd.f32 %v5003_v54, %v8661_v23  ;;  %v5005_v11 = vpop.f32.mrb[25].mxu0  ;;  %5794 = vmatprep.mubr.bf16.mxu1 %v6937_v32 }
 0x358   : > { %v5006_v29 = vpop.f32.mrb[26].mxu0 }
 0x359   : > { %v7440_v49 = vadd.f32 %v5006_v29, %v8663_v30  ;;  %v9826_v26 = vadd.f32 %v7438_v2, %v9759_v18  ;;  %v5008_v22 = vpop.f32.mrb[27].mxu0  ;;  %v661_v30 = vld [vmem:[%s11142_s1 + $0x8f0] sm:$0xff]  ;;  %v9846_v54 = vpop.f32.mrb[24].mxu1  ;;  %v6936_v29 = vcombine.low %v674_v24, %v678_v62 }
 0x35a   : > { %v6919_v11 = vcombine.high %v657_v60, %v661_v30  ;;  %v6918_v43 = vcombine.low %v657_v60, %v661_v30  ;;  %v673_v60 = vld [vmem:[%s11142_s1 + $0x950] sm:$0xff]  ;;  %v698_v30 = vld [vmem:[%s11142_s1 + $0xa18] sm:$0xff] }
 0x35b   : > { %v9831_v23 = vadd.f32 %v7440_v49, %v9761_v59  ;;  %5218 = vmatmul.mubr.bf16.gmra.mrb[132].mxu0 %v6902_v51  ;;  %v686_v59 = vld [vmem:[%s11142_s1 + $0x9b8] sm:$0xff]  ;;  %v5582_v51 = vpop.f32.mrb[25].mxu1 }
 0x35c   : > { %5225 = vmatprep.mubr.bf16.mxu0 %v6911_v34  ;;  %v9852_v49 = vpop.f32.mrb[26].mxu1  ;;  %v6945_v22 = vcombine.high %v682_v1, %v686_v59 }
 0x35d   : > { %v5585_v32 = vpop.f32.mrb[27].mxu1 }
 0x35e   : > { %v5011_v18 = vpop.f32.mrb[28].mxu0  ;;  %5795 = vmatmul.mubr.bf16.gmra.mrb[132].mxu1 %v6936_v29 }
 0x35f   : > { %v7442_v48 = vadd.f32 %v5011_v18, %v8677_v38  ;;  %v5013_v37 = vpop.f32.mrb[29].mxu0  ;;  %5802 = vmatprep.mubr.bf16.mxu1 %v6945_v22 }
 0x360   : > { %v5014_v2 = vpop.f32.mrb[30].mxu0 }
 0x361   : > { %v7444_v34 = vadd.f32 %v5014_v2, %v8679_v44  ;;  %v9850_v36 = vadd.f32 %v7442_v48, %v9776_v50  ;;  %v5016_v5 = vpop.f32.mrb[31].mxu0  ;;  %v669_v44 = vld [vmem:[%s11142_s1 + $0x930] sm:$0xff]  ;;  %v9870_v18 = vpop.f32.mrb[28].mxu1  ;;  %v6944_v2 = vcombine.low %v682_v1, %v686_v59 }
 0x362   : > { %v6927_v37 = vcombine.high %v665_v57, %v669_v44  ;;  %v6926_v32 = vcombine.low %v665_v57, %v669_v44  ;;  %v681_v57 = vld [vmem:[%s11142_s1 + $0x990] sm:$0xff]  ;;  %v706_v44 = vld [vmem:[%s11142_s1 + $0xa58] sm:$0xff] }
 0x363   : > { %v9855_v38 = vadd.f32 %v7444_v34, %v9781_v40  ;;  %5226 = vmatmul.mubr.bf16.gmra.mrb[136].mxu0 %v6910_v53  ;;  %v694_v40 = vld [vmem:[%s11142_s1 + $0x9f8] sm:$0xff]  ;;  %v5590_v53 = vpop.f32.mrb[29].mxu1 }
 0x364   : > { %5233 = vmatprep.mubr.bf16.mxu0 %v6919_v11  ;;  %v9876_v34 = vpop.f32.mrb[30].mxu1  ;;  %v6953_v5 = vcombine.high %v690_v15, %v694_v40 }
 0x365   : > { %v5593_v22 = vpop.f32.mrb[31].mxu1 }
 0x366   : > { %v5019_v50 = vpop.f32.mrb[32].mxu0  ;;  %5803 = vmatmul.mubr.bf16.gmra.mrb[136].mxu1 %v6944_v2 }
 0x367   : > { %v7446_v24 = vadd.f32 %v5019_v50, %v8693_v52  ;;  %v5021_v62 = vpop.f32.mrb[33].mxu0  ;;  %5810 = vmatprep.mubr.bf16.mxu1 %v6953_v5 }
 0x368   : > { %v5022_v48 = vpop.f32.mrb[34].mxu0 }
 0x369   : > { %v7448_v11 = vadd.f32 %v5022_v48, %v8695_v58  ;;  %v9874_v51 = vadd.f32 %v7446_v24, %v9798_v19  ;;  %v5024_v29 = vpop.f32.mrb[35].mxu0  ;;  %v677_v58 = vld [vmem:[%s11142_s1 + $0x970] sm:$0xff]  ;;  %v9894_v50 = vpop.f32.mrb[32].mxu1  ;;  %v6952_v48 = vcombine.low %v690_v15, %v694_v40 }
 0x36a   : > { %v6935_v62 = vcombine.high %v673_v60, %v677_v58  ;;  %v6934_v22 = vcombine.low %v673_v60, %v677_v58  ;;  %v689_v60 = vld [vmem:[%s11142_s1 + $0x9d0] sm:$0xff]  ;;  %v714_v58 = vld [vmem:[%s11142_s1 + $0xa98] sm:$0xff] }
 0x36b   : > { %v9879_v52 = vadd.f32 %v7448_v11, %v9804_v31  ;;  %5234 = vmatmul.mubr.bf16.gmra.mrb[140].mxu0 %v6918_v43  ;;  %v702_v31 = vld [vmem:[%s11142_s1 + $0xa38] sm:$0xff]  ;;  %v5598_v43 = vpop.f32.mrb[33].mxu1 }
 0x36c   : > { %5241 = vmatprep.mubr.bf16.mxu0 %v6927_v37  ;;  %v9900_v11 = vpop.f32.mrb[34].mxu1  ;;  %v6961_v29 = vcombine.high %v698_v30, %v702_v31 }
 0x36d   : > { %v5601_v5 = vpop.f32.mrb[35].mxu1 }
 0x36e   : > { %v5027_v19 = vpop.f32.mrb[36].mxu0  ;;  %5811 = vmatmul.mubr.bf16.gmra.mrb[140].mxu1 %v6952_v48 }
 0x36f   : > { %v7450_v1 = vadd.f32 %v5027_v19, %v8709_v4  ;;  %v5029_v59 = vpop.f32.mrb[37].mxu0  ;;  %5818 = vmatprep.mubr.bf16.mxu1 %v6961_v29 }
 0x370   : > { %v5030_v24 = vpop.f32.mrb[38].mxu0 }
 0x371   : > { %v7452_v37 = vadd.f32 %v5030_v24, %v8711_v10  ;;  %v9898_v53 = vadd.f32 %v7450_v1, %v9822_v42  ;;  %v5032_v2 = vpop.f32.mrb[39].mxu0  ;;  %v685_v10 = vld [vmem:[%s11142_s1 + $0x9b0] sm:$0xff]  ;;  %v9918_v19 = vpop.f32.mrb[36].mxu1  ;;  %v6960_v24 = vcombine.low %v698_v30, %v702_v31 }
 0x372   : > { %v6943_v59 = vcombine.high %v681_v57, %v685_v10  ;;  %v6942_v5 = vcombine.low %v681_v57, %v685_v10  ;;  %v697_v57 = vld [vmem:[%s11142_s1 + $0xa10] sm:$0xff]  ;;  %v722_v10 = vld [vmem:[%s11142_s1 + $0xad8] sm:$0xff] }
 0x373   : > { %v9903_v4 = vadd.f32 %v7452_v37, %v9828_v17  ;;  %5242 = vmatmul.mubr.bf16.gmra.mrb[144].mxu0 %v6926_v32  ;;  %v710_v17 = vld [vmem:[%s11142_s1 + $0xa78] sm:$0xff]  ;;  %v5606_v32 = vpop.f32.mrb[37].mxu1 }
 0x374   : > { %5249 = vmatprep.mubr.bf16.mxu0 %v6935_v62  ;;  %v9924_v37 = vpop.f32.mrb[38].mxu1  ;;  %v6969_v2 = vcombine.high %v706_v44, %v710_v17 }
 0x375   : > { %v5609_v29 = vpop.f32.mrb[39].mxu1 }
 0x376   : > { %v5035_v42 = vpop.f32.mrb[40].mxu0  ;;  %5819 = vmatmul.mubr.bf16.gmra.mrb[144].mxu1 %v6960_v24 }
 0x377   : > { %v7454_v15 = vadd.f32 %v5035_v42, %v8725_v20  ;;  %v5037_v40 = vpop.f32.mrb[41].mxu0  ;;  %5826 = vmatprep.mubr.bf16.mxu1 %v6969_v2 }
 0x378   : > { %v5038_v1 = vpop.f32.mrb[42].mxu0 }
 0x379   : > { %v7456_v62 = vadd.f32 %v5038_v1, %v8727_v27  ;;  %v9922_v43 = vadd.f32 %v7454_v15, %v9846_v54  ;;  %v5040_v48 = vpop.f32.mrb[43].mxu0  ;;  %v693_v27 = vld [vmem:[%s11142_s1 + $0x9f0] sm:$0xff]  ;;  %v9942_v42 = vpop.f32.mrb[40].mxu1  ;;  %v6968_v1 = vcombine.low %v706_v44, %v710_v17 }
 0x37a   : > { %v6951_v40 = vcombine.high %v689_v60, %v693_v27  ;;  %v6950_v29 = vcombine.low %v689_v60, %v693_v27  ;;  %v705_v60 = vld [vmem:[%s11142_s1 + $0xa50] sm:$0xff]  ;;  %v730_v27 = vld [vmem:[%s11142_s1 + $0xb18] sm:$0xff] }
 0x37b   : > { %v9927_v20 = vadd.f32 %v7456_v62, %v9852_v49  ;;  %5250 = vmatmul.mubr.bf16.gmra.mrb[148].mxu0 %v6934_v22  ;;  %v718_v49 = vld [vmem:[%s11142_s1 + $0xab8] sm:$0xff]  ;;  %v5614_v22 = vpop.f32.mrb[41].mxu1 }
 0x37c   : > { %5257 = vmatprep.mubr.bf16.mxu0 %v6943_v59  ;;  %v9948_v62 = vpop.f32.mrb[42].mxu1  ;;  %v6977_v48 = vcombine.high %v714_v58, %v718_v49 }
 0x37d   : > { %v5617_v2 = vpop.f32.mrb[43].mxu1 }
 0x37e   : > { %v5043_v54 = vpop.f32.mrb[44].mxu0  ;;  %5827 = vmatmul.mubr.bf16.gmra.mrb[148].mxu1 %v6968_v1 }
 0x37f   : > { %v7458_v30 = vadd.f32 %v5043_v54, %v8743_v39  ;;  %v5045_v31 = vpop.f32.mrb[45].mxu0  ;;  %5834 = vmatprep.mubr.bf16.mxu1 %v6977_v48 }
 0x380   : > { %v5046_v15 = vpop.f32.mrb[46].mxu0 }
 0x381   : > { %v7460_v59 = vadd.f32 %v5046_v15, %v8745_v46  ;;  %v9946_v32 = vadd.f32 %v7458_v30, %v9870_v18  ;;  %v5048_v24 = vpop.f32.mrb[47].mxu0  ;;  %v701_v46 = vld [vmem:[%s11142_s1 + $0xa30] sm:$0xff]  ;;  %v9966_v54 = vpop.f32.mrb[44].mxu1  ;;  %v6976_v15 = vcombine.low %v714_v58, %v718_v49 }
 0x382   : > { %v6959_v31 = vcombine.high %v697_v57, %v701_v46  ;;  %v6958_v2 = vcombine.low %v697_v57, %v701_v46  ;;  %v713_v57 = vld [vmem:[%s11142_s1 + $0xa90] sm:$0xff]  ;;  %v738_v46 = vld [vmem:[%s11142_s1 + $0xb58] sm:$0xff] }
 0x383   : > { %v9951_v39 = vadd.f32 %v7460_v59, %v9876_v34  ;;  %5258 = vmatmul.mubr.bf16.gmra.mrb[152].mxu0 %v6942_v5  ;;  %v726_v34 = vld [vmem:[%s11142_s1 + $0xaf8] sm:$0xff]  ;;  %v5622_v5 = vpop.f32.mrb[45].mxu1 }
 0x384   : > { %5265 = vmatprep.mubr.bf16.mxu0 %v6951_v40  ;;  %v9972_v59 = vpop.f32.mrb[46].mxu1  ;;  %v6985_v24 = vcombine.high %v722_v10, %v726_v34 }
 0x385   : > { %v5625_v48 = vpop.f32.mrb[47].mxu1 }
 0x386   : > { %v5051_v18 = vpop.f32.mrb[48].mxu0  ;;  %5835 = vmatmul.mubr.bf16.gmra.mrb[152].mxu1 %v6976_v15 }
 0x387   : > { %v7462_v44 = vadd.f32 %v5051_v18, %v8759_v56  ;;  %v5053_v17 = vpop.f32.mrb[49].mxu0  ;;  %5842 = vmatprep.mubr.bf16.mxu1 %v6985_v24 }
 0x388   : > { %v5054_v30 = vpop.f32.mrb[50].mxu0 }
 0x389   : > { %v7464_v40 = vadd.f32 %v5054_v30, %v8761_v63  ;;  %v9970_v22 = vadd.f32 %v7462_v44, %v9894_v50  ;;  %v5056_v1 = vpop.f32.mrb[51].mxu0  ;;  %v709_v63 = vld [vmem:[%s11142_s1 + $0xa70] sm:$0xff]  ;;  %v9990_v18 = vpop.f32.mrb[48].mxu1  ;;  %v6984_v30 = vcombine.low %v722_v10, %v726_v34 }
 0x38a   : > { %v6967_v17 = vcombine.high %v705_v60, %v709_v63  ;;  %v6966_v48 = vcombine.low %v705_v60, %v709_v63  ;;  %v721_v60 = vld [vmem:[%s11142_s1 + $0xad0] sm:$0xff]  ;;  %v746_v63 = vld [vmem:[%s11142_s1 + $0xb98] sm:$0xff] }
 0x38b   : > { %v9975_v56 = vadd.f32 %v7464_v40, %v9900_v11  ;;  %5266 = vmatmul.mubr.bf16.gmra.mrb[156].mxu0 %v6950_v29  ;;  %v734_v11 = vld [vmem:[%s11142_s1 + $0xb38] sm:$0xff]  ;;  %v5630_v29 = vpop.f32.mrb[49].mxu1 }
 0x38c   : > { %5273 = vmatprep.mubr.bf16.mxu0 %v6959_v31  ;;  %v9996_v40 = vpop.f32.mrb[50].mxu1  ;;  %v6993_v1 = vcombine.high %v730_v27, %v734_v11 }
 0x38d   : > { %v5633_v24 = vpop.f32.mrb[51].mxu1 }
 0x38e   : > { %v5059_v50 = vpop.f32.mrb[52].mxu0  ;;  %5843 = vmatmul.mubr.bf16.gmra.mrb[156].mxu1 %v6984_v30 }
 0x38f   : > { %v7466_v58 = vadd.f32 %v5059_v50, %v8777_v13  ;;  %v5061_v49 = vpop.f32.mrb[53].mxu0  ;;  %5850 = vmatprep.mubr.bf16.mxu1 %v6993_v1 }
 0x390   : > { %v5062_v44 = vpop.f32.mrb[54].mxu0 }
 0x391   : > { %v7468_v31 = vadd.f32 %v5062_v44, %v8779_v21  ;;  %v9994_v5 = vadd.f32 %v7466_v58, %v9918_v19  ;;  %v5064_v15 = vpop.f32.mrb[55].mxu0  ;;  %v717_v21 = vld [vmem:[%s11142_s1 + $0xab0] sm:$0xff]  ;;  %v10014_v50 = vpop.f32.mrb[52].mxu1  ;;  %v6992_v44 = vcombine.low %v730_v27, %v734_v11 }
 0x392   : > { %v6975_v49 = vcombine.high %v713_v57, %v717_v21  ;;  %v6974_v24 = vcombine.low %v713_v57, %v717_v21  ;;  %v729_v57 = vld [vmem:[%s11142_s1 + $0xb10] sm:$0xff]  ;;  %v754_v21 = vld [vmem:[%s11142_s1 + $0xbd8] sm:$0xff] }
 0x393   : > { %v9999_v13 = vadd.f32 %v7468_v31, %v9924_v37  ;;  %5274 = vmatmul.mubr.bf16.gmra.mrb[160].mxu0 %v6958_v2  ;;  %v742_v37 = vld [vmem:[%s11142_s1 + $0xb78] sm:$0xff]  ;;  %v5638_v2 = vpop.f32.mrb[53].mxu1 }
 0x394   : > { %5281 = vmatprep.mubr.bf16.mxu0 %v6967_v17  ;;  %v10020_v31 = vpop.f32.mrb[54].mxu1  ;;  %v7001_v15 = vcombine.high %v738_v46, %v742_v37 }
 0x395   : > { %v5641_v1 = vpop.f32.mrb[55].mxu1 }
 0x396   : > { %v5067_v19 = vpop.f32.mrb[56].mxu0  ;;  %5851 = vmatmul.mubr.bf16.gmra.mrb[160].mxu1 %v6992_v44 }
 0x397   : > { %v7470_v10 = vadd.f32 %v5067_v19, %v8796_v35  ;;  %v5069_v34 = vpop.f32.mrb[57].mxu0  ;;  %5858 = vmatprep.mubr.bf16.mxu1 %v7001_v15 }
 0x398   : > { %v5070_v58 = vpop.f32.mrb[58].mxu0 }
 0x399   : > { %v7472_v17 = vadd.f32 %v5070_v58, %v8798_v45  ;;  %v10018_v29 = vadd.f32 %v7470_v10, %v9942_v42  ;;  %v5072_v30 = vpop.f32.mrb[59].mxu0  ;;  %v725_v45 = vld [vmem:[%s11142_s1 + $0xaf0] sm:$0xff]  ;;  %v10038_v19 = vpop.f32.mrb[56].mxu1  ;;  %v7000_v58 = vcombine.low %v738_v46, %v742_v37 }
 0x39a   : > { %v6983_v34 = vcombine.high %v721_v60, %v725_v45  ;;  %v6982_v1 = vcombine.low %v721_v60, %v725_v45  ;;  %v737_v60 = vld [vmem:[%s11142_s1 + $0xb50] sm:$0xff]  ;;  %v762_v45 = vld [vmem:[%s11142_s1 + $0xc18] sm:$0xff] }
 0x39b   : > { %v10023_v35 = vadd.f32 %v7472_v17, %v9948_v62  ;;  %5282 = vmatmul.mubr.bf16.gmra.mrb[164].mxu0 %v6966_v48  ;;  %v750_v62 = vld [vmem:[%s11142_s1 + $0xbb8] sm:$0xff]  ;;  %v5646_v48 = vpop.f32.mrb[57].mxu1 }
 0x39c   : > { %5289 = vmatprep.mubr.bf16.mxu0 %v6975_v49  ;;  %v10044_v17 = vpop.f32.mrb[58].mxu1  ;;  %v7009_v30 = vcombine.high %v746_v63, %v750_v62 }
 0x39d   : > { %v5649_v15 = vpop.f32.mrb[59].mxu1 }
 0x39e   : > { %v5075_v42 = vpop.f32.mrb[60].mxu0  ;;  %5859 = vmatmul.mubr.bf16.gmra.mrb[164].mxu1 %v7000_v58 }
 0x39f   : > { %v7474_v27 = vadd.f32 %v5075_v42, %v8816_v61  ;;  %v5077_v11 = vpop.f32.mrb[61].mxu0  ;;  %5866 = vmatprep.mubr.bf16.mxu1 %v7009_v30 }
 0x3a0   : > { %v5078_v10 = vpop.f32.mrb[62].mxu0 }
 0x3a1   : > { %v7476_v49 = vadd.f32 %v5078_v10, %v8818_v6  ;;  %v10042_v2 = vadd.f32 %v7474_v27, %v9966_v54  ;;  %v5080_v44 = vpop.f32.mrb[63].mxu0  ;;  %v733_v6 = vld [vmem:[%s11142_s1 + $0xb30] sm:$0xff]  ;;  %v10062_v42 = vpop.f32.mrb[60].mxu1  ;;  %v7008_v10 = vcombine.low %v746_v63, %v750_v62 }
 0x3a2   : > { %v6991_v11 = vcombine.high %v729_v57, %v733_v6  ;;  %v6990_v15 = vcombine.low %v729_v57, %v733_v6  ;;  %v745_v57 = vld [vmem:[%s11142_s1 + $0xb90] sm:$0xff]  ;;  %v770_v6 = vld [vmem:[%s11142_s1 + $0xc58] sm:$0xff] }
 0x3a3   : > { %v10047_v61 = vadd.f32 %v7476_v49, %v9972_v59  ;;  %5290 = vmatmul.mubr.bf16.gmra.mrb[168].mxu0 %v6974_v24  ;;  %v758_v59 = vld [vmem:[%s11142_s1 + $0xbf8] sm:$0xff]  ;;  %v5654_v24 = vpop.f32.mrb[61].mxu1 }
 0x3a4   : > { %5297 = vmatprep.mubr.bf16.mxu0 %v6983_v34  ;;  %v10068_v49 = vpop.f32.mrb[62].mxu1  ;;  %v7017_v44 = vcombine.high %v754_v21, %v758_v59 }
 0x3a5   : > { %v5657_v30 = vpop.f32.mrb[63].mxu1 }
 0x3a6   : > { %v5083_v54 = vpop.f32.mrb[64].mxu0  ;;  %5867 = vmatmul.mubr.bf16.gmra.mrb[168].mxu1 %v7008_v10 }
 0x3a7   : > { %v7478_v46 = vadd.f32 %v5083_v54, %v8836_v25  ;;  %v5085_v37 = vpop.f32.mrb[65].mxu0  ;;  %5874 = vmatprep.mubr.bf16.mxu1 %v7017_v44 }
 0x3a8   : > { %v5086_v27 = vpop.f32.mrb[66].mxu0 }
 0x3a9   : > { %v7480_v34 = vadd.f32 %v5086_v27, %v8838_v33  ;;  %v10066_v48 = vadd.f32 %v7478_v46, %v9990_v18  ;;  %v5088_v58 = vpop.f32.mrb[67].mxu0  ;;  %v741_v33 = vld [vmem:[%s11142_s1 + $0xb70] sm:$0xff]  ;;  %v10086_v54 = vpop.f32.mrb[64].mxu1  ;;  %v7016_v27 = vcombine.low %v754_v21, %v758_v59 }
 0x3aa   : > { %v6999_v37 = vcombine.high %v737_v60, %v741_v33  ;;  %v6998_v30 = vcombine.low %v737_v60, %v741_v33  ;;  %v753_v60 = vld [vmem:[%s11142_s1 + $0xbd0] sm:$0xff]  ;;  %v778_v33 = vld [vmem:[%s11142_s1 + $0xc98] sm:$0xff] }
 0x3ab   : > { %v10071_v25 = vadd.f32 %v7480_v34, %v9996_v40  ;;  %5298 = vmatmul.mubr.bf16.gmra.mrb[172].mxu0 %v6982_v1  ;;  %v766_v40 = vld [vmem:[%s11142_s1 + $0xc38] sm:$0xff]  ;;  %v5662_v1 = vpop.f32.mrb[65].mxu1 }
 0x3ac   : > { %5305 = vmatprep.mubr.bf16.mxu0 %v6991_v11  ;;  %v10092_v34 = vpop.f32.mrb[66].mxu1  ;;  %v7025_v58 = vcombine.high %v762_v45, %v766_v40 }
 0x3ad   : > { %v5665_v44 = vpop.f32.mrb[67].mxu1 }
 0x3ae   : > { %v5091_v18 = vpop.f32.mrb[68].mxu0  ;;  %5875 = vmatmul.mubr.bf16.gmra.mrb[172].mxu1 %v7016_v27 }
 0x3af   : > { %v7482_v63 = vadd.f32 %v5091_v18, %v8864_v55  ;;  %v5093_v62 = vpop.f32.mrb[69].mxu0  ;;  %5882 = vmatprep.mubr.bf16.mxu1 %v7025_v58 }
 0x3b0   : > { %v5094_v46 = vpop.f32.mrb[70].mxu0 }
 0x3b1   : > { %v7484_v11 = vadd.f32 %v5094_v46, %v8866_v3  ;;  %v10090_v24 = vadd.f32 %v7482_v63, %v10014_v50  ;;  %v5096_v10 = vpop.f32.mrb[71].mxu0  ;;  %v749_v3 = vld [vmem:[%s11142_s1 + $0xbb0] sm:$0xff]  ;;  %v10110_v18 = vpop.f32.mrb[68].mxu1  ;;  %v7024_v46 = vcombine.low %v762_v45, %v766_v40 }
 0x3b2   : > { %v7007_v62 = vcombine.high %v745_v57, %v749_v3  ;;  %v7006_v44 = vcombine.low %v745_v57, %v749_v3  ;;  %v761_v57 = vld [vmem:[%s11142_s1 + $0xc10] sm:$0xff] }
 0x3b3   : > { %v10095_v55 = vadd.f32 %v7484_v11, %v10020_v31  ;;  %5306 = vmatmul.mubr.bf16.gmra.mrb[176].mxu0 %v6990_v15  ;;  %v774_v31 = vld [vmem:[%s11142_s1 + $0xc78] sm:$0xff]  ;;  %v5670_v15 = vpop.f32.mrb[69].mxu1 }
 0x3b4   : > { %5313 = vmatprep.mubr.bf16.mxu0 %v6999_v37  ;;  %v10116_v11 = vpop.f32.mrb[70].mxu1  ;;  %v7033_v10 = vcombine.high %v770_v6, %v774_v31 }
 0x3b5   : > { %v5673_v58 = vpop.f32.mrb[71].mxu1 }
 0x3b6   : > { %v5099_v50 = vpop.f32.mrb[72].mxu0  ;;  %5883 = vmatmul.mubr.bf16.gmra.mrb[176].mxu1 %v7024_v46 }
 0x3b7   : > { %v7486_v21 = vadd.f32 %v5099_v50, %v8894_v28  ;;  %v5101_v59 = vpop.f32.mrb[73].mxu0  ;;  %5890 = vmatprep.mubr.bf16.mxu1 %v7033_v10 }
 0x3b8   : > { %v5102_v63 = vpop.f32.mrb[74].mxu0 }
 0x3b9   : > { %v7488_v37 = vadd.f32 %v5102_v63, %v8896_v47  ;;  %v10114_v1 = vadd.f32 %v7486_v21, %v10038_v19  ;;  %v5104_v27 = vpop.f32.mrb[75].mxu0  ;;  %v757_v47 = vld [vmem:[%s11142_s1 + $0xbf0] sm:$0xff]  ;;  %v10134_v50 = vpop.f32.mrb[72].mxu1  ;;  %v7032_v63 = vcombine.low %v770_v6, %v774_v31  ;;  %v786_v6 = vld [vmem:[%s11142_s1 + $0xcd8] sm:$0xff]  ;;  %v11261_v31 = vld [vmem:[#allocation11_spill] sm:$0xff] }
 0x3ba   : > { %v7015_v59 = vcombine.high %v753_v60, %v757_v47 }
 0x3bb   : > { %v10119_v28 = vadd.f32 %v7488_v37, %v10044_v17  ;;  %5314 = vmatmul.mubr.bf16.gmra.mrb[180].mxu0 %v6998_v30  ;;  %v782_v17 = vld [vmem:[%s11142_s1 + $0xcb8] sm:$0xff]  ;;  %v5678_v30 = vpop.f32.mrb[73].mxu1 }
 0x3bc   : > { %5321 = vmatprep.mubr.bf16.mxu0 %v7007_v62  ;;  %v11258_v62 = vld [vmem:[#allocation10_spill] sm:$0xff]  ;;  %v10140_v27 = vpop.f32.mrb[74].mxu1  ;;  %v7041_v10 = vcombine.high %v778_v33, %v782_v17 }
 0x3bd   : > { %11257 = vst [vmem:[#allocation96_spill] sm:$0xff] %v10119_v28  ;;  %v5681_v58 = vpop.f32.mrb[75].mxu1 }
 0x3be   : > { %v5107_v19 = vpop.f32.mrb[76].mxu0  ;;  %5891 = vmatmul.mubr.bf16.gmra.mrb[180].mxu1 %v7032_v63  ;;  %v7040_v63 = vcombine.low %v778_v33, %v782_v17  ;;  %v794_v33 = vld [vmem:[%s11142_s1 + $0xd18] sm:$0xff] }
 0x3bf   : > { %v7490_v45 = vadd.f32 %v5107_v19, %v8924_v7  ;;  %v5109_v40 = vpop.f32.mrb[77].mxu0  ;;  %5898 = vmatprep.mubr.bf16.mxu1 %v7041_v10  ;;  %v11265_v17 = vld [vmem:[#allocation13_spill] sm:$0xff] }
 0x3c0   : > { %v5110_v21 = vpop.f32.mrb[78].mxu0  ;;  %v7014_v40 = vcombine.low %v753_v60, %v757_v47  ;;  %v769_v60 = vld [vmem:[%s11142_s1 + $0xc50] sm:$0xff] }
 0x3c1   : > { %v7492_v15 = vadd.f32 %v5110_v21, %v11258_v62  ;;  %v10138_v46 = vadd.f32 %v7490_v45, %v10062_v42  ;;  %v5112_v37 = vpop.f32.mrb[79].mxu0  ;;  %v765_v42 = vld [vmem:[%s11142_s1 + $0xc30] sm:$0xff] }
 0x3c2   : > { %v11262_v62 = vld [vmem:[#allocation12_spill] sm:$0xff] }
 0x3c3   : > { %11259 = vst [vmem:[#allocation10_spill] sm:$0xff] %v10138_v46  ;;  %v10143_v7 = vadd.f32 %v7492_v15, %v10068_v49  ;;  %5322 = vmatmul.mubr.bf16.gmra.mrb[184].mxu0 %v7006_v44  ;;  %v790_v49 = vld [vmem:[%s11142_s1 + $0xcf8] sm:$0xff]  ;;  %v10158_v44 = vpop.f32.mrb[76].mxu1 }
 0x3c4   : > { %5329 = vmatprep.mubr.bf16.mxu0 %v7015_v59  ;;  %v7023_v59 = vcombine.high %v761_v57, %v765_v42  ;;  %v5686_v30 = vpop.f32.mrb[77].mxu1 }
 0x3c5   : > { %11260 = vst [vmem:[#allocation97_spill] sm:$0xff] %v10143_v7  ;;  %v10164_v58 = vpop.f32.mrb[78].mxu1  ;;  %v7049_v7 = vcombine.high %v786_v6, %v790_v49  ;;  %v7048_v30 = vcombine.low %v786_v6, %v790_v49  ;;  %v802_v6 = vld [vmem:[%s11142_s1 + $0xd58] sm:$0xff]  ;;  %v11269_v49 = vld [vmem:[#allocation15_spill] sm:$0xff] }
 0x3c6   : > { %v5115_v3 = vpop.f32.mrb[80].mxu0  ;;  %v5689_v46 = vpop.f32.mrb[79].mxu1  ;;  %5899 = vmatmul.mubr.bf16.gmra.mrb[184].mxu1 %v7040_v63 }
 0x3c7   : > { %v7494_v19 = vadd.f32 %v5115_v3, %v11261_v31  ;;  %v5117_v45 = vpop.f32.mrb[81].mxu0  ;;  %5906 = vmatprep.mubr.bf16.mxu1 %v7049_v7  ;;  %v11266_v7 = vld [vmem:[#allocation14_spill] sm:$0xff] }
 0x3c8   : > { %v5118_v21 = vpop.f32.mrb[82].mxu0 }
 0x3c9   : > { %v7496_v15 = vadd.f32 %v5118_v21, %v11262_v62  ;;  %v10162_v37 = vadd.f32 %v7494_v19, %v10086_v54  ;;  %v5120_v10 = vpop.f32.mrb[83].mxu0  ;;  %v773_v54 = vld [vmem:[%s11142_s1 + $0xc70] sm:$0xff]  ;;  %v7022_v19 = vcombine.low %v761_v57, %v765_v42  ;;  %v10182_v45 = vpop.f32.mrb[80].mxu1 }
 0x3ca   : > { %v7031_v21 = vcombine.high %v769_v60, %v773_v54  ;;  %v777_v57 = vld [vmem:[%s11142_s1 + $0xc90] sm:$0xff] }
 0x3cb   : > { %11263 = vst [vmem:[#allocation11_spill] sm:$0xff] %v10162_v37  ;;  %v10167_v3 = vadd.f32 %v7496_v15, %v10092_v34  ;;  %5330 = vmatmul.mubr.bf16.gmra.mrb[188].mxu0 %v7014_v40  ;;  %v798_v34 = vld [vmem:[%s11142_s1 + $0xd38] sm:$0xff] }
 0x3cc   : > { %5337 = vmatprep.mubr.bf16.mxu0 %v7023_v59  ;;  %v5694_v59 = vpop.f32.mrb[81].mxu1 }
 0x3cd   : > { %11264 = vst [vmem:[#allocation12_spill] sm:$0xff] %v10167_v3  ;;  %v10188_v10 = vpop.f32.mrb[82].mxu1  ;;  %v7057_v3 = vcombine.high %v794_v33, %v798_v34  ;;  %v7056_v59 = vcombine.low %v794_v33, %v798_v34  ;;  %v810_v33 = vld [vmem:[%s11142_s1 + $0xd98] sm:$0xff] }
 0x3ce   : > { %v5123_v47 = vpop.f32.mrb[84].mxu0  ;;  %v5697_v37 = vpop.f32.mrb[83].mxu1  ;;  %5907 = vmatmul.mubr.bf16.gmra.mrb[188].mxu1 %v7048_v30  ;;  %v11273_v34 = vld [vmem:[#allocation17_spill] sm:$0xff] }
 0x3cf   : > { %v7498_v46 = vadd.f32 %v5123_v47, %v11265_v17  ;;  %v5125_v31 = vpop.f32.mrb[85].mxu0  ;;  %5914 = vmatprep.mubr.bf16.mxu1 %v7057_v3  ;;  %v11270_v3 = vld [vmem:[#allocation16_spill] sm:$0xff] }
 0x3d0   : > { %v5126_v40 = vpop.f32.mrb[86].mxu0 }
 0x3d1   : > { %v7500_v63 = vadd.f32 %v5126_v40, %v11266_v7  ;;  %v10186_v62 = vadd.f32 %v7498_v46, %v10110_v18  ;;  %v5128_v15 = vpop.f32.mrb[87].mxu0  ;;  %v781_v18 = vld [vmem:[%s11142_s1 + $0xcb0] sm:$0xff]  ;;  %v7030_v46 = vcombine.low %v769_v60, %v773_v54  ;;  %v10206_v31 = vpop.f32.mrb[84].mxu1 }
 0x3d2   : > { %v7039_v40 = vcombine.high %v777_v57, %v781_v18  ;;  %v785_v60 = vld [vmem:[%s11142_s1 + $0xcd0] sm:$0xff] }
 0x3d3   : > { %11267 = vst [vmem:[#allocation13_spill] sm:$0xff] %v10186_v62  ;;  %v10191_v47 = vadd.f32 %v7500_v63, %v10116_v11  ;;  %5338 = vmatmul.mubr.bf16.gmra.mrb[192].mxu0 %v7022_v19  ;;  %v806_v11 = vld [vmem:[%s11142_s1 + $0xd78] sm:$0xff] }
 0x3d4   : > { %5345 = vmatprep.mubr.bf16.mxu0 %v7031_v21  ;;  %v5702_v21 = vpop.f32.mrb[85].mxu1 }
 0x3d5   : > { %11268 = vst [vmem:[#allocation14_spill] sm:$0xff] %v10191_v47  ;;  %v10212_v15 = vpop.f32.mrb[86].mxu1  ;;  %v7065_v47 = vcombine.high %v802_v6, %v806_v11  ;;  %v7064_v21 = vcombine.low %v802_v6, %v806_v11  ;;  %v818_v6 = vld [vmem:[%s11142_s1 + $0xdd8] sm:$0xff]  ;;  %v11277_v11 = vld [vmem:[#allocation19_spill] sm:$0xff] }
 0x3d6   : > { %v5131_v42 = vpop.f32.mrb[88].mxu0  ;;  %v5705_v62 = vpop.f32.mrb[87].mxu1  ;;  %5915 = vmatmul.mubr.bf16.gmra.mrb[192].mxu1 %v7056_v59 }
 0x3d7   : > { %v7502_v37 = vadd.f32 %v5131_v42, %v11269_v49  ;;  %v5133_v17 = vpop.f32.mrb[89].mxu0  ;;  %5922 = vmatprep.mubr.bf16.mxu1 %v7065_v47  ;;  %v11274_v47 = vld [vmem:[#allocation18_spill] sm:$0xff] }
 0x3d8   : > { %v5134_v19 = vpop.f32.mrb[90].mxu0 }
 0x3d9   : > { %v7504_v30 = vadd.f32 %v5134_v19, %v11270_v3  ;;  %v10210_v7 = vadd.f32 %v7502_v37, %v10134_v50  ;;  %v5136_v63 = vpop.f32.mrb[91].mxu0  ;;  %v789_v50 = vld [vmem:[%s11142_s1 + $0xcf0] sm:$0xff]  ;;  %v7038_v37 = vcombine.low %v777_v57, %v781_v18  ;;  %v10230_v17 = vpop.f32.mrb[88].mxu1 }
 0x3da   : > { %v7047_v19 = vcombine.high %v785_v60, %v789_v50  ;;  %v793_v57 = vld [vmem:[%s11142_s1 + $0xd10] sm:$0xff] }
 0x3db   : > { %11271 = vst [vmem:[#allocation15_spill] sm:$0xff] %v10210_v7  ;;  %v10215_v42 = vadd.f32 %v7504_v30, %v10140_v27  ;;  %5346 = vmatmul.mubr.bf16.gmra.mrb[196].mxu0 %v7030_v46  ;;  %v814_v27 = vld [vmem:[%s11142_s1 + $0xdb8] sm:$0xff] }
 0x3dc   : > { %5353 = vmatprep.mubr.bf16.mxu0 %v7039_v40  ;;  %v5710_v40 = vpop.f32.mrb[89].mxu1 }
 0x3dd   : > { %11272 = vst [vmem:[#allocation16_spill] sm:$0xff] %v10215_v42  ;;  %v10236_v63 = vpop.f32.mrb[90].mxu1  ;;  %v7073_v42 = vcombine.high %v810_v33, %v814_v27  ;;  %v7072_v40 = vcombine.low %v810_v33, %v814_v27  ;;  %v826_v33 = vld [vmem:[%s11142_s1 + $0xe18] sm:$0xff] }
 0x3de   : > { %v5139_v54 = vpop.f32.mrb[92].mxu0  ;;  %v5713_v7 = vpop.f32.mrb[91].mxu1  ;;  %5923 = vmatmul.mubr.bf16.gmra.mrb[196].mxu1 %v7064_v21  ;;  %v11281_v27 = vld [vmem:[#allocation21_spill] sm:$0xff] }
 0x3df   : > { %v7506_v62 = vadd.f32 %v5139_v54, %v11273_v34  ;;  %v5141_v49 = vpop.f32.mrb[93].mxu0  ;;  %5930 = vmatprep.mubr.bf16.mxu1 %v7073_v42  ;;  %v11278_v42 = vld [vmem:[#allocation20_spill] sm:$0xff] }
 0x3e0   : > { %v5142_v46 = vpop.f32.mrb[94].mxu0 }
 0x3e1   : > { %v7508_v59 = vadd.f32 %v5142_v46, %v11274_v47  ;;  %v10234_v3 = vadd.f32 %v7506_v62, %v10158_v44  ;;  %v5144_v30 = vpop.f32.mrb[95].mxu0  ;;  %v797_v44 = vld [vmem:[%s11142_s1 + $0xd30] sm:$0xff]  ;;  %v7046_v62 = vcombine.low %v785_v60, %v789_v50  ;;  %v10254_v49 = vpop.f32.mrb[92].mxu1 }
 0x3e2   : > { %v7055_v46 = vcombine.high %v793_v57, %v797_v44  ;;  %v801_v60 = vld [vmem:[%s11142_s1 + $0xd50] sm:$0xff] }
 0x3e3   : > { %11275 = vst [vmem:[#allocation17_spill] sm:$0xff] %v10234_v3  ;;  %v10239_v54 = vadd.f32 %v7508_v59, %v10164_v58  ;;  %5354 = vmatmul.mubr.bf16.gmra.mrb[200].mxu0 %v7038_v37  ;;  %v822_v58 = vld [vmem:[%s11142_s1 + $0xdf8] sm:$0xff] }
 0x3e4   : > { %5361 = vmatprep.mubr.bf16.mxu0 %v7047_v19  ;;  %v5718_v19 = vpop.f32.mrb[93].mxu1 }
 0x3e5   : > { %11276 = vst [vmem:[#allocation18_spill] sm:$0xff] %v10239_v54  ;;  %v10260_v30 = vpop.f32.mrb[94].mxu1  ;;  %v7081_v54 = vcombine.high %v818_v6, %v822_v58  ;;  %v7080_v19 = vcombine.low %v818_v6, %v822_v58  ;;  %v834_v6 = vld [vmem:[%s11142_s1 + $0xe58] sm:$0xff]  ;;  %v11285_v58 = vld [vmem:[#allocation23_spill] sm:$0xff] }
 0x3e6   : > { %v5147_v18 = vpop.f32.mrb[96].mxu0  ;;  %v5721_v3 = vpop.f32.mrb[95].mxu1  ;;  %5931 = vmatmul.mubr.bf16.gmra.mrb[200].mxu1 %v7072_v40 }
 0x3e7   : > { %v7510_v7 = vadd.f32 %v5147_v18, %v11277_v11  ;;  %v5149_v34 = vpop.f32.mrb[97].mxu0  ;;  %5938 = vmatprep.mubr.bf16.mxu1 %v7081_v54  ;;  %v11282_v54 = vld [vmem:[#allocation22_spill] sm:$0xff] }
 0x3e8   : > { %v5150_v37 = vpop.f32.mrb[98].mxu0 }
 0x3e9   : > { %v7512_v21 = vadd.f32 %v5150_v37, %v11278_v42  ;;  %v10258_v47 = vadd.f32 %v7510_v7, %v10182_v45  ;;  %v5152_v59 = vpop.f32.mrb[99].mxu0  ;;  %v805_v45 = vld [vmem:[%s11142_s1 + $0xd70] sm:$0xff]  ;;  %v7054_v7 = vcombine.low %v793_v57, %v797_v44  ;;  %v10278_v34 = vpop.f32.mrb[96].mxu1 }
 0x3ea   : > { %v7063_v37 = vcombine.high %v801_v60, %v805_v45  ;;  %v809_v57 = vld [vmem:[%s11142_s1 + $0xd90] sm:$0xff] }
 0x3eb   : > { %11279 = vst [vmem:[#allocation19_spill] sm:$0xff] %v10258_v47  ;;  %v10263_v18 = vadd.f32 %v7512_v21, %v10188_v10  ;;  %5362 = vmatmul.mubr.bf16.gmra.mrb[204].mxu0 %v7046_v62  ;;  %v830_v10 = vld [vmem:[%s11142_s1 + $0xe38] sm:$0xff] }
 0x3ec   : > { %5369 = vmatprep.mubr.bf16.mxu0 %v7055_v46  ;;  %v5726_v46 = vpop.f32.mrb[97].mxu1 }
 0x3ed   : > { %11280 = vst [vmem:[#allocation20_spill] sm:$0xff] %v10263_v18  ;;  %v10284_v59 = vpop.f32.mrb[98].mxu1  ;;  %v7089_v18 = vcombine.high %v826_v33, %v830_v10  ;;  %v7088_v46 = vcombine.low %v826_v33, %v830_v10  ;;  %v842_v33 = vld [vmem:[%s11142_s1 + $0xe98] sm:$0xff] }
 0x3ee   : > { %v5155_v50 = vpop.f32.mrb[100].mxu0  ;;  %v5729_v47 = vpop.f32.mrb[99].mxu1  ;;  %5939 = vmatmul.mubr.bf16.gmra.mrb[204].mxu1 %v7080_v19  ;;  %v11289_v10 = vld [vmem:[#allocation25_spill] sm:$0xff] }
 0x3ef   : > { %v7514_v3 = vadd.f32 %v5155_v50, %v11281_v27  ;;  %v5157_v11 = vpop.f32.mrb[101].mxu0  ;;  %5946 = vmatprep.mubr.bf16.mxu1 %v7089_v18  ;;  %v11286_v18 = vld [vmem:[#allocation24_spill] sm:$0xff] }
 0x3f0   : > { %v5158_v62 = vpop.f32.mrb[102].mxu0 }
 0x3f1   : > { %v7516_v40 = vadd.f32 %v5158_v62, %v11282_v54  ;;  %v10282_v42 = vadd.f32 %v7514_v3, %v10206_v31  ;;  %v5160_v21 = vpop.f32.mrb[103].mxu0  ;;  %v813_v31 = vld [vmem:[%s11142_s1 + $0xdb0] sm:$0xff]  ;;  %v7062_v3 = vcombine.low %v801_v60, %v805_v45  ;;  %v10302_v11 = vpop.f32.mrb[100].mxu1 }
 0x3f2   : > { %v7071_v62 = vcombine.high %v809_v57, %v813_v31  ;;  %v817_v60 = vld [vmem:[%s11142_s1 + $0xdd0] sm:$0xff] }
 0x3f3   : > { %11283 = vst [vmem:[#allocation21_spill] sm:$0xff] %v10282_v42  ;;  %v10287_v50 = vadd.f32 %v7516_v40, %v10212_v15  ;;  %5370 = vmatmul.mubr.bf16.gmra.mrb[208].mxu0 %v7054_v7  ;;  %v838_v15 = vld [vmem:[%s11142_s1 + $0xe78] sm:$0xff] }
 0x3f4   : > { %5377 = vmatprep.mubr.bf16.mxu0 %v7063_v37  ;;  %v5734_v37 = vpop.f32.mrb[101].mxu1 }
 0x3f5   : > { %11284 = vst [vmem:[#allocation22_spill] sm:$0xff] %v10287_v50  ;;  %v10308_v21 = vpop.f32.mrb[102].mxu1  ;;  %v7097_v50 = vcombine.high %v834_v6, %v838_v15  ;;  %v7096_v37 = vcombine.low %v834_v6, %v838_v15  ;;  %v850_v6 = vld [vmem:[%s11142_s1 + $0xed8] sm:$0xff]  ;;  %v11293_v15 = vld [vmem:[#allocation27_spill] sm:$0xff] }
 0x3f6   : > { %v5163_v44 = vpop.f32.mrb[104].mxu0  ;;  %v5737_v42 = vpop.f32.mrb[103].mxu1  ;;  %5947 = vmatmul.mubr.bf16.gmra.mrb[208].mxu1 %v7088_v46 }
 0x3f7   : > { %v7518_v47 = vadd.f32 %v5163_v44, %v11285_v58  ;;  %v5165_v27 = vpop.f32.mrb[105].mxu0  ;;  %5954 = vmatprep.mubr.bf16.mxu1 %v7097_v50  ;;  %v11290_v50 = vld [vmem:[#allocation26_spill] sm:$0xff] }
 0x3f8   : > { %v5166_v7 = vpop.f32.mrb[106].mxu0 }
 0x3f9   : > { %v7520_v19 = vadd.f32 %v5166_v7, %v11286_v18  ;;  %v10306_v54 = vadd.f32 %v7518_v47, %v10230_v17  ;;  %v5168_v40 = vpop.f32.mrb[107].mxu0  ;;  %v821_v17 = vld [vmem:[%s11142_s1 + $0xdf0] sm:$0xff]  ;;  %v7070_v47 = vcombine.low %v809_v57, %v813_v31  ;;  %v10326_v27 = vpop.f32.mrb[104].mxu1 }
 0x3fa   : > { %v7079_v7 = vcombine.high %v817_v60, %v821_v17  ;;  %v825_v57 = vld [vmem:[%s11142_s1 + $0xe10] sm:$0xff] }
 0x3fb   : > { %11287 = vst [vmem:[#allocation23_spill] sm:$0xff] %v10306_v54  ;;  %v10311_v44 = vadd.f32 %v7520_v19, %v10236_v63  ;;  %5378 = vmatmul.mubr.bf16.gmra.mrb[212].mxu0 %v7062_v3  ;;  %v846_v63 = vld [vmem:[%s11142_s1 + $0xeb8] sm:$0xff] }
 0x3fc   : > { %5385 = vmatprep.mubr.bf16.mxu0 %v7071_v62  ;;  %v5742_v62 = vpop.f32.mrb[105].mxu1 }
 0x3fd   : > { %11288 = vst [vmem:[#allocation24_spill] sm:$0xff] %v10311_v44  ;;  %v10332_v40 = vpop.f32.mrb[106].mxu1  ;;  %v7105_v44 = vcombine.high %v842_v33, %v846_v63  ;;  %v7104_v62 = vcombine.low %v842_v33, %v846_v63  ;;  %v858_v33 = vld [vmem:[%s11142_s1 + $0xf18] sm:$0xff] }
 0x3fe   : > { %v5171_v45 = vpop.f32.mrb[108].mxu0  ;;  %v5745_v54 = vpop.f32.mrb[107].mxu1  ;;  %5955 = vmatmul.mubr.bf16.gmra.mrb[212].mxu1 %v7096_v37  ;;  %v11297_v63 = vld [vmem:[#allocation29_spill] sm:$0xff] }
 0x3ff   : > { %v7522_v42 = vadd.f32 %v5171_v45, %v11289_v10  ;;  %v5173_v58 = vpop.f32.mrb[109].mxu0  ;;  %5962 = vmatprep.mubr.bf16.mxu1 %v7105_v44  ;;  %v11294_v44 = vld [vmem:[#allocation28_spill] sm:$0xff] }
 0x400   : > { %v5174_v3 = vpop.f32.mrb[110].mxu0 }
 0x401   : > { %v7524_v46 = vadd.f32 %v5174_v3, %v11290_v50  ;;  %v10330_v18 = vadd.f32 %v7522_v42, %v10254_v49  ;;  %v5176_v19 = vpop.f32.mrb[111].mxu0  ;;  %v829_v49 = vld [vmem:[%s11142_s1 + $0xe30] sm:$0xff]  ;;  %v7078_v42 = vcombine.low %v817_v60, %v821_v17  ;;  %v10350_v58 = vpop.f32.mrb[108].mxu1 }
 0x402   : > { %v7087_v3 = vcombine.high %v825_v57, %v829_v49  ;;  %v833_v60 = vld [vmem:[%s11142_s1 + $0xe50] sm:$0xff] }
 0x403   : > { %11291 = vst [vmem:[#allocation25_spill] sm:$0xff] %v10330_v18  ;;  %v10335_v45 = vadd.f32 %v7524_v46, %v10260_v30  ;;  %5386 = vmatmul.mubr.bf16.gmra.mrb[216].mxu0 %v7070_v47  ;;  %v854_v30 = vld [vmem:[%s11142_s1 + $0xef8] sm:$0xff] }
 0x404   : > { %5393 = vmatprep.mubr.bf16.mxu0 %v7079_v7  ;;  %v5750_v7 = vpop.f32.mrb[109].mxu1 }
 0x405   : > { %11292 = vst [vmem:[#allocation26_spill] sm:$0xff] %v10335_v45  ;;  %v10356_v19 = vpop.f32.mrb[110].mxu1  ;;  %v7113_v45 = vcombine.high %v850_v6, %v854_v30  ;;  %v7112_v7 = vcombine.low %v850_v6, %v854_v30  ;;  %v866_v6 = vld [vmem:[%s11142_s1 + $0xf58] sm:$0xff]  ;;  %v11301_v30 = vld [vmem:[#allocation31_spill] sm:$0xff] }
 0x406   : > { %v5179_v31 = vpop.f32.mrb[112].mxu0  ;;  %v5753_v18 = vpop.f32.mrb[111].mxu1  ;;  %5963 = vmatmul.mubr.bf16.gmra.mrb[216].mxu1 %v7104_v62 }
 0x407   : > { %v7526_v54 = vadd.f32 %v5179_v31, %v11293_v15  ;;  %v5181_v10 = vpop.f32.mrb[113].mxu0  ;;  %5970 = vmatprep.mubr.bf16.mxu1 %v7113_v45  ;;  %v11298_v45 = vld [vmem:[#allocation30_spill] sm:$0xff] }
 0x408   : > { %v5182_v47 = vpop.f32.mrb[114].mxu0 }
 0x409   : > { %v7528_v37 = vadd.f32 %v5182_v47, %v11294_v44  ;;  %v10354_v50 = vadd.f32 %v7526_v54, %v10278_v34  ;;  %v5184_v46 = vpop.f32.mrb[115].mxu0  ;;  %v837_v34 = vld [vmem:[%s11142_s1 + $0xe70] sm:$0xff]  ;;  %v7086_v54 = vcombine.low %v825_v57, %v829_v49  ;;  %v10374_v10 = vpop.f32.mrb[112].mxu1 }
 0x40a   : > { %v7095_v47 = vcombine.high %v833_v60, %v837_v34  ;;  %v841_v57 = vld [vmem:[%s11142_s1 + $0xe90] sm:$0xff] }
 0x40b   : > { %11295 = vst [vmem:[#allocation27_spill] sm:$0xff] %v10354_v50  ;;  %v10359_v31 = vadd.f32 %v7528_v37, %v10284_v59  ;;  %5394 = vmatmul.mubr.bf16.gmra.mrb[220].mxu0 %v7078_v42  ;;  %v862_v59 = vld [vmem:[%s11142_s1 + $0xf38] sm:$0xff] }
 0x40c   : > { %5401 = vmatprep.mubr.bf16.mxu0 %v7087_v3  ;;  %v5758_v3 = vpop.f32.mrb[113].mxu1 }
 0x40d   : > { %11296 = vst [vmem:[#allocation28_spill] sm:$0xff] %v10359_v31  ;;  %v10380_v46 = vpop.f32.mrb[114].mxu1  ;;  %v7121_v31 = vcombine.high %v858_v33, %v862_v59  ;;  %v7120_v3 = vcombine.low %v858_v33, %v862_v59  ;;  %v874_v33 = vld [vmem:[%s11142_s1 + $0xf98] sm:$0xff] }
 0x40e   : > { %v5187_v17 = vpop.f32.mrb[116].mxu0  ;;  %v5761_v50 = vpop.f32.mrb[115].mxu1  ;;  %5971 = vmatmul.mubr.bf16.gmra.mrb[220].mxu1 %v7112_v7  ;;  %v11305_v59 = vld [vmem:[#allocation33_spill] sm:$0xff] }
 0x40f   : > { %v7530_v18 = vadd.f32 %v5187_v17, %v11297_v63  ;;  %v5189_v15 = vpop.f32.mrb[117].mxu0  ;;  %5978 = vmatprep.mubr.bf16.mxu1 %v7121_v31  ;;  %v11302_v31 = vld [vmem:[#allocation32_spill] sm:$0xff] }
 0x410   : > { %v5190_v42 = vpop.f32.mrb[118].mxu0 }
 0x411   : > { %v7532_v62 = vadd.f32 %v5190_v42, %v11298_v45  ;;  %v10378_v44 = vadd.f32 %v7530_v18, %v10302_v11  ;;  %v5192_v37 = vpop.f32.mrb[119].mxu0  ;;  %v845_v11 = vld [vmem:[%s11142_s1 + $0xeb0] sm:$0xff]  ;;  %v7094_v18 = vcombine.low %v833_v60, %v837_v34  ;;  %v10398_v15 = vpop.f32.mrb[116].mxu1 }
 0x412   : > { %v7103_v42 = vcombine.high %v841_v57, %v845_v11  ;;  %v849_v60 = vld [vmem:[%s11142_s1 + $0xed0] sm:$0xff] }
 0x413   : > { %11299 = vst [vmem:[#allocation29_spill] sm:$0xff] %v10378_v44  ;;  %v10383_v17 = vadd.f32 %v7532_v62, %v10308_v21  ;;  %5402 = vmatmul.mubr.bf16.gmra.mrb[224].mxu0 %v7086_v54  ;;  %v870_v21 = vld [vmem:[%s11142_s1 + $0xf78] sm:$0xff] }
 0x414   : > { %5409 = vmatprep.mubr.bf16.mxu0 %v7095_v47  ;;  %v5766_v47 = vpop.f32.mrb[117].mxu1 }
 0x415   : > { %11300 = vst [vmem:[#allocation30_spill] sm:$0xff] %v10383_v17  ;;  %v10404_v37 = vpop.f32.mrb[118].mxu1  ;;  %v7129_v17 = vcombine.high %v866_v6, %v870_v21  ;;  %v7128_v47 = vcombine.low %v866_v6, %v870_v21  ;;  %v882_v6 = vld [vmem:[%s11142_s1 + $0xfd8] sm:$0xff]  ;;  %v11309_v21 = vld [vmem:[#allocation35_spill] sm:$0xff] }
 0x416   : > { %v5195_v49 = vpop.f32.mrb[120].mxu0  ;;  %v5769_v44 = vpop.f32.mrb[119].mxu1  ;;  %5979 = vmatmul.mubr.bf16.gmra.mrb[224].mxu1 %v7120_v3 }
 0x417   : > { %v7534_v50 = vadd.f32 %v5195_v49, %v11301_v30  ;;  %v5197_v63 = vpop.f32.mrb[121].mxu0  ;;  %5986 = vmatprep.mubr.bf16.mxu1 %v7129_v17  ;;  %v11306_v17 = vld [vmem:[#allocation34_spill] sm:$0xff] }
 0x418   : > { %v5198_v54 = vpop.f32.mrb[122].mxu0 }
 0x419   : > { %v7536_v7 = vadd.f32 %v5198_v54, %v11302_v31  ;;  %v10402_v45 = vadd.f32 %v7534_v50, %v10326_v27  ;;  %v5200_v62 = vpop.f32.mrb[123].mxu0  ;;  %v853_v27 = vld [vmem:[%s11142_s1 + $0xef0] sm:$0xff]  ;;  %v7102_v50 = vcombine.low %v841_v57, %v845_v11  ;;  %v10422_v63 = vpop.f32.mrb[120].mxu1 }
 0x41a   : > { %v7111_v54 = vcombine.high %v849_v60, %v853_v27  ;;  %v857_v57 = vld [vmem:[%s11142_s1 + $0xf10] sm:$0xff] }
 0x41b   : > { %11303 = vst [vmem:[#allocation31_spill] sm:$0xff] %v10402_v45  ;;  %v10407_v49 = vadd.f32 %v7536_v7, %v10332_v40  ;;  %5410 = vmatmul.mubr.bf16.gmra.mrb[228].mxu0 %v7094_v18  ;;  %v878_v40 = vld [vmem:[%s11142_s1 + $0xfb8] sm:$0xff] }
 0x41c   : > { %5417 = vmatprep.mubr.bf16.mxu0 %v7103_v42  ;;  %v5774_v42 = vpop.f32.mrb[121].mxu1 }
 0x41d   : > { %11304 = vst [vmem:[#allocation32_spill] sm:$0xff] %v10407_v49  ;;  %v10428_v62 = vpop.f32.mrb[122].mxu1  ;;  %v7137_v49 = vcombine.high %v874_v33, %v878_v40  ;;  %v7136_v42 = vcombine.low %v874_v33, %v878_v40  ;;  %v11311_v33 = vld [vmem:[#allocation37_spill] sm:$0xff] }
 0x41e   : > { %v5203_v34 = vpop.f32.mrb[124].mxu0  ;;  %v5777_v45 = vpop.f32.mrb[123].mxu1  ;;  %5987 = vmatmul.mubr.bf16.gmra.mrb[228].mxu1 %v7128_v47 }
 0x41f   : > { %v7538_v44 = vadd.f32 %v5203_v34, %v11305_v59  ;;  %v5205_v30 = vpop.f32.mrb[125].mxu0  ;;  %5994 = vmatprep.mubr.bf16.mxu1 %v7137_v49  ;;  %v11310_v49 = vld [vmem:[#allocation36_spill] sm:$0xff] }
 0x420   : > { %v5206_v18 = vpop.f32.mrb[126].mxu0 }
 0x421   : > { %v7540_v3 = vadd.f32 %v5206_v18, %v11306_v17  ;;  %v10426_v31 = vadd.f32 %v7538_v44, %v10350_v58  ;;  %v5208_v7 = vpop.f32.mrb[127].mxu0  ;;  %v861_v58 = vld [vmem:[%s11142_s1 + $0xf30] sm:$0xff]  ;;  %v7110_v44 = vcombine.low %v849_v60, %v853_v27  ;;  %v10446_v30 = vpop.f32.mrb[124].mxu1 }
 0x422   : > { %v7119_v18 = vcombine.high %v857_v57, %v861_v58  ;;  %v865_v60 = vld [vmem:[%s11142_s1 + $0xf50] sm:$0xff] }
 0x423   : > { %11307 = vst [vmem:[#allocation33_spill] sm:$0xff] %v10426_v31  ;;  %v10431_v34 = vadd.f32 %v7540_v3, %v10356_v19  ;;  %5418 = vmatmul.mubr.bf16.gmra.mrb[232].mxu0 %v7102_v50  ;;  %v886_v19 = vld [vmem:[%s11142_s1 + $0xff8] sm:$0xff]  ;;  %v869_v27 = vld [vmem:[%s11142_s1 + $0xf70] sm:$0xff] }
 0x424   : > { %5425 = vmatprep.mubr.bf16.mxu0 %v7111_v54  ;;  %v5782_v54 = vpop.f32.mrb[125].mxu1 }
 0x425   : > { %11308 = vst [vmem:[#allocation34_spill] sm:$0xff] %v10431_v34  ;;  %v5783_v7 = vpop.f32.mrb[126].mxu1  ;;  %v7145_v34 = vcombine.high %v882_v6, %v886_v19 }
 0x426   : > { %v5211_v11 = vpop.f32.mrb[128].mxu0  ;;  %v5785_v31 = vpop.f32.mrb[127].mxu1  ;;  %5995 = vmatmul.mubr.bf16.gmra.mrb[232].mxu1 %v7136_v42 }
 0x427   : > { %v7542_v45 = vadd.f32 %v5211_v11, %v11309_v21  ;;  %v5213_v59 = vpop.f32.mrb[129].mxu0  ;;  %6002 = vmatprep.mubr.bf16.mxu1 %v7145_v34  ;;  %v7118_v31 = vcombine.low %v857_v57, %v861_v58  ;;  %v873_v57 = vld [vmem:[%s11142_s1 + $0xf90] sm:$0xff] }
 0x428   : > { %v5214_v50 = vpop.f32.mrb[130].mxu0  ;;  %v877_v58 = vld [vmem:[%s11142_s1 + $0xfb0] sm:$0xff] }
 0x429   : > { %v7544_v47 = vadd.f32 %v5214_v50, %v11310_v49  ;;  %v10450_v17 = vadd.f32 %v7542_v45, %v10374_v10  ;;  %v5216_v3 = vpop.f32.mrb[131].mxu0  ;;  %v5788_v21 = vpop.f32.mrb[128].mxu1  ;;  %v7127_v45 = vcombine.high %v865_v60, %v869_v27  ;;  %v11312_v50 = vld [vmem:[#allocation38_spill] sm:$0xff] }
 0x42a   : > { %v5790_v59 = vpop.f32.mrb[129].mxu1 }
 0x42b   : > { %v10453_v28 = vadd.f32 %v7544_v47, %v10380_v46  ;;  %5426 = vmatmul.mubr.bf16.gmra.mrb[236].mxu0 %v7110_v44  ;;  %v7144_v44 = vcombine.low %v882_v6, %v886_v19  ;;  %v5791_v49 = vpop.f32.mrb[130].mxu1 }
 0x42c   : > { %5433 = vmatprep.mubr.bf16.mxu0 %v7119_v18  ;;  %v5793_v47 = vpop.f32.mrb[131].mxu1 }
 0x42e   : > { %v5219_v10 = vpop.f32.mrb[132].mxu0  ;;  %6003 = vmatmul.mubr.bf16.gmra.mrb[236].mxu1 %v7144_v44 }
 0x42f   : > { %v7546_v40 = vadd.f32 %v5219_v10, %v11311_v33  ;;  %v5221_v11 = vpop.f32.mrb[133].mxu0  ;;  %v7126_v10 = vcombine.low %v865_v60, %v869_v27  ;;  %v881_v60 = vld [vmem:[%s11142_s1 + $0xfd0] sm:$0xff] }
 0x430   : > { %v5222_v46 = vpop.f32.mrb[134].mxu0  ;;  %v885_v27 = vld [vmem:[%s11142_s1 + $0xff0] sm:$0xff] }
 0x431   : > { %v7548_v18 = vadd.f32 %v5222_v46, %v11312_v50  ;;  %v10464_v54 = vadd.f32 %v7546_v40, %v10398_v15  ;;  %v5224_v42 = vpop.f32.mrb[135].mxu0  ;;  %v11313_v15 = vld [vmem:[#allocation39_spill] sm:$0xff]  ;;  %v10476_v33 = vpop.f32.mrb[132].mxu1  ;;  %v7135_v40 = vcombine.high %v873_v57, %v877_v58 }
 0x432   : > { %v5798_v11 = vpop.f32.mrb[133].mxu1 }
 0x433   : > { %v10467_v34 = vadd.f32 %v7548_v18, %v10404_v37  ;;  %5434 = vmatmul.mubr.bf16.gmra.mrb[240].mxu0 %v7118_v31  ;;  %v11314_v31 = vld [vmem:[#allocation40_spill] sm:$0xff]  ;;  %v10482_v44 = vpop.f32.mrb[134].mxu1 }
 0x434   : > { %5441 = vmatprep.mubr.bf16.mxu0 %v7127_v45  ;;  %v5801_v50 = vpop.f32.mrb[135].mxu1 }
 0x436   : > { %v5227_v6 = vpop.f32.mrb[136].mxu0 }
 0x437   : > { %v7550_v19 = vadd.f32 %v5227_v6, %v11313_v15  ;;  %v5229_v3 = vpop.f32.mrb[137].mxu0  ;;  %v7134_v15 = vcombine.low %v873_v57, %v877_v58  ;;  %v378_v57 = vld [vmem:[%s11142_s1 + $0x18] sm:$0xff] }
 0x438   : > { %v5230_v37 = vpop.f32.mrb[138].mxu0  ;;  %v382_v58 = vld [vmem:[%s11142_s1 + $0x38] sm:$0xff] }
 0x439   : > { %v7552_v46 = vadd.f32 %v5230_v37, %v11314_v31  ;;  %v10480_v45 = vadd.f32 %v7550_v19, %v10422_v63  ;;  %v5232_v59 = vpop.f32.mrb[139].mxu0  ;;  %v11316_v63 = vld [vmem:[#allocation41_spill] sm:$0xff]  ;;  %v10494_v19 = vpop.f32.mrb[136].mxu1 }
 0x43a   : > { %v5806_v37 = vpop.f32.mrb[137].mxu1 }
 0x43b   : > { %v10485_v18 = vadd.f32 %v7552_v46, %v10428_v62  ;;  %5442 = vmatmul.mubr.bf16.gmra.mrb[244].mxu0 %v7126_v10  ;;  %v7143_v62 = vcombine.high %v881_v60, %v885_v27  ;;  %v11317_v10 = vld [vmem:[#allocation42_spill] sm:$0xff]  ;;  %v10500_v46 = vpop.f32.mrb[138].mxu1 }
 0x43c   : > { %5449 = vmatprep.mubr.bf16.mxu0 %v7135_v40  ;;  %v5809_v59 = vpop.f32.mrb[139].mxu1 }
 0x43d   : > { %11315 = vst [vmem:[#allocation35_spill] sm:$0xff] %v10485_v18 }
 0x43e   : > { %v5235_v42 = vpop.f32.mrb[140].mxu0 }
 0x43f   : > { %v7554_v47 = vadd.f32 %v5235_v42, %v11316_v63  ;;  %v5237_v6 = vpop.f32.mrb[141].mxu0 }
 0x440   : > { %v5238_v3 = vpop.f32.mrb[142].mxu0 }
 0x441   : > { %v7556_v40 = vadd.f32 %v5238_v3, %v11317_v10  ;;  %v10498_v11 = vadd.f32 %v7554_v47, %v10446_v30  ;;  %v5240_v31 = vpop.f32.mrb[143].mxu0  ;;  %v7142_v47 = vcombine.low %v881_v60, %v885_v27  ;;  %v10511_v6 = vpop.f32.mrb[140].mxu1 }
 0x442   : > { %v5814_v37 = vpop.f32.mrb[141].mxu1 }
 0x443   : > { %11318 = vst [vmem:[#allocation36_spill] sm:$0xff] %v10498_v11  ;;  %v10502_v50 = vadd.f32 %v7556_v40, %v5783_v7  ;;  %5450 = vmatmul.mubr.bf16.gmra.mrb[248].mxu0 %v7134_v15  ;;  %v6641_v7 = vcombine.high %v378_v57, %v382_v58  ;;  %v11320_v15 = vld [vmem:[#allocation43_spill] sm:$0xff]  ;;  %v10514_v31 = vpop.f32.mrb[142].mxu1 }
 0x444   : > { %5457 = vmatprep.mubr.bf16.mxu0 %v7143_v62  ;;  %v5817_v59 = vpop.f32.mrb[143].mxu1 }
 0x445   : > { %11319 = vst [vmem:[#allocation37_spill] sm:$0xff] %v10502_v50  ;;  %v6019_v50 = vmul.f32 %v9779_v8, %v9779_v8 }
 0x446   : > { %v5243_v42 = vpop.f32.mrb[144].mxu0 }
 0x447   : > { %v7558_v30 = vadd.f32 %v5243_v42, %v9252_v41  ;;  %v5245_v63 = vpop.f32.mrb[145].mxu0  ;;  %v6020_v41 = vmul.f32 %v9783_v16, %v9783_v16  ;;  %v390_v42 = vld [vmem:[%s11142_s1 + $0x78] sm:$0xff] }
 0x448   : > { %v5246_v3 = vpop.f32.mrb[146].mxu0 }
 0x449   : > { %v7560_v62 = vadd.f32 %v5246_v3, %v11320_v15  ;;  %v7559_v10 = vadd.f32 %v7558_v30, %v5788_v21  ;;  %v5248_v40 = vpop.f32.mrb[147].mxu0  ;;  %v386_v21 = vld [vmem:[%s11142_s1 + $0x58] sm:$0xff]  ;;  %v10531_v3 = vpop.f32.mrb[144].mxu1 }
 0x44a   : > { %v6022_v40 = vmul.f32 %v9807_v9, %v9807_v9 }
 0x44b   : > { %v6083_v11 = vmul.f32 %v7559_v10, %v7559_v10  ;;  %v7561_v18 = vadd.f32 %v7560_v62, %v5791_v49  ;;  %5458 = vmatmul.mubr.bf16.gmra.mrb[252].mxu0 %v7142_v47  ;;  %v6640_v47 = vcombine.low %v378_v57, %v382_v58 }
 0x44c   : > { %5498 = vmatprep.mubr.bf16.mxu0 %v6641_v7 }
 0x44d   : > { %v10520_v60 = vadd.f32 %v6083_v11, %v6019_v50  ;;  %v6084_v27 = vmul.f32 %v7561_v18, %v7561_v18  ;;  %v6649_v11 = vcombine.high %v386_v21, %v390_v42  ;;  %v5822_v18 = vpop.f32.mrb[145].mxu1 }
 0x44e   : > { %v5251_v30 = vpop.f32.mrb[148].mxu0  ;;  %v10537_v62 = vpop.f32.mrb[146].mxu1  ;;  %v11353_v18 = vld [vmem:[#allocation97_spill] sm:$0xff] }
 0x44f   : > { %v10528_v8 = vadd.f32 %v6084_v27, %v6020_v41  ;;  %v7562_v49 = vadd.f32 %v5251_v30, %v9270_v12  ;;  %v5253_v63 = vpop.f32.mrb[149].mxu0  ;;  %v5825_v10 = vpop.f32.mrb[147].mxu1  ;;  %v6021_v12 = vmul.f32 %v9802_v0, %v9802_v0  ;;  %v398_v41 = vld [vmem:[%s11142_s1 + $0xb8] sm:$0xff] }
 0x450   : > { %v5254_v16 = vpop.f32.mrb[150].mxu0  ;;  %v6648_v63 = vcombine.low %v386_v21, %v390_v42 }
 0x451   : > { %v7564_v7 = vadd.f32 %v5254_v16, %v9272_v14  ;;  %v7563_v37 = vadd.f32 %v7562_v49, %v10476_v33  ;;  %v5256_v15 = vpop.f32.mrb[151].mxu0  ;;  %v394_v33 = vld [vmem:[%s11142_s1 + $0x98] sm:$0xff] }
 0x452   : > { %v6657_v16 = vcombine.high %v394_v33, %v398_v41 }
 0x453   : > { %v6085_v57 = vmul.f32 %v7563_v37, %v7563_v37  ;;  %v7565_v58 = vadd.f32 %v7564_v7, %v10482_v44  ;;  %5499 = vmatmul.mubr.bf16.vlgmr.msra.gmra.mrb[0].mxu0 %v6640_v47  ;;  %v11321_v44 = vld [vmem:[#allocation44_spill] sm:$0xff]  ;;  %v10555_v47 = vpop.f32.mrb[148].mxu1  ;;  %v11322_v7 = vld [vmem:[#allocation45_spill] sm:$0xff] }
 0x454   : > { %5506 = vmatprep.mubr.bf16.mxu0 %v6649_v11  ;;  %v5830_v11 = vpop.f32.mrb[149].mxu1 }
 0x455   : > { %v10544_v59 = vadd.f32 %v6085_v57, %v6021_v12  ;;  %v6086_v14 = vmul.f32 %v7565_v58, %v7565_v58  ;;  %v10561_v12 = vpop.f32.mrb[150].mxu1  ;;  %v6023_v58 = vmul.f32 %v9826_v26, %v9826_v26 }
 0x456   : > { %v5259_v0 = vpop.f32.mrb[152].mxu0  ;;  %v5833_v57 = vpop.f32.mrb[151].mxu1 }
 0x457   : > { %v10552_v27 = vadd.f32 %v6086_v14, %v6022_v40  ;;  %v7566_v30 = vadd.f32 %v5259_v0, %v11321_v44  ;;  %v5261_v49 = vpop.f32.mrb[153].mxu0  ;;  %v6024_v40 = vmul.f32 %v9831_v23, %v9831_v23  ;;  %v406_v44 = vld [vmem:[%s11142_s1 + $0xf8] sm:$0xff] }
 0x458   : > { %v5262_v9 = vpop.f32.mrb[154].mxu0 }
 0x459   : > { %v7568_v37 = vadd.f32 %v5262_v9, %v11322_v7  ;;  %v7567_v15 = vadd.f32 %v7566_v30, %v10494_v19  ;;  %v5264_v10 = vpop.f32.mrb[155].mxu0  ;;  %v402_v19 = vld [vmem:[%s11142_s1 + $0xd8] sm:$0xff]  ;;  %v6656_v9 = vcombine.low %v394_v33, %v398_v41 }
 0x45a   : > { %v6665_v11 = vcombine.high %v402_v19, %v406_v44 }
 0x45b   : > { %v6087_v21 = vmul.f32 %v7567_v15, %v7567_v15  ;;  %v7569_v42 = vadd.f32 %v7568_v37, %v10500_v46  ;;  %5507 = vmatmul.mubr.bf16.gmra.mrb[4].mxu0 %v6648_v63  ;;  %v11323_v46 = vld [vmem:[#allocation46_spill] sm:$0xff]  ;;  %v11324_v15 = vld [vmem:[#allocation47_spill] sm:$0xff] }
 0x45c   : > { %5514 = vmatprep.mubr.bf16.mxu0 %v6657_v16  ;;  %v10579_v16 = vpop.f32.mrb[152].mxu1 }
 0x45d   : > { %v10568_v14 = vadd.f32 %v6087_v21, %v6023_v58  ;;  %v6088_v0 = vmul.f32 %v7569_v42, %v7569_v42  ;;  %v5838_v7 = vpop.f32.mrb[153].mxu1 }
 0x45e   : > { %v5267_v26 = vpop.f32.mrb[156].mxu0  ;;  %v10585_v21 = vpop.f32.mrb[154].mxu1 }
 0x45f   : > { %v10576_v30 = vadd.f32 %v6088_v0, %v6024_v40  ;;  %v7570_v49 = vadd.f32 %v5267_v26, %v11323_v46  ;;  %v5269_v63 = vpop.f32.mrb[157].mxu0  ;;  %v5841_v42 = vpop.f32.mrb[155].mxu1  ;;  %v6025_v40 = vmul.f32 %v9850_v36, %v9850_v36  ;;  %v6026_v0 = vmul.f32 %v9855_v38, %v9855_v38 }
 0x460   : > { %v5270_v23 = vpop.f32.mrb[158].mxu0 }
 0x461   : > { %v7572_v10 = vadd.f32 %v5270_v23, %v11324_v15  ;;  %v7571_v57 = vadd.f32 %v7570_v49, %v10511_v6  ;;  %v5272_v58 = vpop.f32.mrb[159].mxu0  ;;  %v11325_v49 = vld [vmem:[#allocation48_spill] sm:$0xff]  ;;  %v6664_v15 = vcombine.low %v402_v19, %v406_v44  ;;  %v6028_v44 = vmul.f32 %v9879_v52, %v9879_v52 }
 0x462   : > { %v10597_v58 = vpop.f32.mrb[156].mxu1  ;;  %v6029_v52 = vmul.f32 %v9898_v53, %v9898_v53  ;;  %v11330_v53 = vld [vmem:[#allocation53_spill] sm:$0xff] }
 0x463   : > { %v6089_v33 = vmul.f32 %v7571_v57, %v7571_v57  ;;  %v7573_v41 = vadd.f32 %v7572_v10, %v10514_v31  ;;  %5515 = vmatmul.mubr.bf16.gmra.mrb[8].mxu0 %v6656_v9  ;;  %v5846_v57 = vpop.f32.mrb[157].mxu1  ;;  %v11326_v9 = vld [vmem:[#allocation49_spill] sm:$0xff] }
 0x464   : > { %5522 = vmatprep.mubr.bf16.mxu0 %v6665_v11  ;;  %v10603_v42 = vpop.f32.mrb[158].mxu1 }
 0x465   : > { %v10592_v26 = vadd.f32 %v6089_v33, %v6025_v40  ;;  %v6090_v46 = vmul.f32 %v7573_v41, %v7573_v41  ;;  %v5849_v40 = vpop.f32.mrb[159].mxu1  ;;  %v6027_v33 = vmul.f32 %v9874_v51, %v9874_v51 }
 0x466   : > { %v5275_v63 = vpop.f32.mrb[160].mxu0 }
 0x467   : > { %v10594_v6 = vadd.f32 %v6090_v46, %v6026_v0  ;;  %v7574_v23 = vadd.f32 %v5275_v63, %v11325_v49  ;;  %v5277_v7 = vpop.f32.mrb[161].mxu0 }
 0x468   : > { %v5278_v36 = vpop.f32.mrb[162].mxu0  ;;  %v11327_v7 = vld [vmem:[#allocation50_spill] sm:$0xff] }
 0x469   : > { %v7576_v11 = vadd.f32 %v5278_v36, %v11326_v9  ;;  %v7575_v38 = vadd.f32 %v7574_v23, %v10531_v3  ;;  %v5280_v10 = vpop.f32.mrb[163].mxu0  ;;  %v5852_v36 = vpop.f32.mrb[160].mxu1 }
 0x46a   : > { %v5854_v9 = vpop.f32.mrb[161].mxu1  ;;  %v11328_v10 = vld [vmem:[#allocation51_spill] sm:$0xff] }
 0x46b   : > { %v6091_v41 = vmul.f32 %v7575_v38, %v7575_v38  ;;  %v7577_v19 = vadd.f32 %v7576_v11, %v10537_v62  ;;  %5523 = vmatmul.mubr.bf16.gmra.mrb[12].mxu0 %v6664_v15  ;;  %v5855_v15 = vpop.f32.mrb[162].mxu1 }
 0x46c   : > { %v5857_v11 = vpop.f32.mrb[163].mxu1 }
 0x46d   : > { %v6155_v0 = vadd.f32 %v6091_v41, %v6027_v33  ;;  %v6092_v46 = vmul.f32 %v7577_v19, %v7577_v19  ;;  %v6030_v19 = vmul.f32 %v9903_v4, %v9903_v4 }
 0x46e   : > { %v5283_v63 = vpop.f32.mrb[164].mxu0 }
 0x46f   : > { %v6156_v49 = vadd.f32 %v6092_v46, %v6028_v44  ;;  %v7578_v3 = vadd.f32 %v5283_v63, %v11327_v7  ;;  %v5285_v23 = vpop.f32.mrb[165].mxu0 }
 0x470   : > { %v5286_v57 = vpop.f32.mrb[166].mxu0 }
 0x471   : > { %v7580_v40 = vadd.f32 %v5286_v57, %v11328_v10  ;;  %v7579_v51 = vadd.f32 %v7578_v3, %v10555_v47  ;;  %v5288_v38 = vpop.f32.mrb[167].mxu0  ;;  %v7326_v62 = vpack.c.bf16 %v6156_v49, %v6155_v0  ;;  %v11329_v47 = vld [vmem:[#allocation52_spill] sm:$0xff]  ;;  %v5860_v3 = vpop.f32.mrb[164].mxu1 }
 0x472   : > { %v5862_v57 = vpop.f32.mrb[165].mxu1  ;;  %v6031_v38 = vmul.f32 %v9922_v43, %v9922_v43 }
 0x473   : > { %v6093_v33 = vmul.f32 %v7579_v51, %v7579_v51  ;;  %v7581_v41 = vadd.f32 %v7580_v40, %v10561_v12  ;;  %7327 = vmatprep.subr.bf16.mxu1 %v7326_v62  ;;  %v5863_v40 = vpop.f32.mrb[166].mxu1  ;;  %v11332_v57 = vld [vmem:[#allocation55_spill] sm:$0xff] }
 0x474   : > { %v5865_v51 = vpop.f32.mrb[167].mxu1 }
 0x475   : > { %v10618_v44 = vadd.f32 %v6093_v33, %v6029_v52  ;;  %v6094_v46 = vmul.f32 %v7581_v41, %v7581_v41  ;;  %v6032_v52 = vmul.f32 %v9927_v20, %v9927_v20 }
 0x476   : > { %v5291_v63 = vpop.f32.mrb[168].mxu0 }
 0x477   : > { %v10620_v7 = vadd.f32 %v6094_v46, %v6030_v19  ;;  %v7582_v0 = vadd.f32 %v5291_v63, %v11329_v47  ;;  %v5293_v49 = vpop.f32.mrb[169].mxu0  ;;  %v11331_v46 = vld [vmem:[#allocation54_spill] sm:$0xff] }
 0x478   : > { %v5294_v23 = vpop.f32.mrb[170].mxu0 }
 0x479   : > { %v7584_v9 = vadd.f32 %v5294_v23, %v11330_v53  ;;  %v7583_v12 = vadd.f32 %v7582_v0, %v10579_v16  ;;  %v5296_v10 = vpop.f32.mrb[171].mxu0  ;;  %v5868_v0 = vpop.f32.mrb[168].mxu1 }
 0x47a   : > { %v5870_v23 = vpop.f32.mrb[169].mxu1  ;;  %v6033_v10 = vmul.f32 %v9946_v32, %v9946_v32 }
 0x47b   : > { %v6095_v62 = vmul.f32 %v7583_v12, %v7583_v12  ;;  %v7585_v11 = vadd.f32 %v7584_v9, %v10585_v21  ;;  %v5871_v9 = vpop.f32.mrb[170].mxu1 }
 0x47c   : > { %v5873_v12 = vpop.f32.mrb[171].mxu1 }
 0x47d   : > { %v10632_v33 = vadd.f32 %v6095_v62, %v6031_v38  ;;  %v6096_v41 = vmul.f32 %v7585_v11, %v7585_v11  ;;  %v6034_v62 = vmul.f32 %v9951_v39, %v9951_v39  ;;  %v6035_v12 = vmul.f32 %v9970_v22, %v9970_v22 }
 0x47e   : > { %v5299_v19 = vpop.f32.mrb[172].mxu0 }
 0x47f   : > { %v10634_v16 = vadd.f32 %v6096_v41, %v6032_v52  ;;  %v7586_v63 = vadd.f32 %v5299_v19, %v11331_v46  ;;  %v5301_v47 = vpop.f32.mrb[173].mxu0  ;;  %v11333_v19 = vld [vmem:[#allocation56_spill] sm:$0xff] }
 0x480   : > { %v5302_v49 = vpop.f32.mrb[174].mxu0 }
 0x481   : > { %v7588_v43 = vadd.f32 %v5302_v49, %v11332_v57  ;;  %v7587_v53 = vadd.f32 %v7586_v63, %v10597_v58  ;;  %v5304_v21 = vpop.f32.mrb[175].mxu0  ;;  %v5876_v47 = vpop.f32.mrb[172].mxu1  ;;  %v11334_v57 = vld [vmem:[#allocation57_spill] sm:$0xff] }
 0x482   : > { %v5878_v23 = vpop.f32.mrb[173].mxu1 }
 0x483   : > { %v6097_v51 = vmul.f32 %v7587_v53, %v7587_v53  ;;  %v7589_v38 = vadd.f32 %v7588_v43, %v10603_v42  ;;  %v5879_v42 = vpop.f32.mrb[174].mxu1 }
 0x484   : > { %v5881_v43 = vpop.f32.mrb[175].mxu1 }
 0x485   : > { %v10646_v11 = vadd.f32 %v6097_v51, %v6033_v10  ;;  %v6098_v52 = vmul.f32 %v7589_v38, %v7589_v38  ;;  %v6036_v38 = vmul.f32 %v9975_v56, %v9975_v56 }
 0x486   : > { %v5307_v41 = vpop.f32.mrb[176].mxu0 }
 0x487   : > { %v10648_v58 = vadd.f32 %v6098_v52, %v6034_v62  ;;  %v7590_v46 = vadd.f32 %v5307_v41, %v11333_v19  ;;  %v5309_v63 = vpop.f32.mrb[177].mxu0 }
 0x488   : > { %v5310_v49 = vpop.f32.mrb[178].mxu0 }
 0x489   : > { %v7592_v32 = vadd.f32 %v5310_v49, %v11334_v57  ;;  %v7591_v53 = vadd.f32 %v7590_v46, %v5852_v36  ;;  %v5312_v21 = vpop.f32.mrb[179].mxu0  ;;  %v11335_v36 = vld [vmem:[#allocation58_spill] sm:$0xff]  ;;  %v5884_v49 = vpop.f32.mrb[176].mxu1 }
 0x48a   : > { %v5886_v57 = vpop.f32.mrb[177].mxu1  ;;  %v11336_v21 = vld [vmem:[#allocation59_spill] sm:$0xff] }
 0x48b   : > { %v6099_v10 = vmul.f32 %v7591_v53, %v7591_v53  ;;  %v7593_v51 = vadd.f32 %v7592_v32, %v5855_v15  ;;  %v5887_v15 = vpop.f32.mrb[178].mxu1 }
 0x48c   : > { %v5889_v32 = vpop.f32.mrb[179].mxu1 }
 0x48d   : > { %v10658_v62 = vadd.f32 %v6099_v10, %v6035_v12  ;;  %v6100_v52 = vmul.f32 %v7593_v51, %v7593_v51  ;;  %v6037_v12 = vmul.f32 %v9994_v5, %v9994_v5  ;;  %v11338_v32 = vld [vmem:[#allocation61_spill] sm:$0xff] }
 0x48e   : > { %v5315_v41 = vpop.f32.mrb[180].mxu0 }
 0x48f   : > { %v10660_v19 = vadd.f32 %v6100_v52, %v6036_v38  ;;  %v7594_v46 = vadd.f32 %v5315_v41, %v11335_v36  ;;  %v5317_v63 = vpop.f32.mrb[181].mxu0  ;;  %v6038_v38 = vmul.f32 %v9999_v13, %v9999_v13 }
 0x490   : > { %v5318_v23 = vpop.f32.mrb[182].mxu0 }
 0x491   : > { %v7596_v43 = vadd.f32 %v5318_v23, %v11336_v21  ;;  %v7595_v22 = vadd.f32 %v7594_v46, %v5860_v3  ;;  %v5320_v53 = vpop.f32.mrb[183].mxu0  ;;  %v11337_v3 = vld [vmem:[#allocation60_spill] sm:$0xff]  ;;  %v5892_v57 = vpop.f32.mrb[180].mxu1 }
 0x492   : > { %v5894_v53 = vpop.f32.mrb[181].mxu1 }
 0x493   : > { %v6101_v10 = vmul.f32 %v7595_v22, %v7595_v22  ;;  %v7597_v51 = vadd.f32 %v7596_v43, %v5863_v40  ;;  %v5895_v40 = vpop.f32.mrb[182].mxu1 }
 0x494   : > { %v5897_v43 = vpop.f32.mrb[183].mxu1 }
 0x495   : > { %v10670_v52 = vadd.f32 %v6101_v10, %v6037_v12  ;;  %v6102_v41 = vmul.f32 %v7597_v51, %v7597_v51  ;;  %v6039_v12 = vmul.f32 %v10018_v29, %v10018_v29  ;;  %v11340_v43 = vld [vmem:[#allocation63_spill] sm:$0xff] }
 0x496   : > { %v5323_v36 = vpop.f32.mrb[184].mxu0 }
 0x497   : > { %v10672_v63 = vadd.f32 %v6102_v41, %v6038_v38  ;;  %v7598_v46 = vadd.f32 %v5323_v36, %v11337_v3  ;;  %v5325_v23 = vpop.f32.mrb[185].mxu0  ;;  %v6040_v38 = vmul.f32 %v10023_v35, %v10023_v35 }
 0x498   : > { %v5326_v21 = vpop.f32.mrb[186].mxu0 }
 0x499   : > { %v7600_v31 = vadd.f32 %v5326_v21, %v11338_v32  ;;  %v7599_v5 = vadd.f32 %v7598_v46, %v5868_v0  ;;  %v5328_v22 = vpop.f32.mrb[187].mxu0  ;;  %v11339_v0 = vld [vmem:[#allocation62_spill] sm:$0xff]  ;;  %v5900_v53 = vpop.f32.mrb[184].mxu1 }
 0x49a   : > { %v5902_v22 = vpop.f32.mrb[185].mxu1 }
 0x49b   : > { %v6103_v10 = vmul.f32 %v7599_v5, %v7599_v5  ;;  %v7601_v51 = vadd.f32 %v7600_v31, %v5871_v9  ;;  %v5903_v31 = vpop.f32.mrb[186].mxu1 }
 0x49c   : > { %v5905_v9 = vpop.f32.mrb[187].mxu1 }
 0x49d   : > { %v10682_v41 = vadd.f32 %v6103_v10, %v6039_v12  ;;  %v6104_v36 = vmul.f32 %v7601_v51, %v7601_v51  ;;  %v6041_v12 = vmul.f32 %v10042_v2, %v10042_v2  ;;  %v11342_v9 = vld [vmem:[#allocation65_spill] sm:$0xff] }
 0x49e   : > { %v5331_v3 = vpop.f32.mrb[188].mxu0 }
 0x49f   : > { %v10684_v23 = vadd.f32 %v6104_v36, %v6040_v38  ;;  %v7602_v46 = vadd.f32 %v5331_v3, %v11339_v0  ;;  %v5333_v21 = vpop.f32.mrb[189].mxu0  ;;  %v6042_v38 = vmul.f32 %v10047_v61, %v10047_v61 }
 0x4a0   : > { %v5334_v32 = vpop.f32.mrb[190].mxu0 }
 0x4a1   : > { %v7604_v37 = vadd.f32 %v5334_v32, %v11340_v43  ;;  %v7603_v29 = vadd.f32 %v7602_v46, %v5876_v47  ;;  %v5336_v5 = vpop.f32.mrb[191].mxu0  ;;  %v11341_v47 = vld [vmem:[#allocation64_spill] sm:$0xff]  ;;  %v5908_v22 = vpop.f32.mrb[188].mxu1 }
 0x4a2   : > { %v5910_v5 = vpop.f32.mrb[189].mxu1 }
 0x4a3   : > { %v6105_v10 = vmul.f32 %v7603_v29, %v7603_v29  ;;  %v7605_v51 = vadd.f32 %v7604_v37, %v5879_v42  ;;  %v5911_v37 = vpop.f32.mrb[190].mxu1 }
 0x4a4   : > { %v5913_v42 = vpop.f32.mrb[191].mxu1 }
 0x4a5   : > { %v10694_v36 = vadd.f32 %v6105_v10, %v6041_v12  ;;  %v6106_v3 = vmul.f32 %v7605_v51, %v7605_v51  ;;  %v6043_v12 = vmul.f32 %v10066_v48, %v10066_v48  ;;  %v11345_v48 = vld [vmem:[#allocation68_spill] sm:$0xff] }
 0x4a6   : > { %v5339_v0 = vpop.f32.mrb[192].mxu0 }
 0x4a7   : > { %v10696_v21 = vadd.f32 %v6106_v3, %v6042_v38  ;;  %v7606_v46 = vadd.f32 %v5339_v0, %v11341_v47  ;;  %v5341_v32 = vpop.f32.mrb[193].mxu0  ;;  %v6044_v38 = vmul.f32 %v10071_v25, %v10071_v25 }
 0x4a8   : > { %v5342_v43 = vpop.f32.mrb[194].mxu0 }
 0x4a9   : > { %v7608_v35 = vadd.f32 %v5342_v43, %v11342_v9  ;;  %v7607_v2 = vadd.f32 %v7606_v46, %v5884_v49  ;;  %v5344_v29 = vpop.f32.mrb[195].mxu0  ;;  %v11343_v49 = vld [vmem:[#allocation66_spill] sm:$0xff]  ;;  %v5916_v5 = vpop.f32.mrb[192].mxu1 }
 0x4aa   : > { %v5918_v29 = vpop.f32.mrb[193].mxu1 }
 0x4ab   : > { %v6107_v10 = vmul.f32 %v7607_v2, %v7607_v2  ;;  %v7609_v51 = vadd.f32 %v7608_v35, %v5887_v15  ;;  %v11344_v2 = vld [vmem:[#allocation67_spill] sm:$0xff]  ;;  %v5919_v25 = vpop.f32.mrb[194].mxu1 }
 0x4ad   : > { %v10706_v3 = vadd.f32 %v6107_v10, %v6043_v12  ;;  %v6108_v0 = vmul.f32 %v7609_v51, %v7609_v51  ;;  %v5921_v12 = vpop.f32.mrb[195].mxu1  ;;  %v6045_v10 = vmul.f32 %v10090_v24, %v10090_v24  ;;  %v11350_v24 = vld [vmem:[#allocation70_spill] sm:$0xff] }
 0x4ae   : > { %v5347_v47 = vpop.f32.mrb[196].mxu0 }
 0x4af   : > { %v10708_v32 = vadd.f32 %v6108_v0, %v6044_v38  ;;  %v7610_v46 = vadd.f32 %v5347_v47, %v11343_v49  ;;  %v5349_v43 = vpop.f32.mrb[197].mxu0  ;;  %v6046_v0 = vmul.f32 %v10095_v55, %v10095_v55 }
 0x4b0   : > { %v5350_v9 = vpop.f32.mrb[198].mxu0 }
 0x4b1   : > { %v7612_v15 = vadd.f32 %v5350_v9, %v11344_v2  ;;  %v7611_v35 = vadd.f32 %v7610_v46, %v5892_v57  ;;  %v5352_v42 = vpop.f32.mrb[199].mxu0  ;;  %v5924_v46 = vpop.f32.mrb[196].mxu1 }
 0x4b2   : > { %v5926_v42 = vpop.f32.mrb[197].mxu1 }
 0x4b3   : > { %v6109_v51 = vmul.f32 %v7611_v35, %v7611_v35  ;;  %v7613_v38 = vadd.f32 %v7612_v15, %v5895_v40  ;;  %v11346_v35 = vld [vmem:[#allocation69_spill] sm:$0xff]  ;;  %v5927_v55 = vpop.f32.mrb[198].mxu1 }
 0x4b5   : > { %v10718_v47 = vadd.f32 %v6109_v51, %v6045_v10  ;;  %v6110_v49 = vmul.f32 %v7613_v38, %v7613_v38  ;;  %v5929_v10 = vpop.f32.mrb[199].mxu1  ;;  %v6047_v51 = vmul.f32 %v10114_v1, %v10114_v1  ;;  %v11356_v1 = vld [vmem:[#allocation72_spill] sm:$0xff] }
 0x4b6   : > { %v5355_v43 = vpop.f32.mrb[200].mxu0 }
 0x4b7   : > { %v10720_v29 = vadd.f32 %v6110_v49, %v6046_v0  ;;  %v7614_v9 = vadd.f32 %v5355_v43, %v11345_v48  ;;  %v5357_v57 = vpop.f32.mrb[201].mxu0  ;;  %v11347_v49 = vld [vmem:[#allocation96_spill] sm:$0xff] }
 0x4b8   : > { %v5358_v2 = vpop.f32.mrb[202].mxu0  ;;  %v6048_v48 = vmul.f32 %v11347_v49, %v11347_v49 }
 0x4b9   : > { %v7616_v40 = vadd.f32 %v5358_v2, %v11346_v35  ;;  %v7615_v15 = vadd.f32 %v7614_v9, %v5900_v53  ;;  %v5360_v12 = vpop.f32.mrb[203].mxu0  ;;  %v5932_v9 = vpop.f32.mrb[200].mxu1 }
 0x4ba   : > { %v5934_v12 = vpop.f32.mrb[201].mxu1 }
 0x4bb   : > { %v6111_v38 = vmul.f32 %v7615_v15, %v7615_v15  ;;  %v7617_v0 = vadd.f32 %v7616_v40, %v5903_v31  ;;  %v11351_v15 = vld [vmem:[#allocation71_spill] sm:$0xff]  ;;  %v5935_v49 = vpop.f32.mrb[202].mxu1 }
 0x4bd   : > { %v10730_v43 = vadd.f32 %v6111_v38, %v6047_v51  ;;  %v6112_v57 = vmul.f32 %v7617_v0, %v7617_v0  ;;  %v5937_v51 = vpop.f32.mrb[203].mxu1  ;;  %v11352_v38 = vld [vmem:[#allocation10_spill] sm:$0xff] }
 0x4be   : > { %v5363_v42 = vpop.f32.mrb[204].mxu0  ;;  %v6049_v0 = vmul.f32 %v11352_v38, %v11352_v38 }
 0x4bf   : > { %11348 = vst [vmem:[#allocation38_spill] sm:$0xff] %v10730_v43  ;;  %v10732_v61 = vadd.f32 %v6112_v57, %v6048_v48  ;;  %v7618_v2 = vadd.f32 %v5363_v42, %v11350_v24  ;;  %v5365_v53 = vpop.f32.mrb[205].mxu0  ;;  %v6050_v24 = vmul.f32 %v11353_v18, %v11353_v18  ;;  %v11399_v43 = vld [vmem:[#allocation89_spill] sm:$0xff] }
 0x4c0   : > { %v5366_v35 = vpop.f32.mrb[206].mxu0 }
 0x4c1   : > { %11349 = vst [vmem:[#allocation39_spill] sm:$0xff] %v10732_v61  ;;  %v7620_v31 = vadd.f32 %v5366_v35, %v11351_v15  ;;  %v7619_v40 = vadd.f32 %v7618_v2, %v5908_v22  ;;  %v5368_v10 = vpop.f32.mrb[207].mxu0  ;;  %v10747_v2 = vpop.f32.mrb[204].mxu1 }
 0x4c2   : > { %v5942_v10 = vpop.f32.mrb[205].mxu1 }
 0x4c3   : > { %v6113_v48 = vmul.f32 %v7619_v40, %v7619_v40  ;;  %v7621_v57 = vadd.f32 %v7620_v31, %v5911_v37  ;;  %v11357_v37 = vld [vmem:[#allocation73_spill] sm:$0xff]  ;;  %v10752_v38 = vpop.f32.mrb[206].mxu1 }
 0x4c5   : > { %v10742_v42 = vadd.f32 %v6113_v48, %v6049_v0  ;;  %v6114_v53 = vmul.f32 %v7621_v57, %v7621_v57  ;;  %v5945_v0 = vpop.f32.mrb[207].mxu1  ;;  %v11358_v48 = vld [vmem:[#allocation11_spill] sm:$0xff] }
 0x4c6   : > { %v5371_v12 = vpop.f32.mrb[208].mxu0  ;;  %v6051_v57 = vmul.f32 %v11358_v48, %v11358_v48 }
 0x4c7   : > { %11354 = vst [vmem:[#allocation40_spill] sm:$0xff] %v10742_v42  ;;  %v10744_v13 = vadd.f32 %v6114_v53, %v6050_v24  ;;  %v7622_v35 = vadd.f32 %v5371_v12, %v11356_v1  ;;  %v5373_v22 = vpop.f32.mrb[209].mxu0  ;;  %v11359_v53 = vld [vmem:[#allocation12_spill] sm:$0xff]  ;;  %v11393_v42 = vld [vmem:[#allocation87_spill] sm:$0xff] }
 0x4c8   : > { %v5374_v15 = vpop.f32.mrb[210].mxu0  ;;  %v6052_v12 = vmul.f32 %v11359_v53, %v11359_v53 }
 0x4c9   : > { %11355 = vst [vmem:[#allocation41_spill] sm:$0xff] %v10744_v13  ;;  %v7624_v31 = vadd.f32 %v5374_v15, %v11357_v37  ;;  %v7623_v51 = vadd.f32 %v7622_v35, %v5916_v5  ;;  %v5376_v18 = vpop.f32.mrb[211].mxu0  ;;  %v11362_v15 = vld [vmem:[#allocation74_spill] sm:$0xff]  ;;  %v10763_v37 = vpop.f32.mrb[208].mxu1 }
 0x4ca   : > { %v5950_v0 = vpop.f32.mrb[209].mxu1 }
 0x4cb   : > { %v6115_v24 = vmul.f32 %v7623_v51, %v7623_v51  ;;  %v7625_v1 = vadd.f32 %v7624_v31, %v5919_v25  ;;  %v11363_v25 = vld [vmem:[#allocation75_spill] sm:$0xff] }
 0x4cd   : > { %v10758_v22 = vadd.f32 %v6115_v24, %v6051_v57  ;;  %v6116_v10 = vmul.f32 %v7625_v1, %v7625_v1  ;;  %v10768_v57 = vpop.f32.mrb[210].mxu1  ;;  %v11364_v1 = vld [vmem:[#allocation13_spill] sm:$0xff] }
 0x4ce   : > { %v5379_v50 = vpop.f32.mrb[212].mxu0  ;;  %v5953_v24 = vpop.f32.mrb[211].mxu1 }
 0x4cf   : > { %11360 = vst [vmem:[#allocation42_spill] sm:$0xff] %v10758_v22  ;;  %v10760_v40 = vadd.f32 %v6116_v10, %v6052_v12  ;;  %v7626_v5 = vadd.f32 %v5379_v50, %v11362_v15  ;;  %v5381_v35 = vpop.f32.mrb[213].mxu0  ;;  %v6053_v12 = vmul.f32 %v11364_v1, %v11364_v1  ;;  %v11365_v15 = vld [vmem:[#allocation14_spill] sm:$0xff]  ;;  %v11389_v22 = vld [vmem:[#allocation85_spill] sm:$0xff] }
 0x4d0   : > { %v5382_v18 = vpop.f32.mrb[214].mxu0  ;;  %v6054_v35 = vmul.f32 %v11365_v15, %v11365_v15 }
 0x4d1   : > { %11361 = vst [vmem:[#allocation43_spill] sm:$0xff] %v10760_v40  ;;  %v7628_v31 = vadd.f32 %v5382_v18, %v11363_v25  ;;  %v7627_v48 = vadd.f32 %v7626_v5, %v5924_v46  ;;  %v5384_v53 = vpop.f32.mrb[215].mxu0  ;;  %v11368_v18 = vld [vmem:[#allocation76_spill] sm:$0xff]  ;;  %v10779_v25 = vpop.f32.mrb[212].mxu1 }
 0x4d2   : > { %v5958_v24 = vpop.f32.mrb[213].mxu1 }
 0x4d3   : > { %v6117_v10 = vmul.f32 %v7627_v48, %v7627_v48  ;;  %v7629_v50 = vadd.f32 %v7628_v31, %v5927_v55  ;;  %v11369_v55 = vld [vmem:[#allocation77_spill] sm:$0xff] }
 0x4d5   : > { %v10774_v56 = vadd.f32 %v6117_v10, %v6053_v12  ;;  %v6118_v0 = vmul.f32 %v7629_v50, %v7629_v50  ;;  %v10784_v12 = vpop.f32.mrb[214].mxu1  ;;  %v6204_v50 = vld [vmem:[%s11143_s2 + $0x8] sm:$0xff] }
 0x4d6   : > { %v5387_v39 = vpop.f32.mrb[216].mxu0  ;;  %v5961_v10 = vpop.f32.mrb[215].mxu1  ;;  %6299 = vmatprep.mubr.f32.mxu1 %v6204_v50 }
 0x4d7   : > { %11366 = vst [vmem:[#allocation44_spill] sm:$0xff] %v10774_v56  ;;  %v10776_v51 = vadd.f32 %v6118_v0, %v6054_v35  ;;  %v7630_v46 = vadd.f32 %v5387_v39, %v11368_v18  ;;  %v5389_v5 = vpop.f32.mrb[217].mxu0  ;;  %v11370_v39 = vld [vmem:[#allocation15_spill] sm:$0xff] }
 0x4d8   : > { %v5390_v53 = vpop.f32.mrb[218].mxu0  ;;  %v6055_v35 = vmul.f32 %v11370_v39, %v11370_v39  ;;  %v11371_v5 = vld [vmem:[#allocation16_spill] sm:$0xff] }
 0x4d9   : > { %11367 = vst [vmem:[#allocation45_spill] sm:$0xff] %v10776_v51  ;;  %v7632_v31 = vadd.f32 %v5390_v53, %v11369_v55  ;;  %v7631_v1 = vadd.f32 %v7630_v46, %v5932_v9  ;;  %v5392_v15 = vpop.f32.mrb[219].mxu0  ;;  %v6056_v24 = vmul.f32 %v11371_v5, %v11371_v5  ;;  %v11374_v55 = vld [vmem:[#allocation78_spill] sm:$0xff]  ;;  %v5964_v20 = vpop.f32.mrb[216].mxu1 }
 0x4da   : > { %v5966_v56 = vpop.f32.mrb[217].mxu1 }
 0x4db   : > { %v6119_v0 = vmul.f32 %v7631_v1, %v7631_v1  ;;  %v7633_v18 = vadd.f32 %v7632_v31, %v5935_v49  ;;  %v11375_v49 = vld [vmem:[#allocation79_spill] sm:$0xff] }
 0x4dd   : > { %v10793_v48 = vadd.f32 %v6119_v0, %v6055_v35  ;;  %v6120_v9 = vmul.f32 %v7633_v18, %v7633_v18  ;;  %v5967_v35 = vpop.f32.mrb[218].mxu1  ;;  %v11376_v18 = vld [vmem:[#allocation17_spill] sm:$0xff] }
 0x4de   : > { %v5395_v46 = vpop.f32.mrb[220].mxu0  ;;  %v5969_v0 = vpop.f32.mrb[219].mxu1  ;;  %v6057_v5 = vmul.f32 %v11376_v18, %v11376_v18  ;;  %v11381_v18 = vld [vmem:[#allocation81_spill] sm:$0xff] }
 0x4df   : > { %11372 = vst [vmem:[#allocation46_spill] sm:$0xff] %v10793_v48  ;;  %v10795_v53 = vadd.f32 %v6120_v9, %v6056_v24  ;;  %v7634_v15 = vadd.f32 %v5395_v46, %v11374_v55  ;;  %v5397_v10 = vpop.f32.mrb[221].mxu0  ;;  %v11377_v46 = vld [vmem:[#allocation18_spill] sm:$0xff] }
 0x4e0   : > { %v5398_v4 = vpop.f32.mrb[222].mxu0  ;;  %v6058_v55 = vmul.f32 %v11377_v46, %v11377_v46 }
 0x4e1   : > { %11373 = vst [vmem:[#allocation47_spill] sm:$0xff] %v10795_v53  ;;  %v7636_v31 = vadd.f32 %v5398_v4, %v11375_v49  ;;  %v7635_v50 = vadd.f32 %v7634_v15, %v10747_v2  ;;  %v5400_v39 = vpop.f32.mrb[223].mxu0  ;;  %v11380_v4 = vld [vmem:[#allocation80_spill] sm:$0xff]  ;;  %v5972_v49 = vpop.f32.mrb[220].mxu1 }
 0x4e2   : > { %v5974_v0 = vpop.f32.mrb[221].mxu1 }
 0x4e3   : > { %v6121_v24 = vmul.f32 %v7635_v50, %v7635_v50  ;;  %v7637_v9 = vadd.f32 %v7636_v31, %v10752_v38 }
 0x4e5   : > { %v10807_v56 = vadd.f32 %v6121_v24, %v6057_v5  ;;  %v6122_v10 = vmul.f32 %v7637_v9, %v7637_v9  ;;  %v5975_v5 = vpop.f32.mrb[222].mxu1  ;;  %v11382_v9 = vld [vmem:[#allocation19_spill] sm:$0xff] }
 0x4e6   : > { %v5403_v1 = vpop.f32.mrb[224].mxu0  ;;  %v5977_v24 = vpop.f32.mrb[223].mxu1 }
 0x4e7   : > { %11378 = vst [vmem:[#allocation48_spill] sm:$0xff] %v10807_v56  ;;  %v10809_v48 = vadd.f32 %v6122_v10, %v6058_v55  ;;  %v7638_v2 = vadd.f32 %v5403_v1, %v11380_v4  ;;  %v5405_v15 = vpop.f32.mrb[225].mxu0  ;;  %v6059_v55 = vmul.f32 %v11382_v9, %v11382_v9  ;;  %v11383_v4 = vld [vmem:[#allocation20_spill] sm:$0xff] }
 0x4e8   : > { %v5406_v39 = vpop.f32.mrb[226].mxu0  ;;  %v6060_v15 = vmul.f32 %v11383_v4, %v11383_v4 }
 0x4e9   : > { %11379 = vst [vmem:[#allocation49_spill] sm:$0xff] %v10809_v48  ;;  %v7640_v38 = vadd.f32 %v5406_v39, %v11381_v18  ;;  %v7639_v31 = vadd.f32 %v7638_v2, %v10763_v37  ;;  %v5408_v46 = vpop.f32.mrb[227].mxu0  ;;  %v11384_v39 = vld [vmem:[#allocation82_spill] sm:$0xff]  ;;  %v5980_v18 = vpop.f32.mrb[224].mxu1  ;;  %v11385_v48 = vld [vmem:[#allocation83_spill] sm:$0xff] }
 0x4ea   : > { %v5982_v24 = vpop.f32.mrb[225].mxu1 }
 0x4eb   : > { %v6123_v10 = vmul.f32 %v7639_v31, %v7639_v31  ;;  %v7641_v1 = vadd.f32 %v7640_v38, %v10768_v57  ;;  %v5983_v38 = vpop.f32.mrb[226].mxu1 }
 0x4ed   : > { %v10821_v0 = vadd.f32 %v6123_v10, %v6059_v55  ;;  %v6124_v53 = vmul.f32 %v7641_v1, %v7641_v1  ;;  %v5985_v10 = vpop.f32.mrb[227].mxu1  ;;  %v11386_v1 = vld [vmem:[#allocation21_spill] sm:$0xff] }
 0x4ee   : > { %v5411_v50 = vpop.f32.mrb[228].mxu0 }
 0x4ef   : > { %v10823_v56 = vadd.f32 %v6124_v53, %v6060_v15  ;;  %v7642_v37 = vadd.f32 %v5411_v50, %v11384_v39  ;;  %v5413_v2 = vpop.f32.mrb[229].mxu0  ;;  %v6061_v53 = vmul.f32 %v11386_v1, %v11386_v1  ;;  %v11387_v15 = vld [vmem:[#allocation22_spill] sm:$0xff] }
 0x4f0   : > { %v5414_v46 = vpop.f32.mrb[230].mxu0  ;;  %v6062_v39 = vmul.f32 %v11387_v15, %v11387_v15 }
 0x4f1   : > { %v7644_v9 = vadd.f32 %v5414_v46, %v11385_v48  ;;  %v7643_v31 = vadd.f32 %v7642_v37, %v10779_v25  ;;  %v5416_v57 = vpop.f32.mrb[231].mxu0  ;;  %v11388_v37 = vld [vmem:[#allocation84_spill] sm:$0xff]  ;;  %v5988_v55 = vpop.f32.mrb[228].mxu1 }
 0x4f2   : > { %v5990_v51 = vpop.f32.mrb[229].mxu1 }
 0x4f3   : > { %v6125_v4 = vmul.f32 %v7643_v31, %v7643_v31  ;;  %v7645_v50 = vadd.f32 %v7644_v9, %v10784_v12  ;;  %v5991_v12 = vpop.f32.mrb[230].mxu1 }
 0x4f5   : > { %v10835_v2 = vadd.f32 %v6125_v4, %v6061_v53  ;;  %v6126_v48 = vmul.f32 %v7645_v50, %v7645_v50  ;;  %v5993_v53 = vpop.f32.mrb[231].mxu1  ;;  %v11390_v4 = vld [vmem:[#allocation23_spill] sm:$0xff] }
 0x4f6   : > { %v5419_v46 = vpop.f32.mrb[232].mxu0  ;;  %v6063_v50 = vmul.f32 %v11390_v4, %v11390_v4 }
 0x4f7   : > { %v10837_v25 = vadd.f32 %v6126_v48, %v6062_v39  ;;  %v7646_v24 = vadd.f32 %v5419_v46, %v11388_v37  ;;  %v5421_v57 = vpop.f32.mrb[233].mxu0  ;;  %v11391_v48 = vld [vmem:[#allocation24_spill] sm:$0xff] }
 0x4f8   : > { %v5422_v10 = vpop.f32.mrb[234].mxu0  ;;  %v6064_v46 = vmul.f32 %v11391_v48, %v11391_v48 }
 0x4f9   : > { %v7648_v1 = vadd.f32 %v5422_v10, %v11389_v22  ;;  %v7647_v31 = vadd.f32 %v7646_v24, %v5964_v20  ;;  %v5424_v40 = vpop.f32.mrb[235].mxu0  ;;  %v11392_v20 = vld [vmem:[#allocation86_spill] sm:$0xff]  ;;  %v5996_v10 = vpop.f32.mrb[232].mxu1 }
 0x4fa   : > { %v5998_v53 = vpop.f32.mrb[233].mxu1 }
 0x4fb   : > { %v6127_v15 = vmul.f32 %v7647_v31, %v7647_v31  ;;  %v7649_v39 = vadd.f32 %v7648_v1, %v5967_v35  ;;  %v5999_v35 = vpop.f32.mrb[234].mxu1 }
 0x4fd   : > { %v10847_v37 = vadd.f32 %v6127_v15, %v6063_v50  ;;  %v6128_v51 = vmul.f32 %v7649_v39, %v7649_v39  ;;  %v6001_v50 = vpop.f32.mrb[235].mxu1  ;;  %v11394_v15 = vld [vmem:[#allocation25_spill] sm:$0xff] }
 0x4fe   : > { %v5427_v57 = vpop.f32.mrb[236].mxu0  ;;  %v6065_v39 = vmul.f32 %v11394_v15, %v11394_v15 }
 0x4ff   : > { %v10849_v22 = vadd.f32 %v6128_v51, %v6064_v46  ;;  %v7650_v40 = vadd.f32 %v5427_v57, %v11392_v20  ;;  %v5429_v24 = vpop.f32.mrb[237].mxu0  ;;  %v11395_v51 = vld [vmem:[#allocation26_spill] sm:$0xff] }
 0x500   : > { %v5430_v9 = vpop.f32.mrb[238].mxu0  ;;  %v6066_v57 = vmul.f32 %v11395_v51, %v11395_v51 }
 0x501   : > { %v7652_v13 = vadd.f32 %v5430_v9, %v11393_v42  ;;  %v7651_v4 = vadd.f32 %v7650_v40, %v5972_v49  ;;  %v5432_v31 = vpop.f32.mrb[239].mxu0  ;;  %v11398_v49 = vld [vmem:[#allocation88_spill] sm:$0xff] }
 0x502   : > { %v6004_v31 = vpop.f32.mrb[236].mxu1 }
 0x503   : > { %v6129_v48 = vmul.f32 %v7651_v4, %v7651_v4  ;;  %v7653_v46 = vadd.f32 %v7652_v13, %v5975_v5  ;;  %v6006_v50 = vpop.f32.mrb[237].mxu1  ;;  %v11403_v5 = vld [vmem:[#allocation91_spill] sm:$0xff] }
 0x504   : > { %v6007_v13 = vpop.f32.mrb[238].mxu1 }
 0x505   : > { %v10859_v20 = vadd.f32 %v6129_v48, %v6065_v39  ;;  %v6130_v24 = vmul.f32 %v7653_v46, %v7653_v46  ;;  %v6009_v39 = vpop.f32.mrb[239].mxu1  ;;  %v11400_v48 = vld [vmem:[#allocation27_spill] sm:$0xff] }
 0x506   : > { %v5435_v53 = vpop.f32.mrb[240].mxu0  ;;  %v6067_v46 = vmul.f32 %v11400_v48, %v11400_v48 }
 0x507   : > { %11396 = vst [vmem:[#allocation50_spill] sm:$0xff] %v10859_v20  ;;  %v10861_v42 = vadd.f32 %v6130_v24, %v6066_v57  ;;  %v7654_v9 = vadd.f32 %v5435_v53, %v11398_v49  ;;  %v5437_v40 = vpop.f32.mrb[241].mxu0  ;;  %v11401_v24 = vld [vmem:[#allocation28_spill] sm:$0xff] }
 0x508   : > { %v5438_v1 = vpop.f32.mrb[242].mxu0  ;;  %v6068_v53 = vmul.f32 %v11401_v24, %v11401_v24 }
 0x509   : > { %11397 = vst [vmem:[#allocation51_spill] sm:$0xff] %v10861_v42  ;;  %v7656_v61 = vadd.f32 %v5438_v1, %v11399_v43  ;;  %v7655_v15 = vadd.f32 %v7654_v9, %v5980_v18  ;;  %v5440_v4 = vpop.f32.mrb[243].mxu0  ;;  %v11402_v18 = vld [vmem:[#allocation90_spill] sm:$0xff] }
 0x50b   : > { %v6131_v51 = vmul.f32 %v7655_v15, %v7655_v15  ;;  %v7657_v57 = vadd.f32 %v7656_v61, %v5983_v38  ;;  %v11404_v38 = vld [vmem:[#allocation29_spill] sm:$0xff] }
 0x50c   : > { %v6069_v15 = vmul.f32 %v11404_v38, %v11404_v38 }
 0x50d   : > { %v10871_v49 = vadd.f32 %v6131_v51, %v6067_v46  ;;  %v6132_v40 = vmul.f32 %v7657_v57, %v7657_v57  ;;  %v11405_v51 = vld [vmem:[#allocation30_spill] sm:$0xff] }
 0x50e   : > { %v5443_v50 = vpop.f32.mrb[244].mxu0  ;;  %v6070_v57 = vmul.f32 %v11405_v51, %v11405_v51 }
 0x50f   : > { %v10873_v43 = vadd.f32 %v6132_v40, %v6068_v53  ;;  %v7658_v1 = vadd.f32 %v5443_v50, %v11402_v18  ;;  %v5445_v9 = vpop.f32.mrb[245].mxu0 }
 0x510   : > { %v5446_v4 = vpop.f32.mrb[246].mxu0 }
 0x511   : > { %v7660_v39 = vadd.f32 %v5446_v4, %v11403_v5  ;;  %v7659_v20 = vadd.f32 %v7658_v1, %v5988_v55  ;;  %v5448_v42 = vpop.f32.mrb[247].mxu0  ;;  %v11406_v5 = vld [vmem:[#allocation92_spill] sm:$0xff]  ;;  %v11407_v1 = vld [vmem:[#allocation93_spill] sm:$0xff] }
 0x513   : > { %v6133_v48 = vmul.f32 %v7659_v20, %v7659_v20  ;;  %v7661_v46 = vadd.f32 %v7660_v39, %v5991_v12  ;;  %v11408_v20 = vld [vmem:[#allocation31_spill] sm:$0xff] }
 0x514   : > { %v6071_v39 = vmul.f32 %v11408_v20, %v11408_v20 }
 0x515   : > { %v10883_v24 = vadd.f32 %v6133_v48, %v6069_v15  ;;  %v6134_v53 = vmul.f32 %v7661_v46, %v7661_v46  ;;  %v11409_v48 = vld [vmem:[#allocation32_spill] sm:$0xff] }
 0x516   : > { %v5451_v40 = vpop.f32.mrb[248].mxu0  ;;  %v6072_v46 = vmul.f32 %v11409_v48, %v11409_v48 }
 0x517   : > { %v10885_v50 = vadd.f32 %v6134_v53, %v6070_v57  ;;  %v7662_v55 = vadd.f32 %v5451_v40, %v11406_v5  ;;  %v5453_v42 = vpop.f32.mrb[249].mxu0  ;;  %v11410_v5 = vld [vmem:[#allocation94_spill] sm:$0xff] }
 0x518   : > { %v5454_v18 = vpop.f32.mrb[250].mxu0  ;;  %v11411_v42 = vld [vmem:[#allocation95_spill] sm:$0xff] }
 0x519   : > { %v7664_v9 = vadd.f32 %v5454_v18, %v11407_v1  ;;  %v7663_v4 = vadd.f32 %v7662_v55, %v5996_v10  ;;  %v5456_v61 = vpop.f32.mrb[251].mxu0 }
 0x51b   : > { %v6135_v38 = vmul.f32 %v7663_v4, %v7663_v4  ;;  %v7665_v15 = vadd.f32 %v7664_v9, %v5999_v35  ;;  %v11412_v9 = vld [vmem:[#allocation33_spill] sm:$0xff] }
 0x51c   : > { %v6073_v4 = vmul.f32 %v11412_v9, %v11412_v9  ;;  %v6076_v9 = vmul.f32 %v10453_v28, %v10453_v28  ;;  %v11418_v28 = vpack.c.bf16 %v10620_v7, %v10618_v44  ;;  %v11422_v7 = vld [vmem:[#allocation35_spill] sm:$0xff] }
 0x51d   : > { %v10895_v51 = vadd.f32 %v6135_v38, %v6071_v39  ;;  %v6136_v57 = vmul.f32 %v7665_v15, %v7665_v15  ;;  %v11413_v38 = vld [vmem:[#allocation34_spill] sm:$0xff] }
 0x51e   : > { %v5459_v53 = vpop.f32.mrb[252].mxu0  ;;  %v6074_v15 = vmul.f32 %v11413_v38, %v11413_v38 }
 0x51f   : > { %v10897_v40 = vadd.f32 %v6136_v57, %v6072_v46  ;;  %v7666_v10 = vadd.f32 %v5459_v53, %v11410_v5  ;;  %v5461_v61 = vpop.f32.mrb[253].mxu0  ;;  %v11414_v5 = vld [vmem:[#allocation2_spill] sm:$0xff] }
 0x520   : > { %v5462_v55 = vpop.f32.mrb[254].mxu0  ;;  %v6075_v61 = vmul.f32 %v10450_v17, %v10450_v17  ;;  %v6077_v17 = vmul.f32 %v10464_v54, %v10464_v54 }
 0x521   : > { %v7668_v18 = vadd.f32 %v5462_v55, %v11411_v42  ;;  %v7667_v1 = vadd.f32 %v7666_v10, %v6004_v31  ;;  %v5464_v12 = vpop.f32.mrb[255].mxu0  ;;  %v7382_v35 = vpack.c.bf16 %v10897_v40, %v10895_v51  ;;  %v11415_v42 = vld [vmem:[#allocation3_spill] sm:$0xff]  ;;  %v6206_v51 = vld [vmem:[%s11143_s2 + $0x18] sm:$0xff] }
 0x522   : > { %v11461_v40 = vld [vmem:[#allocation49_spill] sm:$0xff] }
 0x523   : > { %v6137_v20 = vmul.f32 %v7667_v1, %v7667_v1  ;;  %v7669_v39 = vadd.f32 %v7668_v18, %v6007_v13 }
 0x525   : > { %v10907_v48 = vadd.f32 %v6137_v20, %v6073_v4  ;;  %v6138_v46 = vmul.f32 %v7669_v39, %v7669_v39 }
 0x526   : > { %v5500_v57 = vpop.f32.mrb[0].mxu0 }
 0x527   : > { %v10909_v53 = vadd.f32 %v6138_v46, %v6074_v15  ;;  %v7422_v31 = vadd.f32 %v5500_v57, %v11414_v5  ;;  %v5502_v12 = vpop.f32.mrb[1].mxu0  ;;  %v11416_v46 = vld [vmem:[#allocation4_spill] sm:$0xff] }
 0x528   : > { %v5503_v10 = vpop.f32.mrb[2].mxu0 }
 0x529   : > { %v6011_v55 = vmul.f32 %v7422_v31, %v7422_v31  ;;  %v7423_v1 = vadd.f32 %v5503_v10, %v11415_v42  ;;  %v5505_v13 = vpop.f32.mrb[3].mxu0  ;;  %v7386_v18 = vpack.c.bf16 %v10909_v53, %v10907_v48  ;;  %v11417_v10 = vld [vmem:[#allocation5_spill] sm:$0xff]  ;;  %v6209_v48 = vld [vmem:[%s11143_s2 + $0x30] sm:$0xff] }
 0x52a   : > { %v6214_v53 = vld [vmem:[%s11143_s2 + $0x58] sm:$0xff] }
 0x52b   : > { %v6139_v4 = vadd.f32 %v6075_v61, %v6011_v55  ;;  %v6012_v20 = vmul.f32 %v7423_v1, %v7423_v1  ;;  %v6078_v61 = vmul.f32 %v10467_v34, %v10467_v34  ;;  %v11421_v34 = vpack.c.bf16 %v10634_v16, %v10632_v33 }
 0x52c   : > { %v11426_v16 = vpack.c.bf16 %v10648_v58, %v10646_v11  ;;  %v11430_v11 = vpack.c.bf16 %v10672_v63, %v10670_v52  ;;  %v11431_v58 = vpack.c.bf16 %v10552_v27, %v10544_v59  ;;  %v6203_v59 = vld [vmem:[%s11143_s2] sm:$0xff]  ;;  %v11436_v27 = vpack.c.bf16 %v10823_v56, %v10821_v0  ;;  %v6220_v0 = vld [vmem:[%s11143_s2 + $0x88] sm:$0xff] }
 0x52d   : > { %v6140_v39 = vadd.f32 %v6076_v9, %v6012_v20  ;;  %v11439_v52 = vpack.c.bf16 %v10720_v29, %v10718_v47  ;;  %v6211_v63 = vld [vmem:[%s11143_s2 + $0x40] sm:$0xff]  ;;  %v11444_v47 = vld [vmem:[#allocation51_spill] sm:$0xff] }
 0x52e   : > { %v5508_v38 = vpop.f32.mrb[4].mxu0  ;;  %v11445_v29 = vld [vmem:[#allocation50_spill] sm:$0xff] }
 0x52f   : > { %v7328_v15 = vpack.c.bf16 %v6140_v39, %v6139_v4  ;;  %v7424_v57 = vadd.f32 %v5508_v38, %v11416_v46  ;;  %v5510_v5 = vpop.f32.mrb[5].mxu0  ;;  %v11419_v39 = vld [vmem:[#allocation6_spill] sm:$0xff]  ;;  %v11446_v56 = vpack.c.bf16 %v11444_v47, %v11445_v29 }
 0x530   : > { %v5511_v12 = vpop.f32.mrb[6].mxu0  ;;  %v11420_v5 = vld [vmem:[#allocation7_spill] sm:$0xff] }
 0x531   : > { %v6013_v31 = vmul.f32 %v7424_v57, %v7424_v57  ;;  %v7425_v42 = vadd.f32 %v5511_v12, %v11417_v10  ;;  %v5513_v13 = vpop.f32.mrb[7].mxu0  ;;  %7329 = vmatpush3.bf16.msra.mxu1 %v7328_v15  ;;  %v6079_v57 = vmul.f32 %v10480_v45, %v10480_v45 }
 0x532   : > { %7331 = vmatprep.subr.bf16.mxu1 %v11418_v28 }
 0x533   : > { %v6141_v55 = vadd.f32 %v6077_v17, %v6013_v31  ;;  %v6014_v1 = vmul.f32 %v7425_v42, %v7425_v42  ;;  %v6080_v17 = vmul.f32 %v11422_v7, %v11422_v7  ;;  %v11432_v7 = vpack.c.bf16 %v10684_v23, %v10682_v41  ;;  %v6216_v23 = vld [vmem:[%s11143_s2 + $0x68] sm:$0xff] }
 0x534   : > { %v11440_v41 = vpack.c.bf16 %v10849_v22, %v10847_v37  ;;  %v6219_v22 = vld [vmem:[%s11143_s2 + $0x80] sm:$0xff] }
 0x535   : > { %v6142_v9 = vadd.f32 %v6078_v61, %v6014_v1  ;;  %v11423_v61 = vld [vmem:[#allocation8_spill] sm:$0xff] }
 0x536   : > { %v5516_v4 = vpop.f32.mrb[8].mxu0 }
 0x537   : > { %v7332_v20 = vpack.c.bf16 %v6142_v9, %v6141_v55  ;;  %v7426_v38 = vadd.f32 %v5516_v4, %v11419_v39  ;;  %v5518_v54 = vpop.f32.mrb[9].mxu0  ;;  %v11424_v9 = vld [vmem:[#allocation36_spill] sm:$0xff]  ;;  %v11425_v39 = vld [vmem:[#allocation9_spill] sm:$0xff] }
 0x538   : > { %v5519_v46 = vpop.f32.mrb[10].mxu0  ;;  %v6081_v4 = vmul.f32 %v11424_v9, %v11424_v9  ;;  %v11427_v54 = vld [vmem:[#allocation37_spill] sm:$0xff]  ;;  %v11459_v9 = vld [vmem:[#allocation46_spill] sm:$0xff] }
 0x539   : > { %v6015_v15 = vmul.f32 %v7426_v38, %v7426_v38  ;;  %v7427_v12 = vadd.f32 %v5519_v46, %v11420_v5  ;;  %v5521_v44 = vpop.f32.mrb[11].mxu0  ;;  %7333 = vmatpush3.bf16.msra.mxu1 %v7332_v20  ;;  %v6082_v46 = vmul.f32 %v11427_v54, %v11427_v54  ;;  %v6217_v54 = vld [vmem:[%s11143_s2 + $0x70] sm:$0xff] }
 0x53a   : > { %7335 = vmatprep.subr.bf16.mxu1 %v11421_v34  ;;  %v11428_v44 = vpack.c.bf16 %v10660_v19, %v10658_v62  ;;  %v11429_v34 = vpack.c.bf16 %v10528_v8, %v10520_v60  ;;  %v11433_v62 = vpack.c.bf16 %v10576_v30, %v10568_v14  ;;  %v11434_v60 = vpack.c.bf16 %v10696_v21, %v10694_v36  ;;  %v6208_v14 = vld [vmem:[%s11143_s2 + $0x28] sm:$0xff]  ;;  %v11442_v21 = vld [vmem:[#allocation38_spill] sm:$0xff] }
 0x53b   : > { %v6143_v31 = vadd.f32 %v6079_v57, %v6015_v15  ;;  %v6016_v10 = vmul.f32 %v7427_v12, %v7427_v12  ;;  %v11435_v8 = vpack.c.bf16 %v10594_v6, %v10592_v26  ;;  %v11437_v30 = vpack.c.bf16 %v10708_v32, %v10706_v3  ;;  %v6207_v26 = vld [vmem:[%s11143_s2 + $0x20] sm:$0xff]  ;;  %v6212_v19 = vld [vmem:[%s11143_s2 + $0x48] sm:$0xff] }
 0x53c   : > { %v11438_v6 = vpack.c.bf16 %v10837_v25, %v10835_v2  ;;  %v11441_v36 = vld [vmem:[#allocation39_spill] sm:$0xff]  ;;  %v6215_v32 = vld [vmem:[%s11143_s2 + $0x60] sm:$0xff]  ;;  %v11447_v2 = vld [vmem:[#allocation41_spill] sm:$0xff] }
 0x53d   : > { %v6144_v42 = vadd.f32 %v6080_v17, %v6016_v10  ;;  %v11443_v3 = vpack.c.bf16 %v11441_v36, %v11442_v21  ;;  %v11448_v25 = vld [vmem:[#allocation40_spill] sm:$0xff]  ;;  %v11450_v17 = vpack.c.bf16 %v10873_v43, %v10871_v49  ;;  %v11451_v10 = vld [vmem:[#allocation43_spill] sm:$0xff]  ;;  %v11455_v43 = vld [vmem:[#allocation45_spill] sm:$0xff] }
 0x53e   : > { %v5524_v13 = vpop.f32.mrb[12].mxu0  ;;  %v11449_v37 = vpack.c.bf16 %v11447_v2, %v11448_v25  ;;  %v6228_v49 = vld [vmem:[%s11143_s2 + $0xc8] sm:$0xff] }
 0x53f   : > { %v7336_v28 = vpack.c.bf16 %v6144_v42, %v6143_v31  ;;  %v7428_v55 = vadd.f32 %v5524_v13, %v11423_v61  ;;  %v5526_v45 = vpop.f32.mrb[13].mxu0  ;;  %v6224_v31 = vld [vmem:[%s11143_s2 + $0xa8] sm:$0xff]  ;;  %v11452_v42 = vld [vmem:[#allocation42_spill] sm:$0xff]  ;;  %v11454_v61 = vpack.c.bf16 %v10885_v50, %v10883_v24 }
 0x540   : > { %v5527_v1 = vpop.f32.mrb[14].mxu0  ;;  %v11453_v13 = vpack.c.bf16 %v11451_v10, %v11452_v42  ;;  %v6232_v24 = vld [vmem:[%s11143_s2 + $0xe8] sm:$0xff] }
 0x541   : > { %v6017_v20 = vmul.f32 %v7428_v55, %v7428_v55  ;;  %v7429_v38 = vadd.f32 %v5527_v1, %v11425_v39  ;;  %v5529_v33 = vpop.f32.mrb[15].mxu0  ;;  %7337 = vmatpush3.bf16.msra.mxu1 %v7336_v28  ;;  %v6223_v28 = vld [vmem:[%s11143_s2 + $0xa0] sm:$0xff]  ;;  %v11456_v55 = vld [vmem:[#allocation44_spill] sm:$0xff]  ;;  %v11458_v50 = vld [vmem:[#allocation47_spill] sm:$0xff] }
 0x542   : > { %7339 = vmatprep.subr.bf16.mxu1 %v11426_v16  ;;  %v11457_v45 = vpack.c.bf16 %v11455_v43, %v11456_v55  ;;  %v6227_v1 = vld [vmem:[%s11143_s2 + $0xc0] sm:$0xff]  ;;  %v6210_v33 = vld [vmem:[%s11143_s2 + $0x38] sm:$0xff] }
 0x543   : > { %v6145_v57 = vadd.f32 %v6081_v4, %v6017_v20  ;;  %v6018_v15 = vmul.f32 %v7429_v38, %v7429_v38  ;;  %v11460_v4 = vpack.c.bf16 %v11458_v50, %v11459_v9  ;;  %v6231_v20 = vld [vmem:[%s11143_s2 + $0xe0] sm:$0xff]  ;;  %v6205_v38 = vld [vmem:[%s11143_s2 + $0x10] sm:$0xff]  ;;  %v6218_v16 = vld [vmem:[%s11143_s2 + $0x78] sm:$0xff] }
 0x545   : > { %v6146_v5 = vadd.f32 %v6082_v46, %v6018_v15  ;;  %v6222_v46 = vld [vmem:[%s11143_s2 + $0x98] sm:$0xff] }
 0x546   : > { %v6226_v15 = vld [vmem:[%s11143_s2 + $0xb8] sm:$0xff] }
 0x547   : > { %v7340_v12 = vpack.c.bf16 %v6146_v5, %v6145_v57  ;;  %v6221_v57 = vld [vmem:[%s11143_s2 + $0x90] sm:$0xff] }
 0x548   : > { %v6225_v5 = vld [vmem:[%s11143_s2 + $0xb0] sm:$0xff] }
 0x549   : > { %7341 = vmatpush3.bf16.msra.mxu1 %v7340_v12  ;;  %v6230_v12 = vld [vmem:[%s11143_s2 + $0xd8] sm:$0xff] }
 0x54a   : > { %7343 = vmatprep.subr.bf16.mxu1 %v11428_v44  ;;  %v6229_v44 = vld [vmem:[%s11143_s2 + $0xd0] sm:$0xff] }
 0x54d   : > { %7345 = vmatpush3.bf16.msra.mxu1 %v11429_v34  ;;  %v6234_v34 = vld [vmem:[%s11143_s2 + $0xf8] sm:$0xff] }
 0x54e   : > { %7347 = vmatprep.subr.bf16.mxu1 %v11430_v11  ;;  %v6233_v11 = vld [vmem:[%s11143_s2 + $0xf0] sm:$0xff] }
 0x551   : > { %7349 = vmatpush3.bf16.msra.mxu1 %v11431_v58 }
 0x552   : > { %7351 = vmatprep.subr.bf16.mxu1 %v11432_v7 }
 0x555   : > { %7353 = vmatpush3.bf16.msra.mxu1 %v11433_v62 }
 0x556   : > { %7355 = vmatprep.subr.bf16.mxu1 %v11434_v60 }
 0x559   : > { %7357 = vmatpush3.bf16.msra.mxu1 %v11435_v8 }
 0x55a   : > { %7359 = vmatprep.subr.bf16.mxu1 %v11436_v27 }
 0x55c   : > { %6300 = vmatmul.mubr.f32.vlgmr.msra.gmra.mrb[240].mxu1 %v6203_v59 }
 0x55d   : > { %7361 = vmatpush3.bf16.msra.mxu1 %v11437_v30  ;;  %6304 = vmatprep.mubr.f32.mxu1 %v6208_v14 }
 0x55e   : > { %7363 = vmatprep.subr.bf16.mxu1 %v11438_v6 }
 0x560   : > { %6305 = vmatmul.mubr.f32.gmra.mrb[242].mxu1 %v6207_v26 }
 0x561   : > { %7365 = vmatpush3.bf16.msra.mxu1 %v11439_v52  ;;  %6309 = vmatprep.mubr.f32.mxu1 %v6212_v19 }
 0x562   : > { %7367 = vmatprep.subr.bf16.mxu1 %v11440_v41 }
 0x564   : > { %6310 = vmatmul.mubr.f32.gmra.mrb[244].mxu1 %v6211_v63 }
 0x565   : > { %7369 = vmatpush3.bf16.msra.mxu1 %v11443_v3  ;;  %6314 = vmatprep.mubr.f32.mxu1 %v6216_v23 }
 0x566   : > { %7371 = vmatprep.subr.bf16.mxu1 %v11446_v56 }
 0x568   : > { %6315 = vmatmul.mubr.f32.gmra.mrb[246].mxu1 %v6215_v32 }
 0x569   : > { %7373 = vmatpush3.bf16.msra.mxu1 %v11449_v37  ;;  %6319 = vmatprep.mubr.f32.mxu1 %v6220_v0 }
 0x56a   : > { %7375 = vmatprep.subr.bf16.mxu1 %v11450_v17 }
 0x56c   : > { %6320 = vmatmul.mubr.f32.gmra.mrb[248].mxu1 %v6219_v22 }
 0x56d   : > { %7377 = vmatpush3.bf16.msra.mxu1 %v11453_v13  ;;  %6324 = vmatprep.mubr.f32.mxu1 %v6224_v31 }
 0x56e   : > { %7379 = vmatprep.subr.bf16.mxu1 %v11454_v61 }
 0x570   : > { %6325 = vmatmul.mubr.f32.gmra.mrb[250].mxu1 %v6223_v28 }
 0x571   : > { %7381 = vmatpush3.bf16.msra.mxu1 %v11457_v45  ;;  %6329 = vmatprep.mubr.f32.mxu1 %v6228_v49 }
 0x572   : > { %7383 = vmatprep.subr.bf16.mxu1 %v7382_v35  ;;  %v11462_v35 = vld [vmem:[#allocation48_spill] sm:$0xff] }
 0x573   : > { %v11463_v39 = vpack.c.bf16 %v11461_v40, %v11462_v35 }
 0x574   : > { %6330 = vmatmul.mubr.f32.gmra.mrb[252].mxu1 %v6227_v1 }
 0x575   : > { %7385 = vmatpush3.bf16.msra.mxu1 %v11460_v4  ;;  %6334 = vmatprep.mubr.f32.mxu1 %v6232_v24 }
 0x576   : > { %7387 = vmatprep.subr.bf16.mxu1 %v7386_v18  ;;  %v6213_v18 = vld [vmem:[%s11143_s2 + $0x50] sm:$0xff] }
 0x578   : > { %6335 = vmatmul.mubr.f32.gmra.mrb[254].mxu1 %v6231_v20 }
 0x579   : > { %7389 = vmatpush3.bf16.msra.mxu1 %v11463_v39  ;;  %6404 = vmatprep.mubr.f32.mxu1 %v6206_v51 }
 0x57c   : > { %6405 = vmatmul.mubr.f32.vlgmr.msra.gmra.mrb[0].mxu1 %v6205_v38 }
 0x57d   : > { %6409 = vmatprep.mubr.f32.mxu1 %v6210_v33 }
 0x580   : > { %6410 = vmatmul.mubr.f32.gmra.mrb[2].mxu1 %v6209_v48 }
 0x581   : > { %6414 = vmatprep.mubr.f32.mxu1 %v6214_v53 }
 0x584   : > { %6415 = vmatmul.mubr.f32.gmra.mrb[4].mxu1 %v6213_v18 }
 0x585   : > { %6419 = vmatprep.mubr.f32.mxu1 %v6218_v16 }
 0x588   : > { %6420 = vmatmul.mubr.f32.gmra.mrb[6].mxu1 %v6217_v54 }
 0x589   : > { %6424 = vmatprep.mubr.f32.mxu1 %v6222_v46 }
 0x58c   : > { %6425 = vmatmul.mubr.f32.gmra.mrb[8].mxu1 %v6221_v57 }
 0x58d   : > { %6429 = vmatprep.mubr.f32.mxu1 %v6226_v15 }
 0x590   : > { %6430 = vmatmul.mubr.f32.gmra.mrb[10].mxu1 %v6225_v5 }
 0x591   : > { %6434 = vmatprep.mubr.f32.mxu1 %v6230_v12 }
 0x594   : > { %6435 = vmatmul.mubr.f32.gmra.mrb[12].mxu1 %v6229_v44 }
 0x595   : > { %6439 = vmatprep.mubr.f32.mxu1 %v6234_v34 }
 0x598   : > { %6440 = vmatmul.mubr.f32.gmra.mrb[14].mxu1 %v6233_v11 }
 0x62f   : > { %v7246_v58 = vpop.f32.mrb[240].mxu1 }
 0x630   : > { %v7247_v7 = vpop.f32.mrb[241].mxu1 }
 0x631   : > { %v7248_v62 = vadd.f32 %v7247_v7, %v7246_v58 }
 0x633   : > { %v7249_v60 = vpop.f32.mrb[242].mxu1 }
 0x634   : > { %v7250_v8 = vpop.f32.mrb[243].mxu1 }
 0x635   : > { %v7251_v59 = vadd.f32 %v7250_v8, %v7249_v60 }
 0x637   : > { %v7252_v27 = vpop.f32.mrb[244].mxu1 }
 0x638   : > { %v7253_v14 = vpop.f32.mrb[245].mxu1 }
 0x639   : > { %v7254_v30 = vadd.f32 %v7253_v14, %v7252_v27 }
 0x63b   : > { %v7255_v26 = vpop.f32.mrb[246].mxu1 }
 0x63c   : > { %v7256_v6 = vpop.f32.mrb[247].mxu1 }
 0x63d   : > { %v7257_v19 = vadd.f32 %v7256_v6, %v7255_v26 }
 0x63f   : > { %v7258_v52 = vpop.f32.mrb[248].mxu1 }
 0x640   : > { %v7259_v63 = vpop.f32.mrb[249].mxu1 }
 0x641   : > { %v7260_v41 = vadd.f32 %v7259_v63, %v7258_v52 }
 0x643   : > { %v7261_v23 = vpop.f32.mrb[250].mxu1 }
 0x644   : > { %v7262_v36 = vpop.f32.mrb[251].mxu1 }
 0x645   : > { %v7263_v21 = vadd.f32 %v7262_v36, %v7261_v23 }
 0x647   : > { %v7264_v3 = vpop.f32.mrb[252].mxu1 }
 0x648   : > { %v7265_v32 = vpop.f32.mrb[253].mxu1 }
 0x649   : > { %v7266_v47 = vadd.f32 %v7265_v32, %v7264_v3 }
 0x64b   : > { %v7267_v29 = vpop.f32.mrb[254].mxu1 }
 0x64c   : > { %v7268_v56 = vpop.f32.mrb[255].mxu1 }
 0x64d   : > { %v11111_v0 = vadd.f32 %v7268_v56, %v7267_v29 }
 0x64f   : > { %v7302_v2 = vpop.f32.mrb[0].mxu1 }
 0x650   : > { %v7303_v25 = vpop.f32.mrb[1].mxu1 }
 0x651   : > { %v7304_v37 = vadd.f32 %v7303_v25, %v7302_v2 }
 0x653   : > { %v6407_v22 = vadd.f32 %v7304_v37, %v7248_v62  ;;  %v7305_v17 = vpop.f32.mrb[2].mxu1 }
 0x654   : > { %v7306_v31 = vpop.f32.mrb[3].mxu1 }
 0x655   : > { %v6445_v10 = vmax.f32 %v6407_v22, 1e-10  ;;  %v7307_v42 = vadd.f32 %v7306_v31, %v7305_v17 }
 0x657   : > { %8031 = vlog2.f32 %v6445_v10  ;;  %v6412_v13 = vadd.f32 %v7307_v42, %v7251_v59  ;;  %v7308_v28 = vpop.f32.mrb[4].mxu1 }
 0x658   : > { %v7309_v61 = vpop.f32.mrb[5].mxu1 }
 0x659   : > { %v6446_v49 = vmax.f32 %v6412_v13, 1e-10  ;;  %v7310_v43 = vadd.f32 %v7309_v61, %v7308_v28 }
 0x65b   : > { %8033 = vlog2.f32 %v6446_v49  ;;  %v6417_v55 = vadd.f32 %v7310_v43, %v7254_v30  ;;  %v7311_v45 = vpop.f32.mrb[6].mxu1 }
 0x65c   : > { %v7312_v1 = vpop.f32.mrb[7].mxu1 }
 0x65d   : > { %v6447_v24 = vmax.f32 %v6417_v55, 1e-10  ;;  %v7313_v50 = vadd.f32 %v7312_v1, %v7311_v45 }
 0x65f   : > { %8035 = vlog2.f32 %v6447_v24  ;;  %v6422_v9 = vadd.f32 %v7313_v50, %v7257_v19  ;;  %v7314_v4 = vpop.f32.mrb[8].mxu1 }
 0x660   : > { %v7315_v20 = vpop.f32.mrb[9].mxu1 }
 0x661   : > { %v8032_v51 = vpop.eup %8031  ;;  %v6448_v40 = vmax.f32 %v6422_v9, 1e-10  ;;  %v7316_v35 = vadd.f32 %v7315_v20, %v7314_v4 }
 0x662   : > { %v6454_v39 = vmul.f32 0.6931472, %v8032_v51 }
 0x663   : > { %8037 = vlog2.f32 %v6448_v40  ;;  %v6427_v38 = vadd.f32 %v7316_v35, %v7260_v41  ;;  %v7317_v33 = vpop.f32.mrb[10].mxu1 }
 0x664   : > { %v6469_v48 = vmul.f32 0.4342945, %v6454_v39  ;;  %v7318_v53 = vpop.f32.mrb[11].mxu1 }
 0x665   : > { %v8034_v18 = vpop.eup %8033  ;;  %v6449_v16 = vmax.f32 %v6427_v38, 1e-10  ;;  %v7319_v54 = vadd.f32 %v7318_v53, %v7317_v33 }
 0x666   : > { %v6477_v46 = vmul.f32 10.0, %v6469_v48  ;;  %v6456_v57 = vmul.f32 0.6931472, %v8034_v18 }
 0x667   : > { %8039 = vlog2.f32 %v6449_v16  ;;  %v6432_v15 = vadd.f32 %v7319_v54, %v7263_v21  ;;  %v7320_v5 = vpop.f32.mrb[12].mxu1 }
 0x668   : > { %6485 = vst [vmem:[%s11117_s7] sm:$0xff] %v6477_v46  ;;  %v6470_v12 = vmul.f32 0.4342945, %v6456_v57  ;;  %v7321_v44 = vpop.f32.mrb[13].mxu1 }
 0x669   : > { %v8036_v34 = vpop.eup %8035  ;;  %v6450_v11 = vmax.f32 %v6432_v15, 1e-10  ;;  %v7322_v58 = vadd.f32 %v7321_v44, %v7320_v5 }
 0x66a   : > { %v6478_v7 = vmul.f32 10.0, %v6470_v12  ;;  %v6458_v62 = vmul.f32 0.6931472, %v8036_v34 }
 0x66b   : > { %8041 = vlog2.f32 %v6450_v11  ;;  %v6437_v60 = vadd.f32 %v7322_v58, %v7266_v47  ;;  %v7323_v8 = vpop.f32.mrb[14].mxu1 }
 0x66c   : > { %6486 = vst [vmem:[%s11117_s7 + $0x8] sm:$0xff] %v6478_v7  ;;  %v6471_v59 = vmul.f32 0.4342945, %v6458_v62  ;;  %v7324_v27 = vpop.f32.mrb[15].mxu1 }
 0x66d   : > { %v8038_v14 = vpop.eup %8037  ;;  %v6451_v30 = vmax.f32 %v6437_v60, 1e-10  ;;  %v7325_v26 = vadd.f32 %v7324_v27, %v7323_v8 }
 0x66e   : > { %v6479_v6 = vmul.f32 10.0, %v6471_v59  ;;  %v6460_v19 = vmul.f32 0.6931472, %v8038_v14 }
 0x66f   : > { %8043 = vlog2.f32 %v6451_v30  ;;  %v6442_v52 = vadd.f32 %v7325_v26, %v11111_v0 }
 0x670   : > { %6487 = vst [vmem:[%s11117_s7 + $0x10] sm:$0xff] %v6479_v6  ;;  %v6472_v63 = vmul.f32 0.4342945, %v6460_v19 }
 0x671   : > { %v8040_v41 = vpop.eup %8039  ;;  %v6452_v23 = vmax.f32 %v6442_v52, 1e-10 }
 0x672   : > { %v6480_v36 = vmul.f32 10.0, %v6472_v63  ;;  %v6462_v21 = vmul.f32 0.6931472, %v8040_v41 }
 0x673   : > { %8045 = vlog2.f32 %v6452_v23 }
 0x674   : > { %6488 = vst [vmem:[%s11117_s7 + $0x18] sm:$0xff] %v6480_v36  ;;  %v6473_v3 = vmul.f32 0.4342945, %v6462_v21 }
 0x675   : > { %v8042_v32 = vpop.eup %8041 }
 0x676   : > { %v6481_v47 = vmul.f32 10.0, %v6473_v3  ;;  %v6464_v29 = vmul.f32 0.6931472, %v8042_v32 }
 0x678   : > { %6489 = vst [vmem:[%s11117_s7 + $0x20] sm:$0xff] %v6481_v47  ;;  %v6493_v56 = vmax.f32 %v6477_v46, %v6481_v47  ;;  %v6474_v2 = vmul.f32 0.4342945, %v6464_v29 }
 0x679   : > { %v8044_v25 = vpop.eup %8043 }
 0x67a   : > { %v6482_v0 = vmul.f32 10.0, %v6474_v2  ;;  %v6466_v37 = vmul.f32 0.6931472, %v8044_v25 }
 0x67c   : > { %6490 = vst [vmem:[%s11117_s7 + $0x28] sm:$0xff] %v6482_v0  ;;  %v6494_v22 = vmax.f32 %v6478_v7, %v6482_v0  ;;  %v6475_v17 = vmul.f32 0.4342945, %v6466_v37 }
 0x67d   : > { %v8046_v31 = vpop.eup %8045 }
 0x67e   : > { %v6497_v10 = vmax.f32 %v6493_v56, %v6494_v22  ;;  %v6483_v42 = vmul.f32 10.0, %v6475_v17  ;;  %v6468_v13 = vmul.f32 0.6931472, %v8046_v31 }
 0x680   : > { %6491 = vst [vmem:[%s11117_s7 + $0x30] sm:$0xff] %v6483_v42  ;;  %v6495_v28 = vmax.f32 %v6479_v6, %v6483_v42  ;;  %v6476_v61 = vmul.f32 0.4342945, %v6468_v13 }
 0x682   : > { %v6484_v49 = vmul.f32 10.0, %v6476_v61 }
 0x684   : > { %6492 = vst [vmem:[%s11117_s7 + $0x38] sm:$0xff] %v6484_v49  ;;  %v6496_v43 = vmax.f32 %v6480_v36, %v6484_v49 }
 0x686   : > { %v6498_v55 = vmax.f32 %v6495_v28, %v6496_v43 }
 0x688   : > { %v6499_v45 = vmax.f32 %v6497_v10, %v6498_v55 }
 0x68a   : > { %v6500_v1 = vrot.slane %v6499_v45, 4 }
 0x68c   : > { %v6501_v24 = vmax.f32 %v6499_v45, %v6500_v1 }
 0x68e   : > { %v6502_v50 = vrot.slane %v6501_v24, 2 }
 0x690   : > { %v6503_v9 = vmax.f32 %v6501_v24, %v6502_v50 }
 0x692   : > { %v6504_v4 = vrot.slane %v6503_v9, 1 }
 0x694   : > { %v6505_v20 = vmax.f32 %v6503_v9, %v6504_v4 }
 0x696   : > { %6506 = vst [vmem:[%s245_s10] sm:$0x1] %v6505_v20 }
 0x697 PF: > { %s15_s17 = sadd.s32 1, %s8069_s17   ;;  %s11464_s15 = smov %s8065_s16 }
 0x698   : > { %p12_p5 = scmp.ge.s32.totalorder %s15_s17, 4   ;;  %s11465_s16 = smov %s11467_s18 }
 0x69a   :  { %14 = sbr.rel (!%p12_p5) target bundleno = 2 (0x2), region = 74 }

</bundles_post_ra>
